<compile_context>
chip_gen: v7x
topology: tpu7x:2x2x1
jax: 0.10.0
libtpu: 0.0.40
codegen_flags: <defaults>
</compile_context>

<pallas_src>
import math
from functools import partial

import numpy as np
import jax
import jax.numpy as jnp
from jax.experimental import pallas as pl
from jax.experimental.pallas import tpu as pltpu

# ----------------------------- configuration --------------------------------
PATCH_SIZE = 4
NUM_PATCHES = 16          # 4x4 grid
IN_CHANNELS = 3
DEPTH = 2
EMBED_DIM = 32
IN_DIM = 48
NUM_HEADS = 4
MLP_RATIO = 4
LN_EPS = 1e-6
BATCH = 2
N_UNMASKED = 9            # cls token + 8 visible patches

HEAD_DIM = EMBED_DIM // NUM_HEADS
HIDDEN = MLP_RATIO * EMBED_DIM
OUT_DIM = PATCH_SIZE ** 2 * IN_CHANNELS
N_TOKENS = NUM_PATCHES + 1


# ----------------------------- sincos pos embed ------------------------------
def _get_1d_sincos(embed_dim, pos):
    omega = np.arange(embed_dim // 2, dtype=np.float64)
    omega /= embed_dim / 2.0
    omega = 1.0 / 10000 ** omega
    pos = pos.reshape(-1)
    out = np.einsum("m,d->md", pos, omega)
    return np.concatenate([np.sin(out), np.cos(out)], axis=1)


def get_2d_sincos_pos_embed(embed_dim, grid_size, cls_token=False):
    grid_h = np.arange(grid_size, dtype=np.float32)
    grid_w = np.arange(grid_size, dtype=np.float32)
    grid = np.meshgrid(grid_w, grid_h)          # w goes first (MAE convention)
    grid = np.stack(grid, axis=0).reshape([2, 1, grid_size, grid_size])
    emb_h = _get_1d_sincos(embed_dim // 2, grid[0])
    emb_w = _get_1d_sincos(embed_dim // 2, grid[1])
    pos = np.concatenate([emb_h, emb_w], axis=1)
    if cls_token:
        pos = np.concatenate([np.zeros([1, embed_dim]), pos], axis=0)
    return pos.astype(np.float32)


# ----------------------------- in-kernel helpers -----------------------------
def _erf(x):
    # Abramowitz & Stegun 7.1.26 polynomial erf (abs err ~1.5e-7 ~= f32 eps);
    # PyTorch nn.GELU() is the exact erf-based GELU.
    a1, a2, a3, a4, a5 = 0.254829592, -0.284496736, 1.421413741, -1.453152027, 1.061405429
    p = 0.3275911
    z = jnp.abs(x)
    t = 1.0 / (1.0 + p * z)
    poly = ((((a5 * t + a4) * t + a3) * t + a2) * t + a1) * t
    y = 1.0 - poly * jnp.exp(-z * z)
    return jnp.where(x >= 0.0, y, -y)


def _gelu(x):
    return 0.5 * x * (1.0 + _erf(x * 0.7071067811865476))


def _layernorm(x, w, b, eps):
    mu = jnp.mean(x, axis=-1, keepdims=True)
    var = jnp.mean(jnp.square(x - mu), axis=-1, keepdims=True)
    return (x - mu) * jax.lax.rsqrt(var + eps) * w + b


# ----------------------------- the fused kernel -------------------------------
def decoder_kernel(
    idx_ref,                                   # SMEM (B, NUM_PATCHES) int32 (scalar prefetch)
    x_ref, embw_ref, embb_ref, mask_ref, pos_ref,
    fln_ref, headw_ref, headb_ref,
    ln_ref, wqkv_ref, bqkv_ref, wproj_ref, bproj_ref,
    wfc1_ref, bfc1_ref, wfc2_ref, bfc2_ref,
    out_ref,
    acts_ref, stage_ref,
    *, batch, n_unmasked, n_patches, num_heads, head_dim, eps):

    n_tok = n_patches + 1
    d = num_heads * head_dim
    layer = pl.program_id(0)
    n_layers = pl.num_programs(0)

    # ------------- prologue: embed + un-shuffle + pos add (first step) --------
    @pl.when(layer == 0)
    def _prologue():
        # Embed each batch's tokens into the staging buffer; last staging row
        # holds the mask token so the un-shuffle below is a pure row gather.
        for b in range(batch):
            xe_b = (jnp.dot(x_ref[b], embw_ref[...],
                            preferred_element_type=jnp.float32) + embb_ref[...])
            stage_ref[pl.ds(b * n_unmasked, n_unmasked), :] = xe_b
        stage_ref[pl.ds(batch * n_unmasked, 1), :] = mask_ref[...]

        # Output token (b, 1+i) = embedded token (b, 1 + idx[b, i]) if it was
        # visible, else the shared mask row; token (b, 0) is the cls token.
        mask_row = batch * n_unmasked
        for b in range(batch):
            acts_ref[pl.ds(b * n_tok, 1), :] = stage_ref[pl.ds(b * n_unmasked, 1), :]
            for i in range(n_patches):
                j = idx_ref[b, i]
                src = jnp.where(j < n_unmasked - 1,
                                b * n_unmasked + 1 + j, mask_row)
                acts_ref[pl.ds(b * n_tok + 1 + i, 1), :] = stage_ref[pl.ds(src, 1), :]

        pos = pos_ref[...]                                         # (n_tok, d)
        acts_ref[...] = acts_ref[...] + jnp.concatenate([pos] * batch, axis=0)

    # ------------- transformer block for this grid step (layer `layer`) -------
    x = acts_ref[...]                                              # (B*n_tok, d)
    lnp = ln_ref[0]                                                # (4, d)

    xn = _layernorm(x, lnp[0:1], lnp[1:2], eps)
    # one fused QKV matmul for the whole batch; q columns are pre-scaled.
    qkv = (jnp.dot(xn, wqkv_ref[0], preferred_element_type=jnp.float32)
           + bqkv_ref[0])                                          # (B*n_tok, 3d)

    heads = []
    for b in range(batch):                                         # static, B=2
        qkv_b = qkv[b * n_tok:(b + 1) * n_tok]                     # (n_tok, 3d)
        outs = []
        for h in range(num_heads):                                 # static, 4
            q = qkv_b[:, h * head_dim:(h + 1) * head_dim]
            k = qkv_b[:, d + h * head_dim: d + (h + 1) * head_dim]
            v = qkv_b[:, 2 * d + h * head_dim: 2 * d + (h + 1) * head_dim]
            s = jax.lax.dot_general(q, k, (((1,), (1,)), ((), ())),
                                    preferred_element_type=jnp.float32)
            s = s - jnp.max(s, axis=-1, keepdims=True)
            e = jnp.exp(s)
            p = e * pl.reciprocal(jnp.sum(e, axis=-1, keepdims=True), approx=True)
            outs.append(jnp.dot(p, v, preferred_element_type=jnp.float32))
        heads.append(jnp.concatenate(outs, axis=1))                # (n_tok, d)
    attn = jnp.concatenate(heads, axis=0)                          # (B*n_tok, d)
    attn = (jnp.dot(attn, wproj_ref[0], preferred_element_type=jnp.float32)
            + bproj_ref[0])
    x = x + attn

    xn2 = _layernorm(x, lnp[2:3], lnp[3:4], eps)
    h1 = (jnp.dot(xn2, wfc1_ref[0], preferred_element_type=jnp.float32)
          + bfc1_ref[0])
    h1 = _gelu(h1)
    h2 = (jnp.dot(h1, wfc2_ref[0], preferred_element_type=jnp.float32)
          + bfc2_ref[0])
    x = x + h2
    acts_ref[...] = x

    # ------------- epilogue: final LN + head, drop cls token (last step) ------
    @pl.when(layer == n_layers - 1)
    def _epilogue():
        fl = fln_ref[...]                                          # (2, d)
        yn = _layernorm(x, fl[0:1], fl[1:2], eps)
        y = (jnp.dot(yn, headw_ref[...], preferred_element_type=jnp.float32)
             + headb_ref[...])                                     # (B*n_tok, P)
        for b in range(batch):
            out_ref[b] = y[b * n_tok + 1:(b + 1) * n_tok].astype(out_ref.dtype)


# ----------------------------- wrapper ----------------------------------------
def decoder_forward(x, idx_restore, params):
    batch, n_unmasked, in_dim = x.shape
    n_patches = idx_restore.shape[1]
    n_tok = n_patches + 1
    d = EMBED_DIM

    def g2(l, idx):            # constant 2-D block (loaded once)
        return (0, 0)

    def g3(l, idx):            # constant 3-D block
        return (0, 0, 0)

    def per_layer(l, idx):     # stream layer l's weights
        return (l, 0, 0)

    kernel = partial(decoder_kernel, batch=batch, n_unmasked=n_unmasked,
                     n_patches=n_patches, num_heads=NUM_HEADS,
                     head_dim=HEAD_DIM, eps=LN_EPS)

    grid_spec = pltpu.PrefetchScalarGridSpec(
        num_scalar_prefetch=1,
        grid=(DEPTH,),
        in_specs=[
            pl.BlockSpec((batch, n_unmasked, in_dim), g3),   # x
            pl.BlockSpec((in_dim, d), g2),                   # embed_w
            pl.BlockSpec((1, d), g2),                        # embed_b
            pl.BlockSpec((1, d), g2),                        # mask_token
            pl.BlockSpec((n_tok, d), g2),                    # pos_embed
            pl.BlockSpec((2, d), g2),                        # final LN (w, b)
            pl.BlockSpec((d, OUT_DIM), g2),                  # head_w
            pl.BlockSpec((1, OUT_DIM), g2),                  # head_b
            pl.BlockSpec((1, 4, d), per_layer),              # ln1w/ln1b/ln2w/ln2b
            pl.BlockSpec((1, d, 3 * d), per_layer),          # wqkv (q pre-scaled)
            pl.BlockSpec((1, 1, 3 * d), per_layer),          # bqkv
            pl.BlockSpec((1, d, d), per_layer),              # wproj
            pl.BlockSpec((1, 1, d), per_layer),              # bproj
            pl.BlockSpec((1, d, HIDDEN), per_layer),         # wfc1
            pl.BlockSpec((1, 1, HIDDEN), per_layer),         # bfc1
            pl.BlockSpec((1, HIDDEN, d), per_layer),         # wfc2
            pl.BlockSpec((1, 1, d), per_layer),              # bfc2
        ],
        out_specs=pl.BlockSpec((batch, n_patches, OUT_DIM), g3),
        scratch_shapes=[
            pltpu.VMEM((batch * n_tok, d), jnp.float32),            # resident acts
            pltpu.VMEM((batch * n_unmasked + 1, d), jnp.float32),   # embed+mask stage
        ],
    )

    return pl.pallas_call(
        kernel,
        out_shape=jax.ShapeDtypeStruct((batch, n_patches, OUT_DIM), x.dtype),
        grid_spec=grid_spec,
        compiler_params=pltpu.CompilerParams(
            dimension_semantics=("arbitrary",)),
    )(idx_restore.astype(jnp.int32), x,
      params["embed_w"], params["embed_b"], params["mask_token"],
      params["pos_embed"], params["final_ln"], params["head_w"],
      params["head_b"],
      params["ln"], params["wqkv"], params["bqkv"], params["wproj"],
      params["bproj"], params["wfc1"], params["bfc1"], params["wfc2"],
      params["bfc2"])


# ----------------------------- parameter init --------------------------------
def xavier_uniform(key, fan_in, fan_out, shape):
    limit = math.sqrt(6.0 / (fan_in + fan_out))
    return jax.random.uniform(key, shape, jnp.float32, -limit, limit)


def init_params(key):
    D, H, P = EMBED_DIM, HIDDEN, OUT_DIM
    keys = jax.random.split(key, 3 + DEPTH)
    scale = HEAD_DIM ** -0.5

    params = {
        "embed_w": xavier_uniform(keys[0], IN_DIM, D, (IN_DIM, D)),
        "embed_b": jnp.zeros((1, D), jnp.float32),
        "mask_token": 0.02 * jax.random.normal(keys[1], (1, D), jnp.float32),
        "pos_embed": jnp.asarray(
            get_2d_sincos_pos_embed(D, int(NUM_PATCHES ** 0.5), cls_token=True)),
        "final_ln": jnp.concatenate(
            [jnp.ones((1, D), jnp.float32), jnp.zeros((1, D), jnp.float32)],
            axis=0),
        "head_w": xavier_uniform(keys[2], D, P, (D, P)),
        "head_b": jnp.zeros((1, P), jnp.float32),
    }

    ln, wqkv, bqkv, wproj, bproj, wfc1, bfc1, wfc2, bfc2 = ([] for _ in range(9))
    for i in range(DEPTH):
        bk = jax.random.split(keys[3 + i], 3)
        qkv = xavier_uniform(bk[0], D, 3 * D, (D, 3 * D))
        # fold the 1/sqrt(head_dim) attention scale into q weights ONCE at init
        # (one-time param transform; kernel never multiplies by the scale).
        qkv = jnp.concatenate([qkv[:, :D] * scale, qkv[:, D:]], axis=1)
        ln.append(jnp.concatenate(
            [jnp.ones((1, D)), jnp.zeros((1, D)),
             jnp.ones((1, D)), jnp.zeros((1, D))], axis=0).astype(jnp.float32))
        wqkv.append(qkv)
        bqkv.append(jnp.zeros((1, 3 * D), jnp.float32))
        wproj.append(xavier_uniform(bk[1], D, D, (D, D)))
        bproj.append(jnp.zeros((1, D), jnp.float32))
        wfc1.append(xavier_uniform(bk[2], D, H, (D, H)))
        bfc1.append(jnp.zeros((1, H), jnp.float32))
        wfc2.append(xavier_uniform(jax.random.fold_in(bk[2], 1), H, D, (H, D)))
        bfc2.append(jnp.zeros((1, D), jnp.float32))

    params.update(
        ln=jnp.stack(ln), wqkv=jnp.stack(wqkv), bqkv=jnp.stack(bqkv),
        wproj=jnp.stack(wproj), bproj=jnp.stack(bproj),
        wfc1=jnp.stack(wfc1), bfc1=jnp.stack(bfc1),
        wfc2=jnp.stack(wfc2), bfc2=jnp.stack(bfc2))
    return params


# ----------------------------- pure-JAX reference -----------------------------
def reference_forward(x, idx_restore, params):
    B, nu, _ = x.shape
    D = EMBED_DIM
    xe = x @ params["embed_w"] + params["embed_b"]                  # (B, nu, D)
    n = idx_restore.shape[1]
    n_masked = n + 1 - nu
    mask = jnp.broadcast_to(params["mask_token"].reshape(1, 1, D), (B, n_masked, D))
    temp = jnp.concatenate([xe[:, 1:, :], mask], axis=1)
    temp = jnp.take_along_axis(temp, idx_restore[:, :, None].astype(jnp.int32), axis=1)
    h = jnp.concatenate([xe[:, :1, :], temp], axis=1) + params["pos_embed"][None]

    def ln(z, w, b):
        mu = z.mean(-1, keepdims=True)
        var = ((z - mu) ** 2).mean(-1, keepdims=True)
        return (z - mu) / jnp.sqrt(var + LN_EPS) * w + b

    for l in range(DEPTH):
        lnp = params["ln"][l]
        z = ln(h, lnp[0], lnp[1])
        qkv = z @ params["wqkv"][l] + params["bqkv"][l]             # (B, N, 3D)
        q, k, v = qkv[..., :D], qkv[..., D:2 * D], qkv[..., 2 * D:]
        q = q.reshape(B, -1, NUM_HEADS, HEAD_DIM).transpose(0, 2, 1, 3)
        k = k.reshape(B, -1, NUM_HEADS, HEAD_DIM).transpose(0, 2, 1, 3)
        v = v.reshape(B, -1, NUM_HEADS, HEAD_DIM).transpose(0, 2, 1, 3)
        s = q @ jnp.swapaxes(k, -1, -2)      # scale already folded into wqkv
        p = jax.nn.softmax(s, axis=-1)
        o = (p @ v).transpose(0, 2, 1, 3).reshape(B, -1, D)
        h = h + o @ params["wproj"][l] + params["bproj"][l]
        z = ln(h, lnp[2], lnp[3])
        m = jax.nn.gelu(z @ params["wfc1"][l] + params["bfc1"][l], approximate=False)
        h = h + m @ params["wfc2"][l] + params["bfc2"][l]

    z = ln(h, params["final_ln"][0], params["final_ln"][1])
    y = z @ params["head_w"] + params["head_b"]
    return y[:, 1:, :]


# ----------------------------- main -------------------------------------------
if __name__ == "__main__":
    root = jax.random.PRNGKey(0)
    kp, kx, kidx = jax.random.split(root, 3)

    params = init_params(kp)
    x = jax.random.normal(kx, (BATCH, N_UNMASKED, IN_DIM), jnp.float32)
    idx_restore = jnp.stack(
        [jax.random.permutation(k, NUM_PATCHES)
         for k in jax.random.split(kidx, BATCH)]).astype(jnp.int32)

    out = decoder_forward(x, idx_restore, params)
    out = jax.block_until_ready(out)

    assert out.shape == (BATCH, NUM_PATCHES, OUT_DIM), out.shape
    assert bool(jnp.all(jnp.isfinite(out)))

    ref = reference_forward(x, idx_restore, params)
    err = float(jnp.max(jnp.abs(out - ref)))
    assert err < 5e-2, f"max abs error vs reference: {err}"

    print("KERNEL_OK")
</pallas_src>

<mosaic_0001>
module attributes {stable_mosaic.version = 11 : i64} {
  func.func @decoder_kernel(%arg0: i32, %arg1: memref<2x16xi32, #tpu.memory_space<smem>>, %arg2: memref<2x9x48xf32, #tpu.memory_space<vmem>>, %arg3: memref<48x32xf32, #tpu.memory_space<vmem>>, %arg4: memref<1x32xf32, #tpu.memory_space<vmem>>, %arg5: memref<1x32xf32, #tpu.memory_space<vmem>>, %arg6: memref<17x32xf32, #tpu.memory_space<vmem>>, %arg7: memref<2x32xf32, #tpu.memory_space<vmem>>, %arg8: memref<32x48xf32, #tpu.memory_space<vmem>>, %arg9: memref<1x48xf32, #tpu.memory_space<vmem>>, %arg10: memref<1x4x32xf32, #tpu.memory_space<vmem>>, %arg11: memref<1x32x96xf32, #tpu.memory_space<vmem>>, %arg12: memref<1x1x96xf32, #tpu.memory_space<vmem>>, %arg13: memref<1x32x32xf32, #tpu.memory_space<vmem>>, %arg14: memref<1x1x32xf32, #tpu.memory_space<vmem>>, %arg15: memref<1x32x128xf32, #tpu.memory_space<vmem>>, %arg16: memref<1x1x128xf32, #tpu.memory_space<vmem>>, %arg17: memref<1x128x32xf32, #tpu.memory_space<vmem>>, %arg18: memref<1x1x32xf32, #tpu.memory_space<vmem>>, %arg19: memref<2x16x48xf32, #tpu.memory_space<vmem>>, %arg20: memref<34x32xf32, #tpu.memory_space<vmem>>, %arg21: memref<19x32xf32, #tpu.memory_space<vmem>>) attributes {dimension_semantics = [#tpu.dimension_semantics<arbitrary>], iteration_bounds = array<i64: 2>, scalar_prefetch = 1 : i64, scratch_operands = 2 : i64, tpu.core_type = #tpu.core_type<tc>, window_params = [{pipeline_mode = #tpu.pipeline_mode<synchronous>, transform_indices = @transform_0, window_bounds = array<i64: 2, 9, 48>}, {pipeline_mode = #tpu.pipeline_mode<synchronous>, transform_indices = @transform_1, window_bounds = array<i64: 48, 32>}, {pipeline_mode = #tpu.pipeline_mode<synchronous>, transform_indices = @transform_2, window_bounds = array<i64: 1, 32>}, {pipeline_mode = #tpu.pipeline_mode<synchronous>, transform_indices = @transform_3, window_bounds = array<i64: 1, 32>}, {pipeline_mode = #tpu.pipeline_mode<synchronous>, transform_indices = @transform_4, window_bounds = array<i64: 17, 32>}, {pipeline_mode = #tpu.pipeline_mode<synchronous>, transform_indices = @transform_5, window_bounds = array<i64: 2, 32>}, {pipeline_mode = #tpu.pipeline_mode<synchronous>, transform_indices = @transform_6, window_bounds = array<i64: 32, 48>}, {pipeline_mode = #tpu.pipeline_mode<synchronous>, transform_indices = @transform_7, window_bounds = array<i64: 1, 48>}, {transform_indices = @transform_8, window_bounds = array<i64: 1, 4, 32>}, {transform_indices = @transform_9, window_bounds = array<i64: 1, 32, 96>}, {transform_indices = @transform_10, window_bounds = array<i64: 1, 1, 96>}, {transform_indices = @transform_11, window_bounds = array<i64: 1, 32, 32>}, {transform_indices = @transform_12, window_bounds = array<i64: 1, 1, 32>}, {transform_indices = @transform_13, window_bounds = array<i64: 1, 32, 128>}, {transform_indices = @transform_14, window_bounds = array<i64: 1, 1, 128>}, {transform_indices = @transform_15, window_bounds = array<i64: 1, 128, 32>}, {transform_indices = @transform_16, window_bounds = array<i64: 1, 1, 32>}, {pipeline_mode = #tpu.pipeline_mode<synchronous>, transform_indices = @transform_17, window_bounds = array<i64: 2, 16, 48>}]} {
    %c0_i32 = arith.constant 0 : i32
    %0 = arith.cmpi eq, %arg0, %c0_i32 : i32
    %1 = arith.extui %0 : i1 to i32
    %c0_i32_0 = arith.constant 0 : i32
    %2 = arith.cmpi ne, %1, %c0_i32_0 : i32
    scf.if %2 {
      %c0_92 = arith.constant 0 : index
      %c0_93 = arith.constant 0 : index
      %c0_94 = arith.constant 0 : index
      %253 = vector.load %arg2[%c0_92, %c0_93, %c0_94] : memref<2x9x48xf32, #tpu.memory_space<vmem>>, vector<1x9x48xf32>
      %254 = vector.shape_cast %253 : vector<1x9x48xf32> to vector<9x48xf32>
      %c0_95 = arith.constant 0 : index
      %c0_96 = arith.constant 0 : index
      %255 = vector.load %arg3[%c0_95, %c0_96] : memref<48x32xf32, #tpu.memory_space<vmem>>, vector<48x32xf32>
      %cst_97 = arith.constant dense<0.000000e+00> : vector<9x32xf32>
      %256 = tpu.matmul %254, %255, %cst_97 {dimension_numbers = #tpu.dot_dimension_numbers<[1], [0], [0], [1], [0, 0, 1, 1], [], []>} : vector<9x48xf32>, vector<48x32xf32>, vector<9x32xf32> -> vector<9x32xf32>
      %c0_98 = arith.constant 0 : index
      %c0_99 = arith.constant 0 : index
      %257 = vector.load %arg4[%c0_98, %c0_99] : memref<1x32xf32, #tpu.memory_space<vmem>>, vector<1x32xf32>
      %258 = vector.broadcast %257 : vector<1x32xf32> to vector<9x32xf32>
      %259 = arith.addf %256, %258 : vector<9x32xf32>
      %c0_100 = arith.constant 0 : index
      %c0_101 = arith.constant 0 : index
      %260 = vector.load %arg21[%c0_100, %c0_101] : memref<19x32xf32, #tpu.memory_space<vmem>>, vector<9x32xf32>
      tpu.vector_store %arg21[%c0_100, %c0_101], %259 {strides = array<i32>} : memref<19x32xf32, #tpu.memory_space<vmem>>, vector<9x32xf32>,
      %c1 = arith.constant 1 : index
      %c0_102 = arith.constant 0 : index
      %c0_103 = arith.constant 0 : index
      %261 = vector.load %arg2[%c1, %c0_102, %c0_103] : memref<2x9x48xf32, #tpu.memory_space<vmem>>, vector<1x9x48xf32>
      %262 = vector.shape_cast %261 : vector<1x9x48xf32> to vector<9x48xf32>
      %c0_104 = arith.constant 0 : index
      %c0_105 = arith.constant 0 : index
      %263 = vector.load %arg3[%c0_104, %c0_105] : memref<48x32xf32, #tpu.memory_space<vmem>>, vector<48x32xf32>
      %cst_106 = arith.constant dense<0.000000e+00> : vector<9x32xf32>
      %264 = tpu.matmul %262, %263, %cst_106 {dimension_numbers = #tpu.dot_dimension_numbers<[1], [0], [0], [1], [0, 0, 1, 1], [], []>} : vector<9x48xf32>, vector<48x32xf32>, vector<9x32xf32> -> vector<9x32xf32>
      %c0_107 = arith.constant 0 : index
      %c0_108 = arith.constant 0 : index
      %265 = vector.load %arg4[%c0_107, %c0_108] : memref<1x32xf32, #tpu.memory_space<vmem>>, vector<1x32xf32>
      %266 = vector.broadcast %265 : vector<1x32xf32> to vector<9x32xf32>
      %267 = arith.addf %264, %266 : vector<9x32xf32>
      %c9 = arith.constant 9 : index
      %c0_109 = arith.constant 0 : index
      %268 = vector.load %arg21[%c9, %c0_109] : memref<19x32xf32, #tpu.memory_space<vmem>>, vector<9x32xf32>
      tpu.vector_store %arg21[%c9, %c0_109], %267 {strides = array<i32>} : memref<19x32xf32, #tpu.memory_space<vmem>>, vector<9x32xf32>,
      %c0_110 = arith.constant 0 : index
      %c0_111 = arith.constant 0 : index
      %269 = vector.load %arg5[%c0_110, %c0_111] : memref<1x32xf32, #tpu.memory_space<vmem>>, vector<1x32xf32>
      %c18 = arith.constant 18 : index
      %c0_112 = arith.constant 0 : index
      %270 = vector.load %arg21[%c18, %c0_112] : memref<19x32xf32, #tpu.memory_space<vmem>>, vector<1x32xf32>
      tpu.vector_store %arg21[%c18, %c0_112], %269 {strides = array<i32>} : memref<19x32xf32, #tpu.memory_space<vmem>>, vector<1x32xf32>,
      %c0_113 = arith.constant 0 : index
      %c0_114 = arith.constant 0 : index
      %271 = vector.load %arg21[%c0_113, %c0_114] : memref<19x32xf32, #tpu.memory_space<vmem>>, vector<1x32xf32>
      %c0_115 = arith.constant 0 : index
      %c0_116 = arith.constant 0 : index
      %272 = vector.load %arg20[%c0_115, %c0_116] : memref<34x32xf32, #tpu.memory_space<vmem>>, vector<1x32xf32>
      tpu.vector_store %arg20[%c0_115, %c0_116], %271 {strides = array<i32>} : memref<34x32xf32, #tpu.memory_space<vmem>>, vector<1x32xf32>,
      %c0_117 = arith.constant 0 : index
      %c0_118 = arith.constant 0 : index
      %273 = memref.load %arg1[%c0_117, %c0_118] : memref<2x16xi32, #tpu.memory_space<smem>>
      %c8_i32 = arith.constant 8 : i32
      %274 = arith.cmpi slt, %273, %c8_i32 : i32
      %c1_i32_119 = arith.constant 1 : i32
      %275 = arith.addi %c1_i32_119, %273 : i32
      %c18_i32 = arith.constant 18 : i32
      %276 = arith.select %274, %275, %c18_i32 : i32
      %277 = arith.index_cast %276 : i32 to index
      %c0_120 = arith.constant 0 : index
      %278 = vector.load %arg21[%277, %c0_120] : memref<19x32xf32, #tpu.memory_space<vmem>>, vector<1x32xf32>
      %c1_121 = arith.constant 1 : index
      %c0_122 = arith.constant 0 : index
      %279 = vector.load %arg20[%c1_121, %c0_122] : memref<34x32xf32, #tpu.memory_space<vmem>>, vector<1x32xf32>
      tpu.vector_store %arg20[%c1_121, %c0_122], %278 {strides = array<i32>} : memref<34x32xf32, #tpu.memory_space<vmem>>, vector<1x32xf32>,
      %c0_123 = arith.constant 0 : index
      %c1_124 = arith.constant 1 : index
      %280 = memref.load %arg1[%c0_123, %c1_124] : memref<2x16xi32, #tpu.memory_space<smem>>
      %c8_i32_125 = arith.constant 8 : i32
      %281 = arith.cmpi slt, %280, %c8_i32_125 : i32
      %c1_i32_126 = arith.constant 1 : i32
      %282 = arith.addi %c1_i32_126, %280 : i32
      %c18_i32_127 = arith.constant 18 : i32
      %283 = arith.select %281, %282, %c18_i32_127 : i32
      %284 = arith.index_cast %283 : i32 to index
      %c0_128 = arith.constant 0 : index
      %285 = vector.load %arg21[%284, %c0_128] : memref<19x32xf32, #tpu.memory_space<vmem>>, vector<1x32xf32>
      %c2 = arith.constant 2 : index
      %c0_129 = arith.constant 0 : index
      %286 = vector.load %arg20[%c2, %c0_129] : memref<34x32xf32, #tpu.memory_space<vmem>>, vector<1x32xf32>
      tpu.vector_store %arg20[%c2, %c0_129], %285 {strides = array<i32>} : memref<34x32xf32, #tpu.memory_space<vmem>>, vector<1x32xf32>,
      %c0_130 = arith.constant 0 : index
      %c2_131 = arith.constant 2 : index
      %287 = memref.load %arg1[%c0_130, %c2_131] : memref<2x16xi32, #tpu.memory_space<smem>>
      %c8_i32_132 = arith.constant 8 : i32
      %288 = arith.cmpi slt, %287, %c8_i32_132 : i32
      %c1_i32_133 = arith.constant 1 : i32
      %289 = arith.addi %c1_i32_133, %287 : i32
      %c18_i32_134 = arith.constant 18 : i32
      %290 = arith.select %288, %289, %c18_i32_134 : i32
      %291 = arith.index_cast %290 : i32 to index
      %c0_135 = arith.constant 0 : index
      %292 = vector.load %arg21[%291, %c0_135] : memref<19x32xf32, #tpu.memory_space<vmem>>, vector<1x32xf32>
      %c3 = arith.constant 3 : index
      %c0_136 = arith.constant 0 : index
      %293 = vector.load %arg20[%c3, %c0_136] : memref<34x32xf32, #tpu.memory_space<vmem>>, vector<1x32xf32>
      tpu.vector_store %arg20[%c3, %c0_136], %292 {strides = array<i32>} : memref<34x32xf32, #tpu.memory_space<vmem>>, vector<1x32xf32>,
      %c0_137 = arith.constant 0 : index
      %c3_138 = arith.constant 3 : index
      %294 = memref.load %arg1[%c0_137, %c3_138] : memref<2x16xi32, #tpu.memory_space<smem>>
      %c8_i32_139 = arith.constant 8 : i32
      %295 = arith.cmpi slt, %294, %c8_i32_139 : i32
      %c1_i32_140 = arith.constant 1 : i32
      %296 = arith.addi %c1_i32_140, %294 : i32
      %c18_i32_141 = arith.constant 18 : i32
      %297 = arith.select %295, %296, %c18_i32_141 : i32
      %298 = arith.index_cast %297 : i32 to index
      %c0_142 = arith.constant 0 : index
      %299 = vector.load %arg21[%298, %c0_142] : memref<19x32xf32, #tpu.memory_space<vmem>>, vector<1x32xf32>
      %c4 = arith.constant 4 : index
      %c0_143 = arith.constant 0 : index
      %300 = vector.load %arg20[%c4, %c0_143] : memref<34x32xf32, #tpu.memory_space<vmem>>, vector<1x32xf32>
      tpu.vector_store %arg20[%c4, %c0_143], %299 {strides = array<i32>} : memref<34x32xf32, #tpu.memory_space<vmem>>, vector<1x32xf32>,
      %c0_144 = arith.constant 0 : index
      %c4_145 = arith.constant 4 : index
      %301 = memref.load %arg1[%c0_144, %c4_145] : memref<2x16xi32, #tpu.memory_space<smem>>
      %c8_i32_146 = arith.constant 8 : i32
      %302 = arith.cmpi slt, %301, %c8_i32_146 : i32
      %c1_i32_147 = arith.constant 1 : i32
      %303 = arith.addi %c1_i32_147, %301 : i32
      %c18_i32_148 = arith.constant 18 : i32
      %304 = arith.select %302, %303, %c18_i32_148 : i32
      %305 = arith.index_cast %304 : i32 to index
      %c0_149 = arith.constant 0 : index
      %306 = vector.load %arg21[%305, %c0_149] : memref<19x32xf32, #tpu.memory_space<vmem>>, vector<1x32xf32>
      %c5 = arith.constant 5 : index
      %c0_150 = arith.constant 0 : index
      %307 = vector.load %arg20[%c5, %c0_150] : memref<34x32xf32, #tpu.memory_space<vmem>>, vector<1x32xf32>
      tpu.vector_store %arg20[%c5, %c0_150], %306 {strides = array<i32>} : memref<34x32xf32, #tpu.memory_space<vmem>>, vector<1x32xf32>,
      %c0_151 = arith.constant 0 : index
      %c5_152 = arith.constant 5 : index
      %308 = memref.load %arg1[%c0_151, %c5_152] : memref<2x16xi32, #tpu.memory_space<smem>>
      %c8_i32_153 = arith.constant 8 : i32
      %309 = arith.cmpi slt, %308, %c8_i32_153 : i32
      %c1_i32_154 = arith.constant 1 : i32
      %310 = arith.addi %c1_i32_154, %308 : i32
      %c18_i32_155 = arith.constant 18 : i32
      %311 = arith.select %309, %310, %c18_i32_155 : i32
      %312 = arith.index_cast %311 : i32 to index
      %c0_156 = arith.constant 0 : index
      %313 = vector.load %arg21[%312, %c0_156] : memref<19x32xf32, #tpu.memory_space<vmem>>, vector<1x32xf32>
      %c6 = arith.constant 6 : index
      %c0_157 = arith.constant 0 : index
      %314 = vector.load %arg20[%c6, %c0_157] : memref<34x32xf32, #tpu.memory_space<vmem>>, vector<1x32xf32>
      tpu.vector_store %arg20[%c6, %c0_157], %313 {strides = array<i32>} : memref<34x32xf32, #tpu.memory_space<vmem>>, vector<1x32xf32>,
      %c0_158 = arith.constant 0 : index
      %c6_159 = arith.constant 6 : index
      %315 = memref.load %arg1[%c0_158, %c6_159] : memref<2x16xi32, #tpu.memory_space<smem>>
      %c8_i32_160 = arith.constant 8 : i32
      %316 = arith.cmpi slt, %315, %c8_i32_160 : i32
      %c1_i32_161 = arith.constant 1 : i32
      %317 = arith.addi %c1_i32_161, %315 : i32
      %c18_i32_162 = arith.constant 18 : i32
      %318 = arith.select %316, %317, %c18_i32_162 : i32
      %319 = arith.index_cast %318 : i32 to index
      %c0_163 = arith.constant 0 : index
      %320 = vector.load %arg21[%319, %c0_163] : memref<19x32xf32, #tpu.memory_space<vmem>>, vector<1x32xf32>
      %c7 = arith.constant 7 : index
      %c0_164 = arith.constant 0 : index
      %321 = vector.load %arg20[%c7, %c0_164] : memref<34x32xf32, #tpu.memory_space<vmem>>, vector<1x32xf32>
      tpu.vector_store %arg20[%c7, %c0_164], %320 {strides = array<i32>} : memref<34x32xf32, #tpu.memory_space<vmem>>, vector<1x32xf32>,
      %c0_165 = arith.constant 0 : index
      %c7_166 = arith.constant 7 : index
      %322 = memref.load %arg1[%c0_165, %c7_166] : memref<2x16xi32, #tpu.memory_space<smem>>
      %c8_i32_167 = arith.constant 8 : i32
      %323 = arith.cmpi slt, %322, %c8_i32_167 : i32
      %c1_i32_168 = arith.constant 1 : i32
      %324 = arith.addi %c1_i32_168, %322 : i32
      %c18_i32_169 = arith.constant 18 : i32
      %325 = arith.select %323, %324, %c18_i32_169 : i32
      %326 = arith.index_cast %325 : i32 to index
      %c0_170 = arith.constant 0 : index
      %327 = vector.load %arg21[%326, %c0_170] : memref<19x32xf32, #tpu.memory_space<vmem>>, vector<1x32xf32>
      %c8 = arith.constant 8 : index
      %c0_171 = arith.constant 0 : index
      %328 = vector.load %arg20[%c8, %c0_171] : memref<34x32xf32, #tpu.memory_space<vmem>>, vector<1x32xf32>
      tpu.vector_store %arg20[%c8, %c0_171], %327 {strides = array<i32>} : memref<34x32xf32, #tpu.memory_space<vmem>>, vector<1x32xf32>,
      %c0_172 = arith.constant 0 : index
      %c8_173 = arith.constant 8 : index
      %329 = memref.load %arg1[%c0_172, %c8_173] : memref<2x16xi32, #tpu.memory_space<smem>>
      %c8_i32_174 = arith.constant 8 : i32
      %330 = arith.cmpi slt, %329, %c8_i32_174 : i32
      %c1_i32_175 = arith.constant 1 : i32
      %331 = arith.addi %c1_i32_175, %329 : i32
      %c18_i32_176 = arith.constant 18 : i32
      %332 = arith.select %330, %331, %c18_i32_176 : i32
      %333 = arith.index_cast %332 : i32 to index
      %c0_177 = arith.constant 0 : index
      %334 = vector.load %arg21[%333, %c0_177] : memref<19x32xf32, #tpu.memory_space<vmem>>, vector<1x32xf32>
      %c9_178 = arith.constant 9 : index
      %c0_179 = arith.constant 0 : index
      %335 = vector.load %arg20[%c9_178, %c0_179] : memref<34x32xf32, #tpu.memory_space<vmem>>, vector<1x32xf32>
      tpu.vector_store %arg20[%c9_178, %c0_179], %334 {strides = array<i32>} : memref<34x32xf32, #tpu.memory_space<vmem>>, vector<1x32xf32>,
      %c0_180 = arith.constant 0 : index
      %c9_181 = arith.constant 9 : index
      %336 = memref.load %arg1[%c0_180, %c9_181] : memref<2x16xi32, #tpu.memory_space<smem>>
      %c8_i32_182 = arith.constant 8 : i32
      %337 = arith.cmpi slt, %336, %c8_i32_182 : i32
      %c1_i32_183 = arith.constant 1 : i32
      %338 = arith.addi %c1_i32_183, %336 : i32
      %c18_i32_184 = arith.constant 18 : i32
      %339 = arith.select %337, %338, %c18_i32_184 : i32
      %340 = arith.index_cast %339 : i32 to index
      %c0_185 = arith.constant 0 : index
      %341 = vector.load %arg21[%340, %c0_185] : memref<19x32xf32, #tpu.memory_space<vmem>>, vector<1x32xf32>
      %c10 = arith.constant 10 : index
      %c0_186 = arith.constant 0 : index
      %342 = vector.load %arg20[%c10, %c0_186] : memref<34x32xf32, #tpu.memory_space<vmem>>, vector<1x32xf32>
      tpu.vector_store %arg20[%c10, %c0_186], %341 {strides = array<i32>} : memref<34x32xf32, #tpu.memory_space<vmem>>, vector<1x32xf32>,
      %c0_187 = arith.constant 0 : index
      %c10_188 = arith.constant 10 : index
      %343 = memref.load %arg1[%c0_187, %c10_188] : memref<2x16xi32, #tpu.memory_space<smem>>
      %c8_i32_189 = arith.constant 8 : i32
      %344 = arith.cmpi slt, %343, %c8_i32_189 : i32
      %c1_i32_190 = arith.constant 1 : i32
      %345 = arith.addi %c1_i32_190, %343 : i32
      %c18_i32_191 = arith.constant 18 : i32
      %346 = arith.select %344, %345, %c18_i32_191 : i32
      %347 = arith.index_cast %346 : i32 to index
      %c0_192 = arith.constant 0 : index
      %348 = vector.load %arg21[%347, %c0_192] : memref<19x32xf32, #tpu.memory_space<vmem>>, vector<1x32xf32>
      %c11 = arith.constant 11 : index
      %c0_193 = arith.constant 0 : index
      %349 = vector.load %arg20[%c11, %c0_193] : memref<34x32xf32, #tpu.memory_space<vmem>>, vector<1x32xf32>
      tpu.vector_store %arg20[%c11, %c0_193], %348 {strides = array<i32>} : memref<34x32xf32, #tpu.memory_space<vmem>>, vector<1x32xf32>,
      %c0_194 = arith.constant 0 : index
      %c11_195 = arith.constant 11 : index
      %350 = memref.load %arg1[%c0_194, %c11_195] : memref<2x16xi32, #tpu.memory_space<smem>>
      %c8_i32_196 = arith.constant 8 : i32
      %351 = arith.cmpi slt, %350, %c8_i32_196 : i32
      %c1_i32_197 = arith.constant 1 : i32
      %352 = arith.addi %c1_i32_197, %350 : i32
      %c18_i32_198 = arith.constant 18 : i32
      %353 = arith.select %351, %352, %c18_i32_198 : i32
      %354 = arith.index_cast %353 : i32 to index
      %c0_199 = arith.constant 0 : index
      %355 = vector.load %arg21[%354, %c0_199] : memref<19x32xf32, #tpu.memory_space<vmem>>, vector<1x32xf32>
      %c12 = arith.constant 12 : index
      %c0_200 = arith.constant 0 : index
      %356 = vector.load %arg20[%c12, %c0_200] : memref<34x32xf32, #tpu.memory_space<vmem>>, vector<1x32xf32>
      tpu.vector_store %arg20[%c12, %c0_200], %355 {strides = array<i32>} : memref<34x32xf32, #tpu.memory_space<vmem>>, vector<1x32xf32>,
      %c0_201 = arith.constant 0 : index
      %c12_202 = arith.constant 12 : index
      %357 = memref.load %arg1[%c0_201, %c12_202] : memref<2x16xi32, #tpu.memory_space<smem>>
      %c8_i32_203 = arith.constant 8 : i32
      %358 = arith.cmpi slt, %357, %c8_i32_203 : i32
      %c1_i32_204 = arith.constant 1 : i32
      %359 = arith.addi %c1_i32_204, %357 : i32
      %c18_i32_205 = arith.constant 18 : i32
      %360 = arith.select %358, %359, %c18_i32_205 : i32
      %361 = arith.index_cast %360 : i32 to index
      %c0_206 = arith.constant 0 : index
      %362 = vector.load %arg21[%361, %c0_206] : memref<19x32xf32, #tpu.memory_space<vmem>>, vector<1x32xf32>
      %c13 = arith.constant 13 : index
      %c0_207 = arith.constant 0 : index
      %363 = vector.load %arg20[%c13, %c0_207] : memref<34x32xf32, #tpu.memory_space<vmem>>, vector<1x32xf32>
      tpu.vector_store %arg20[%c13, %c0_207], %362 {strides = array<i32>} : memref<34x32xf32, #tpu.memory_space<vmem>>, vector<1x32xf32>,
      %c0_208 = arith.constant 0 : index
      %c13_209 = arith.constant 13 : index
      %364 = memref.load %arg1[%c0_208, %c13_209] : memref<2x16xi32, #tpu.memory_space<smem>>
      %c8_i32_210 = arith.constant 8 : i32
      %365 = arith.cmpi slt, %364, %c8_i32_210 : i32
      %c1_i32_211 = arith.constant 1 : i32
      %366 = arith.addi %c1_i32_211, %364 : i32
      %c18_i32_212 = arith.constant 18 : i32
      %367 = arith.select %365, %366, %c18_i32_212 : i32
      %368 = arith.index_cast %367 : i32 to index
      %c0_213 = arith.constant 0 : index
      %369 = vector.load %arg21[%368, %c0_213] : memref<19x32xf32, #tpu.memory_space<vmem>>, vector<1x32xf32>
      %c14 = arith.constant 14 : index
      %c0_214 = arith.constant 0 : index
      %370 = vector.load %arg20[%c14, %c0_214] : memref<34x32xf32, #tpu.memory_space<vmem>>, vector<1x32xf32>
      tpu.vector_store %arg20[%c14, %c0_214], %369 {strides = array<i32>} : memref<34x32xf32, #tpu.memory_space<vmem>>, vector<1x32xf32>,
      %c0_215 = arith.constant 0 : index
      %c14_216 = arith.constant 14 : index
      %371 = memref.load %arg1[%c0_215, %c14_216] : memref<2x16xi32, #tpu.memory_space<smem>>
      %c8_i32_217 = arith.constant 8 : i32
      %372 = arith.cmpi slt, %371, %c8_i32_217 : i32
      %c1_i32_218 = arith.constant 1 : i32
      %373 = arith.addi %c1_i32_218, %371 : i32
      %c18_i32_219 = arith.constant 18 : i32
      %374 = arith.select %372, %373, %c18_i32_219 : i32
      %375 = arith.index_cast %374 : i32 to index
      %c0_220 = arith.constant 0 : index
      %376 = vector.load %arg21[%375, %c0_220] : memref<19x32xf32, #tpu.memory_space<vmem>>, vector<1x32xf32>
      %c15 = arith.constant 15 : index
      %c0_221 = arith.constant 0 : index
      %377 = vector.load %arg20[%c15, %c0_221] : memref<34x32xf32, #tpu.memory_space<vmem>>, vector<1x32xf32>
      tpu.vector_store %arg20[%c15, %c0_221], %376 {strides = array<i32>} : memref<34x32xf32, #tpu.memory_space<vmem>>, vector<1x32xf32>,
      %c0_222 = arith.constant 0 : index
      %c15_223 = arith.constant 15 : index
      %378 = memref.load %arg1[%c0_222, %c15_223] : memref<2x16xi32, #tpu.memory_space<smem>>
      %c8_i32_224 = arith.constant 8 : i32
      %379 = arith.cmpi slt, %378, %c8_i32_224 : i32
      %c1_i32_225 = arith.constant 1 : i32
      %380 = arith.addi %c1_i32_225, %378 : i32
      %c18_i32_226 = arith.constant 18 : i32
      %381 = arith.select %379, %380, %c18_i32_226 : i32
      %382 = arith.index_cast %381 : i32 to index
      %c0_227 = arith.constant 0 : index
      %383 = vector.load %arg21[%382, %c0_227] : memref<19x32xf32, #tpu.memory_space<vmem>>, vector<1x32xf32>
      %c16 = arith.constant 16 : index
      %c0_228 = arith.constant 0 : index
      %384 = vector.load %arg20[%c16, %c0_228] : memref<34x32xf32, #tpu.memory_space<vmem>>, vector<1x32xf32>
      tpu.vector_store %arg20[%c16, %c0_228], %383 {strides = array<i32>} : memref<34x32xf32, #tpu.memory_space<vmem>>, vector<1x32xf32>,
      %c9_229 = arith.constant 9 : index
      %c0_230 = arith.constant 0 : index
      %385 = vector.load %arg21[%c9_229, %c0_230] : memref<19x32xf32, #tpu.memory_space<vmem>>, vector<1x32xf32>
      %c17 = arith.constant 17 : index
      %c0_231 = arith.constant 0 : index
      %386 = vector.load %arg20[%c17, %c0_231] : memref<34x32xf32, #tpu.memory_space<vmem>>, vector<1x32xf32>
      tpu.vector_store %arg20[%c17, %c0_231], %385 {strides = array<i32>} : memref<34x32xf32, #tpu.memory_space<vmem>>, vector<1x32xf32>,
      %c1_232 = arith.constant 1 : index
      %c0_233 = arith.constant 0 : index
      %387 = memref.load %arg1[%c1_232, %c0_233] : memref<2x16xi32, #tpu.memory_space<smem>>
      %c8_i32_234 = arith.constant 8 : i32
      %388 = arith.cmpi slt, %387, %c8_i32_234 : i32
      %c10_i32 = arith.constant 10 : i32
      %389 = arith.addi %c10_i32, %387 : i32
      %c18_i32_235 = arith.constant 18 : i32
      %390 = arith.select %388, %389, %c18_i32_235 : i32
      %391 = arith.index_cast %390 : i32 to index
      %c0_236 = arith.constant 0 : index
      %392 = vector.load %arg21[%391, %c0_236] : memref<19x32xf32, #tpu.memory_space<vmem>>, vector<1x32xf32>
      %c18_237 = arith.constant 18 : index
      %c0_238 = arith.constant 0 : index
      %393 = vector.load %arg20[%c18_237, %c0_238] : memref<34x32xf32, #tpu.memory_space<vmem>>, vector<1x32xf32>
      tpu.vector_store %arg20[%c18_237, %c0_238], %392 {strides = array<i32>} : memref<34x32xf32, #tpu.memory_space<vmem>>, vector<1x32xf32>,
      %c1_239 = arith.constant 1 : index
      %c1_240 = arith.constant 1 : index
      %394 = memref.load %arg1[%c1_239, %c1_240] : memref<2x16xi32, #tpu.memory_space<smem>>
      %c8_i32_241 = arith.constant 8 : i32
      %395 = arith.cmpi slt, %394, %c8_i32_241 : i32
      %c10_i32_242 = arith.constant 10 : i32
      %396 = arith.addi %c10_i32_242, %394 : i32
      %c18_i32_243 = arith.constant 18 : i32
      %397 = arith.select %395, %396, %c18_i32_243 : i32
      %398 = arith.index_cast %397 : i32 to index
      %c0_244 = arith.constant 0 : index
      %399 = vector.load %arg21[%398, %c0_244] : memref<19x32xf32, #tpu.memory_space<vmem>>, vector<1x32xf32>
      %c19 = arith.constant 19 : index
      %c0_245 = arith.constant 0 : index
      %400 = vector.load %arg20[%c19, %c0_245] : memref<34x32xf32, #tpu.memory_space<vmem>>, vector<1x32xf32>
      tpu.vector_store %arg20[%c19, %c0_245], %399 {strides = array<i32>} : memref<34x32xf32, #tpu.memory_space<vmem>>, vector<1x32xf32>,
      %c1_246 = arith.constant 1 : index
      %c2_247 = arith.constant 2 : index
      %401 = memref.load %arg1[%c1_246, %c2_247] : memref<2x16xi32, #tpu.memory_space<smem>>
      %c8_i32_248 = arith.constant 8 : i32
      %402 = arith.cmpi slt, %401, %c8_i32_248 : i32
      %c10_i32_249 = arith.constant 10 : i32
      %403 = arith.addi %c10_i32_249, %401 : i32
      %c18_i32_250 = arith.constant 18 : i32
      %404 = arith.select %402, %403, %c18_i32_250 : i32
      %405 = arith.index_cast %404 : i32 to index
      %c0_251 = arith.constant 0 : index
      %406 = vector.load %arg21[%405, %c0_251] : memref<19x32xf32, #tpu.memory_space<vmem>>, vector<1x32xf32>
      %c20 = arith.constant 20 : index
      %c0_252 = arith.constant 0 : index
      %407 = vector.load %arg20[%c20, %c0_252] : memref<34x32xf32, #tpu.memory_space<vmem>>, vector<1x32xf32>
      tpu.vector_store %arg20[%c20, %c0_252], %406 {strides = array<i32>} : memref<34x32xf32, #tpu.memory_space<vmem>>, vector<1x32xf32>,
      %c1_253 = arith.constant 1 : index
      %c3_254 = arith.constant 3 : index
      %408 = memref.load %arg1[%c1_253, %c3_254] : memref<2x16xi32, #tpu.memory_space<smem>>
      %c8_i32_255 = arith.constant 8 : i32
      %409 = arith.cmpi slt, %408, %c8_i32_255 : i32
      %c10_i32_256 = arith.constant 10 : i32
      %410 = arith.addi %c10_i32_256, %408 : i32
      %c18_i32_257 = arith.constant 18 : i32
      %411 = arith.select %409, %410, %c18_i32_257 : i32
      %412 = arith.index_cast %411 : i32 to index
      %c0_258 = arith.constant 0 : index
      %413 = vector.load %arg21[%412, %c0_258] : memref<19x32xf32, #tpu.memory_space<vmem>>, vector<1x32xf32>
      %c21 = arith.constant 21 : index
      %c0_259 = arith.constant 0 : index
      %414 = vector.load %arg20[%c21, %c0_259] : memref<34x32xf32, #tpu.memory_space<vmem>>, vector<1x32xf32>
      tpu.vector_store %arg20[%c21, %c0_259], %413 {strides = array<i32>} : memref<34x32xf32, #tpu.memory_space<vmem>>, vector<1x32xf32>,
      %c1_260 = arith.constant 1 : index
      %c4_261 = arith.constant 4 : index
      %415 = memref.load %arg1[%c1_260, %c4_261] : memref<2x16xi32, #tpu.memory_space<smem>>
      %c8_i32_262 = arith.constant 8 : i32
      %416 = arith.cmpi slt, %415, %c8_i32_262 : i32
      %c10_i32_263 = arith.constant 10 : i32
      %417 = arith.addi %c10_i32_263, %415 : i32
      %c18_i32_264 = arith.constant 18 : i32
      %418 = arith.select %416, %417, %c18_i32_264 : i32
      %419 = arith.index_cast %418 : i32 to index
      %c0_265 = arith.constant 0 : index
      %420 = vector.load %arg21[%419, %c0_265] : memref<19x32xf32, #tpu.memory_space<vmem>>, vector<1x32xf32>
      %c22 = arith.constant 22 : index
      %c0_266 = arith.constant 0 : index
      %421 = vector.load %arg20[%c22, %c0_266] : memref<34x32xf32, #tpu.memory_space<vmem>>, vector<1x32xf32>
      tpu.vector_store %arg20[%c22, %c0_266], %420 {strides = array<i32>} : memref<34x32xf32, #tpu.memory_space<vmem>>, vector<1x32xf32>,
      %c1_267 = arith.constant 1 : index
      %c5_268 = arith.constant 5 : index
      %422 = memref.load %arg1[%c1_267, %c5_268] : memref<2x16xi32, #tpu.memory_space<smem>>
      %c8_i32_269 = arith.constant 8 : i32
      %423 = arith.cmpi slt, %422, %c8_i32_269 : i32
      %c10_i32_270 = arith.constant 10 : i32
      %424 = arith.addi %c10_i32_270, %422 : i32
      %c18_i32_271 = arith.constant 18 : i32
      %425 = arith.select %423, %424, %c18_i32_271 : i32
      %426 = arith.index_cast %425 : i32 to index
      %c0_272 = arith.constant 0 : index
      %427 = vector.load %arg21[%426, %c0_272] : memref<19x32xf32, #tpu.memory_space<vmem>>, vector<1x32xf32>
      %c23 = arith.constant 23 : index
      %c0_273 = arith.constant 0 : index
      %428 = vector.load %arg20[%c23, %c0_273] : memref<34x32xf32, #tpu.memory_space<vmem>>, vector<1x32xf32>
      tpu.vector_store %arg20[%c23, %c0_273], %427 {strides = array<i32>} : memref<34x32xf32, #tpu.memory_space<vmem>>, vector<1x32xf32>,
      %c1_274 = arith.constant 1 : index
      %c6_275 = arith.constant 6 : index
      %429 = memref.load %arg1[%c1_274, %c6_275] : memref<2x16xi32, #tpu.memory_space<smem>>
      %c8_i32_276 = arith.constant 8 : i32
      %430 = arith.cmpi slt, %429, %c8_i32_276 : i32
      %c10_i32_277 = arith.constant 10 : i32
      %431 = arith.addi %c10_i32_277, %429 : i32
      %c18_i32_278 = arith.constant 18 : i32
      %432 = arith.select %430, %431, %c18_i32_278 : i32
      %433 = arith.index_cast %432 : i32 to index
      %c0_279 = arith.constant 0 : index
      %434 = vector.load %arg21[%433, %c0_279] : memref<19x32xf32, #tpu.memory_space<vmem>>, vector<1x32xf32>
      %c24 = arith.constant 24 : index
      %c0_280 = arith.constant 0 : index
      %435 = vector.load %arg20[%c24, %c0_280] : memref<34x32xf32, #tpu.memory_space<vmem>>, vector<1x32xf32>
      tpu.vector_store %arg20[%c24, %c0_280], %434 {strides = array<i32>} : memref<34x32xf32, #tpu.memory_space<vmem>>, vector<1x32xf32>,
      %c1_281 = arith.constant 1 : index
      %c7_282 = arith.constant 7 : index
      %436 = memref.load %arg1[%c1_281, %c7_282] : memref<2x16xi32, #tpu.memory_space<smem>>
      %c8_i32_283 = arith.constant 8 : i32
      %437 = arith.cmpi slt, %436, %c8_i32_283 : i32
      %c10_i32_284 = arith.constant 10 : i32
      %438 = arith.addi %c10_i32_284, %436 : i32
      %c18_i32_285 = arith.constant 18 : i32
      %439 = arith.select %437, %438, %c18_i32_285 : i32
      %440 = arith.index_cast %439 : i32 to index
      %c0_286 = arith.constant 0 : index
      %441 = vector.load %arg21[%440, %c0_286] : memref<19x32xf32, #tpu.memory_space<vmem>>, vector<1x32xf32>
      %c25 = arith.constant 25 : index
      %c0_287 = arith.constant 0 : index
      %442 = vector.load %arg20[%c25, %c0_287] : memref<34x32xf32, #tpu.memory_space<vmem>>, vector<1x32xf32>
      tpu.vector_store %arg20[%c25, %c0_287], %441 {strides = array<i32>} : memref<34x32xf32, #tpu.memory_space<vmem>>, vector<1x32xf32>,
      %c1_288 = arith.constant 1 : index
      %c8_289 = arith.constant 8 : index
      %443 = memref.load %arg1[%c1_288, %c8_289] : memref<2x16xi32, #tpu.memory_space<smem>>
      %c8_i32_290 = arith.constant 8 : i32
      %444 = arith.cmpi slt, %443, %c8_i32_290 : i32
      %c10_i32_291 = arith.constant 10 : i32
      %445 = arith.addi %c10_i32_291, %443 : i32
      %c18_i32_292 = arith.constant 18 : i32
      %446 = arith.select %444, %445, %c18_i32_292 : i32
      %447 = arith.index_cast %446 : i32 to index
      %c0_293 = arith.constant 0 : index
      %448 = vector.load %arg21[%447, %c0_293] : memref<19x32xf32, #tpu.memory_space<vmem>>, vector<1x32xf32>
      %c26 = arith.constant 26 : index
      %c0_294 = arith.constant 0 : index
      %449 = vector.load %arg20[%c26, %c0_294] : memref<34x32xf32, #tpu.memory_space<vmem>>, vector<1x32xf32>
      tpu.vector_store %arg20[%c26, %c0_294], %448 {strides = array<i32>} : memref<34x32xf32, #tpu.memory_space<vmem>>, vector<1x32xf32>,
      %c1_295 = arith.constant 1 : index
      %c9_296 = arith.constant 9 : index
      %450 = memref.load %arg1[%c1_295, %c9_296] : memref<2x16xi32, #tpu.memory_space<smem>>
      %c8_i32_297 = arith.constant 8 : i32
      %451 = arith.cmpi slt, %450, %c8_i32_297 : i32
      %c10_i32_298 = arith.constant 10 : i32
      %452 = arith.addi %c10_i32_298, %450 : i32
      %c18_i32_299 = arith.constant 18 : i32
      %453 = arith.select %451, %452, %c18_i32_299 : i32
      %454 = arith.index_cast %453 : i32 to index
      %c0_300 = arith.constant 0 : index
      %455 = vector.load %arg21[%454, %c0_300] : memref<19x32xf32, #tpu.memory_space<vmem>>, vector<1x32xf32>
      %c27 = arith.constant 27 : index
      %c0_301 = arith.constant 0 : index
      %456 = vector.load %arg20[%c27, %c0_301] : memref<34x32xf32, #tpu.memory_space<vmem>>, vector<1x32xf32>
      tpu.vector_store %arg20[%c27, %c0_301], %455 {strides = array<i32>} : memref<34x32xf32, #tpu.memory_space<vmem>>, vector<1x32xf32>,
      %c1_302 = arith.constant 1 : index
      %c10_303 = arith.constant 10 : index
      %457 = memref.load %arg1[%c1_302, %c10_303] : memref<2x16xi32, #tpu.memory_space<smem>>
      %c8_i32_304 = arith.constant 8 : i32
      %458 = arith.cmpi slt, %457, %c8_i32_304 : i32
      %c10_i32_305 = arith.constant 10 : i32
      %459 = arith.addi %c10_i32_305, %457 : i32
      %c18_i32_306 = arith.constant 18 : i32
      %460 = arith.select %458, %459, %c18_i32_306 : i32
      %461 = arith.index_cast %460 : i32 to index
      %c0_307 = arith.constant 0 : index
      %462 = vector.load %arg21[%461, %c0_307] : memref<19x32xf32, #tpu.memory_space<vmem>>, vector<1x32xf32>
      %c28 = arith.constant 28 : index
      %c0_308 = arith.constant 0 : index
      %463 = vector.load %arg20[%c28, %c0_308] : memref<34x32xf32, #tpu.memory_space<vmem>>, vector<1x32xf32>
      tpu.vector_store %arg20[%c28, %c0_308], %462 {strides = array<i32>} : memref<34x32xf32, #tpu.memory_space<vmem>>, vector<1x32xf32>,
      %c1_309 = arith.constant 1 : index
      %c11_310 = arith.constant 11 : index
      %464 = memref.load %arg1[%c1_309, %c11_310] : memref<2x16xi32, #tpu.memory_space<smem>>
      %c8_i32_311 = arith.constant 8 : i32
      %465 = arith.cmpi slt, %464, %c8_i32_311 : i32
      %c10_i32_312 = arith.constant 10 : i32
      %466 = arith.addi %c10_i32_312, %464 : i32
      %c18_i32_313 = arith.constant 18 : i32
      %467 = arith.select %465, %466, %c18_i32_313 : i32
      %468 = arith.index_cast %467 : i32 to index
      %c0_314 = arith.constant 0 : index
      %469 = vector.load %arg21[%468, %c0_314] : memref<19x32xf32, #tpu.memory_space<vmem>>, vector<1x32xf32>
      %c29 = arith.constant 29 : index
      %c0_315 = arith.constant 0 : index
      %470 = vector.load %arg20[%c29, %c0_315] : memref<34x32xf32, #tpu.memory_space<vmem>>, vector<1x32xf32>
      tpu.vector_store %arg20[%c29, %c0_315], %469 {strides = array<i32>} : memref<34x32xf32, #tpu.memory_space<vmem>>, vector<1x32xf32>,
      %c1_316 = arith.constant 1 : index
      %c12_317 = arith.constant 12 : index
      %471 = memref.load %arg1[%c1_316, %c12_317] : memref<2x16xi32, #tpu.memory_space<smem>>
      %c8_i32_318 = arith.constant 8 : i32
      %472 = arith.cmpi slt, %471, %c8_i32_318 : i32
      %c10_i32_319 = arith.constant 10 : i32
      %473 = arith.addi %c10_i32_319, %471 : i32
      %c18_i32_320 = arith.constant 18 : i32
      %474 = arith.select %472, %473, %c18_i32_320 : i32
      %475 = arith.index_cast %474 : i32 to index
      %c0_321 = arith.constant 0 : index
      %476 = vector.load %arg21[%475, %c0_321] : memref<19x32xf32, #tpu.memory_space<vmem>>, vector<1x32xf32>
      %c30 = arith.constant 30 : index
      %c0_322 = arith.constant 0 : index
      %477 = vector.load %arg20[%c30, %c0_322] : memref<34x32xf32, #tpu.memory_space<vmem>>, vector<1x32xf32>
      tpu.vector_store %arg20[%c30, %c0_322], %476 {strides = array<i32>} : memref<34x32xf32, #tpu.memory_space<vmem>>, vector<1x32xf32>,
      %c1_323 = arith.constant 1 : index
      %c13_324 = arith.constant 13 : index
      %478 = memref.load %arg1[%c1_323, %c13_324] : memref<2x16xi32, #tpu.memory_space<smem>>
      %c8_i32_325 = arith.constant 8 : i32
      %479 = arith.cmpi slt, %478, %c8_i32_325 : i32
      %c10_i32_326 = arith.constant 10 : i32
      %480 = arith.addi %c10_i32_326, %478 : i32
      %c18_i32_327 = arith.constant 18 : i32
      %481 = arith.select %479, %480, %c18_i32_327 : i32
      %482 = arith.index_cast %481 : i32 to index
      %c0_328 = arith.constant 0 : index
      %483 = vector.load %arg21[%482, %c0_328] : memref<19x32xf32, #tpu.memory_space<vmem>>, vector<1x32xf32>
      %c31 = arith.constant 31 : index
      %c0_329 = arith.constant 0 : index
      %484 = vector.load %arg20[%c31, %c0_329] : memref<34x32xf32, #tpu.memory_space<vmem>>, vector<1x32xf32>
      tpu.vector_store %arg20[%c31, %c0_329], %483 {strides = array<i32>} : memref<34x32xf32, #tpu.memory_space<vmem>>, vector<1x32xf32>,
      %c1_330 = arith.constant 1 : index
      %c14_331 = arith.constant 14 : index
      %485 = memref.load %arg1[%c1_330, %c14_331] : memref<2x16xi32, #tpu.memory_space<smem>>
      %c8_i32_332 = arith.constant 8 : i32
      %486 = arith.cmpi slt, %485, %c8_i32_332 : i32
      %c10_i32_333 = arith.constant 10 : i32
      %487 = arith.addi %c10_i32_333, %485 : i32
      %c18_i32_334 = arith.constant 18 : i32
      %488 = arith.select %486, %487, %c18_i32_334 : i32
      %489 = arith.index_cast %488 : i32 to index
      %c0_335 = arith.constant 0 : index
      %490 = vector.load %arg21[%489, %c0_335] : memref<19x32xf32, #tpu.memory_space<vmem>>, vector<1x32xf32>
      %c32 = arith.constant 32 : index
      %c0_336 = arith.constant 0 : index
      %491 = vector.load %arg20[%c32, %c0_336] : memref<34x32xf32, #tpu.memory_space<vmem>>, vector<1x32xf32>
      tpu.vector_store %arg20[%c32, %c0_336], %490 {strides = array<i32>} : memref<34x32xf32, #tpu.memory_space<vmem>>, vector<1x32xf32>,
      %c1_337 = arith.constant 1 : index
      %c15_338 = arith.constant 15 : index
      %492 = memref.load %arg1[%c1_337, %c15_338] : memref<2x16xi32, #tpu.memory_space<smem>>
      %c8_i32_339 = arith.constant 8 : i32
      %493 = arith.cmpi slt, %492, %c8_i32_339 : i32
      %c10_i32_340 = arith.constant 10 : i32
      %494 = arith.addi %c10_i32_340, %492 : i32
      %c18_i32_341 = arith.constant 18 : i32
      %495 = arith.select %493, %494, %c18_i32_341 : i32
      %496 = arith.index_cast %495 : i32 to index
      %c0_342 = arith.constant 0 : index
      %497 = vector.load %arg21[%496, %c0_342] : memref<19x32xf32, #tpu.memory_space<vmem>>, vector<1x32xf32>
      %c33 = arith.constant 33 : index
      %c0_343 = arith.constant 0 : index
      %498 = vector.load %arg20[%c33, %c0_343] : memref<34x32xf32, #tpu.memory_space<vmem>>, vector<1x32xf32>
      tpu.vector_store %arg20[%c33, %c0_343], %497 {strides = array<i32>} : memref<34x32xf32, #tpu.memory_space<vmem>>, vector<1x32xf32>,
      %c0_344 = arith.constant 0 : index
      %c0_345 = arith.constant 0 : index
      %499 = vector.load %arg6[%c0_344, %c0_345] : memref<17x32xf32, #tpu.memory_space<vmem>>, vector<17x32xf32>
      %c0_346 = arith.constant 0 : index
      %c0_347 = arith.constant 0 : index
      %500 = vector.load %arg20[%c0_346, %c0_347] : memref<34x32xf32, #tpu.memory_space<vmem>>, vector<34x32xf32>
      %501 = tpu.concatenate %499, %499 in 0 : vector<17x32xf32>, vector<17x32xf32> -> vector<34x32xf32>
      %502 = arith.addf %500, %501 : vector<34x32xf32>
      %c0_348 = arith.constant 0 : index
      %c0_349 = arith.constant 0 : index
      %503 = vector.load %arg20[%c0_348, %c0_349] : memref<34x32xf32, #tpu.memory_space<vmem>>, vector<34x32xf32>
      tpu.vector_store %arg20[%c0_348, %c0_349], %502 {strides = array<i32>} : memref<34x32xf32, #tpu.memory_space<vmem>>, vector<34x32xf32>,
    } else {
    }
    %c0 = arith.constant 0 : index
    %c0_1 = arith.constant 0 : index
    %3 = vector.load %arg20[%c0, %c0_1] : memref<34x32xf32, #tpu.memory_space<vmem>>, vector<34x32xf32>
    %c0_2 = arith.constant 0 : index
    %c0_3 = arith.constant 0 : index
    %c0_4 = arith.constant 0 : index
    %4 = vector.load %arg10[%c0_2, %c0_3, %c0_4] : memref<1x4x32xf32, #tpu.memory_space<vmem>>, vector<1x4x32xf32>
    %5 = vector.shape_cast %4 : vector<1x4x32xf32> to vector<4x32xf32>
    %6 = vector.extract_strided_slice %5 {offsets = [0, 0], sizes = [1, 32], strides = [1, 1]} : vector<4x32xf32> to vector<1x32xf32>
    %7 = vector.extract_strided_slice %5 {offsets = [1, 0], sizes = [1, 32], strides = [1, 1]} : vector<4x32xf32> to vector<1x32xf32>
    %cst = arith.constant dense<0.000000e+00> : vector<34xf32>
    %8 = vector.multi_reduction <add>, %3, %cst [1] : vector<34x32xf32> to vector<34xf32>
    %9 = vector.shape_cast %8 : vector<34xf32> to vector<34x1xf32>
    %cst_5 = arith.constant 3.200000e+01 : f32
    %10 = vector.broadcast %cst_5 : f32 to vector<34x1xf32>
    %11 = arith.divf %9, %10 : vector<34x1xf32>
    %12 = vector.broadcast %11 : vector<34x1xf32> to vector<34x32xf32>
    %13 = arith.subf %3, %12 : vector<34x32xf32>
    %14 = arith.mulf %13, %13 : vector<34x32xf32>
    %cst_6 = arith.constant dense<0.000000e+00> : vector<34xf32>
    %15 = vector.multi_reduction <add>, %14, %cst_6 [1] : vector<34x32xf32> to vector<34xf32>
    %16 = vector.shape_cast %15 : vector<34xf32> to vector<34x1xf32>
    %cst_7 = arith.constant 3.200000e+01 : f32
    %17 = vector.broadcast %cst_7 : f32 to vector<34x1xf32>
    %18 = arith.divf %16, %17 : vector<34x1xf32>
    %19 = vector.broadcast %11 : vector<34x1xf32> to vector<34x32xf32>
    %20 = arith.subf %3, %19 : vector<34x32xf32>
    %cst_8 = arith.constant 9.99999997E-7 : f32
    %21 = vector.broadcast %cst_8 : f32 to vector<34x1xf32>
    %22 = arith.addf %18, %21 : vector<34x1xf32>
    %23 = math.rsqrt %22 : vector<34x1xf32>
    %24 = vector.broadcast %23 : vector<34x1xf32> to vector<34x32xf32>
    %25 = arith.mulf %20, %24 : vector<34x32xf32>
    %26 = vector.broadcast %6 : vector<1x32xf32> to vector<34x32xf32>
    %27 = arith.mulf %25, %26 : vector<34x32xf32>
    %28 = vector.broadcast %7 : vector<1x32xf32> to vector<34x32xf32>
    %29 = arith.addf %27, %28 : vector<34x32xf32>
    %c0_9 = arith.constant 0 : index
    %c0_10 = arith.constant 0 : index
    %c0_11 = arith.constant 0 : index
    %30 = vector.load %arg11[%c0_9, %c0_10, %c0_11] : memref<1x32x96xf32, #tpu.memory_space<vmem>>, vector<1x32x96xf32>
    %31 = vector.shape_cast %30 : vector<1x32x96xf32> to vector<32x96xf32>
    %cst_12 = arith.constant dense<0.000000e+00> : vector<34x96xf32>
    %32 = tpu.matmul %29, %31, %cst_12 {dimension_numbers = #tpu.dot_dimension_numbers<[1], [0], [0], [1], [0, 0, 1, 1], [], []>} : vector<34x32xf32>, vector<32x96xf32>, vector<34x96xf32> -> vector<34x96xf32>
    %c0_13 = arith.constant 0 : index
    %c0_14 = arith.constant 0 : index
    %c0_15 = arith.constant 0 : index
    %33 = vector.load %arg12[%c0_13, %c0_14, %c0_15] : memref<1x1x96xf32, #tpu.memory_space<vmem>>, vector<1x1x96xf32>
    %34 = vector.shape_cast %33 : vector<1x1x96xf32> to vector<1x96xf32>
    %35 = vector.broadcast %34 : vector<1x96xf32> to vector<34x96xf32>
    %36 = arith.addf %32, %35 : vector<34x96xf32>
    %37 = vector.extract_strided_slice %36 {offsets = [0, 0], sizes = [17, 96], strides = [1, 1]} : vector<34x96xf32> to vector<17x96xf32>
    %38 = vector.extract_strided_slice %37 {offsets = [0, 0], sizes = [17, 8], strides = [1, 1]} : vector<17x96xf32> to vector<17x8xf32>
    %39 = vector.extract_strided_slice %37 {offsets = [0, 32], sizes = [17, 8], strides = [1, 1]} : vector<17x96xf32> to vector<17x8xf32>
    %40 = vector.extract_strided_slice %37 {offsets = [0, 64], sizes = [17, 8], strides = [1, 1]} : vector<17x96xf32> to vector<17x8xf32>
    %cst_16 = arith.constant dense<0.000000e+00> : vector<17x17xf32>
    %41 = tpu.matmul %38, %39, %cst_16 {dimension_numbers = #tpu.dot_dimension_numbers<[1], [1], [0], [0], [0, 0, 1, 0], [], []>} : vector<17x8xf32>, vector<17x8xf32>, vector<17x17xf32> -> vector<17x17xf32>
    %cst_17 = arith.constant dense<0xFF800000> : vector<17xf32>
    %42 = vector.multi_reduction <maximumf>, %41, %cst_17 [1] : vector<17x17xf32> to vector<17xf32>
    %43 = vector.shape_cast %42 : vector<17xf32> to vector<17x1xf32>
    %44 = vector.broadcast %43 : vector<17x1xf32> to vector<17x17xf32>
    %45 = arith.subf %41, %44 : vector<17x17xf32>
    %46 = math.exp %45 : vector<17x17xf32>
    %cst_18 = arith.constant dense<0.000000e+00> : vector<17xf32>
    %47 = vector.multi_reduction <add>, %46, %cst_18 [1] : vector<17x17xf32> to vector<17xf32>
    %48 = vector.shape_cast %47 : vector<17xf32> to vector<17x1xf32>
    %49 = tpu.reciprocal %48 {approx = true} : vector<17x1xf32> -> vector<17x1xf32>
    %50 = vector.broadcast %49 : vector<17x1xf32> to vector<17x17xf32>
    %51 = arith.mulf %46, %50 : vector<17x17xf32>
    %cst_19 = arith.constant dense<0.000000e+00> : vector<17x8xf32>
    %52 = tpu.matmul %51, %40, %cst_19 {dimension_numbers = #tpu.dot_dimension_numbers<[1], [0], [0], [1], [0, 0, 1, 1], [], []>} : vector<17x17xf32>, vector<17x8xf32>, vector<17x8xf32> -> vector<17x8xf32>
    %53 = vector.extract_strided_slice %37 {offsets = [0, 8], sizes = [17, 8], strides = [1, 1]} : vector<17x96xf32> to vector<17x8xf32>
    %54 = vector.extract_strided_slice %37 {offsets = [0, 40], sizes = [17, 8], strides = [1, 1]} : vector<17x96xf32> to vector<17x8xf32>
    %55 = vector.extract_strided_slice %37 {offsets = [0, 72], sizes = [17, 8], strides = [1, 1]} : vector<17x96xf32> to vector<17x8xf32>
    %cst_20 = arith.constant dense<0.000000e+00> : vector<17x17xf32>
    %56 = tpu.matmul %53, %54, %cst_20 {dimension_numbers = #tpu.dot_dimension_numbers<[1], [1], [0], [0], [0, 0, 1, 0], [], []>} : vector<17x8xf32>, vector<17x8xf32>, vector<17x17xf32> -> vector<17x17xf32>
    %cst_21 = arith.constant dense<0xFF800000> : vector<17xf32>
    %57 = vector.multi_reduction <maximumf>, %56, %cst_21 [1] : vector<17x17xf32> to vector<17xf32>
    %58 = vector.shape_cast %57 : vector<17xf32> to vector<17x1xf32>
    %59 = vector.broadcast %58 : vector<17x1xf32> to vector<17x17xf32>
    %60 = arith.subf %56, %59 : vector<17x17xf32>
    %61 = math.exp %60 : vector<17x17xf32>
    %cst_22 = arith.constant dense<0.000000e+00> : vector<17xf32>
    %62 = vector.multi_reduction <add>, %61, %cst_22 [1] : vector<17x17xf32> to vector<17xf32>
    %63 = vector.shape_cast %62 : vector<17xf32> to vector<17x1xf32>
    %64 = tpu.reciprocal %63 {approx = true} : vector<17x1xf32> -> vector<17x1xf32>
    %65 = vector.broadcast %64 : vector<17x1xf32> to vector<17x17xf32>
    %66 = arith.mulf %61, %65 : vector<17x17xf32>
    %cst_23 = arith.constant dense<0.000000e+00> : vector<17x8xf32>
    %67 = tpu.matmul %66, %55, %cst_23 {dimension_numbers = #tpu.dot_dimension_numbers<[1], [0], [0], [1], [0, 0, 1, 1], [], []>} : vector<17x17xf32>, vector<17x8xf32>, vector<17x8xf32> -> vector<17x8xf32>
    %68 = vector.extract_strided_slice %37 {offsets = [0, 16], sizes = [17, 8], strides = [1, 1]} : vector<17x96xf32> to vector<17x8xf32>
    %69 = vector.extract_strided_slice %37 {offsets = [0, 48], sizes = [17, 8], strides = [1, 1]} : vector<17x96xf32> to vector<17x8xf32>
    %70 = vector.extract_strided_slice %37 {offsets = [0, 80], sizes = [17, 8], strides = [1, 1]} : vector<17x96xf32> to vector<17x8xf32>
    %cst_24 = arith.constant dense<0.000000e+00> : vector<17x17xf32>
    %71 = tpu.matmul %68, %69, %cst_24 {dimension_numbers = #tpu.dot_dimension_numbers<[1], [1], [0], [0], [0, 0, 1, 0], [], []>} : vector<17x8xf32>, vector<17x8xf32>, vector<17x17xf32> -> vector<17x17xf32>
    %cst_25 = arith.constant dense<0xFF800000> : vector<17xf32>
    %72 = vector.multi_reduction <maximumf>, %71, %cst_25 [1] : vector<17x17xf32> to vector<17xf32>
    %73 = vector.shape_cast %72 : vector<17xf32> to vector<17x1xf32>
    %74 = vector.broadcast %73 : vector<17x1xf32> to vector<17x17xf32>
    %75 = arith.subf %71, %74 : vector<17x17xf32>
    %76 = math.exp %75 : vector<17x17xf32>
    %cst_26 = arith.constant dense<0.000000e+00> : vector<17xf32>
    %77 = vector.multi_reduction <add>, %76, %cst_26 [1] : vector<17x17xf32> to vector<17xf32>
    %78 = vector.shape_cast %77 : vector<17xf32> to vector<17x1xf32>
    %79 = tpu.reciprocal %78 {approx = true} : vector<17x1xf32> -> vector<17x1xf32>
    %80 = vector.broadcast %79 : vector<17x1xf32> to vector<17x17xf32>
    %81 = arith.mulf %76, %80 : vector<17x17xf32>
    %cst_27 = arith.constant dense<0.000000e+00> : vector<17x8xf32>
    %82 = tpu.matmul %81, %70, %cst_27 {dimension_numbers = #tpu.dot_dimension_numbers<[1], [0], [0], [1], [0, 0, 1, 1], [], []>} : vector<17x17xf32>, vector<17x8xf32>, vector<17x8xf32> -> vector<17x8xf32>
    %83 = vector.extract_strided_slice %37 {offsets = [0, 24], sizes = [17, 8], strides = [1, 1]} : vector<17x96xf32> to vector<17x8xf32>
    %84 = vector.extract_strided_slice %37 {offsets = [0, 56], sizes = [17, 8], strides = [1, 1]} : vector<17x96xf32> to vector<17x8xf32>
    %85 = vector.extract_strided_slice %37 {offsets = [0, 88], sizes = [17, 8], strides = [1, 1]} : vector<17x96xf32> to vector<17x8xf32>
    %cst_28 = arith.constant dense<0.000000e+00> : vector<17x17xf32>
    %86 = tpu.matmul %83, %84, %cst_28 {dimension_numbers = #tpu.dot_dimension_numbers<[1], [1], [0], [0], [0, 0, 1, 0], [], []>} : vector<17x8xf32>, vector<17x8xf32>, vector<17x17xf32> -> vector<17x17xf32>
    %cst_29 = arith.constant dense<0xFF800000> : vector<17xf32>
    %87 = vector.multi_reduction <maximumf>, %86, %cst_29 [1] : vector<17x17xf32> to vector<17xf32>
    %88 = vector.shape_cast %87 : vector<17xf32> to vector<17x1xf32>
    %89 = vector.broadcast %88 : vector<17x1xf32> to vector<17x17xf32>
    %90 = arith.subf %86, %89 : vector<17x17xf32>
    %91 = math.exp %90 : vector<17x17xf32>
    %cst_30 = arith.constant dense<0.000000e+00> : vector<17xf32>
    %92 = vector.multi_reduction <add>, %91, %cst_30 [1] : vector<17x17xf32> to vector<17xf32>
    %93 = vector.shape_cast %92 : vector<17xf32> to vector<17x1xf32>
    %94 = tpu.reciprocal %93 {approx = true} : vector<17x1xf32> -> vector<17x1xf32>
    %95 = vector.broadcast %94 : vector<17x1xf32> to vector<17x17xf32>
    %96 = arith.mulf %91, %95 : vector<17x17xf32>
    %cst_31 = arith.constant dense<0.000000e+00> : vector<17x8xf32>
    %97 = tpu.matmul %96, %85, %cst_31 {dimension_numbers = #tpu.dot_dimension_numbers<[1], [0], [0], [1], [0, 0, 1, 1], [], []>} : vector<17x17xf32>, vector<17x8xf32>, vector<17x8xf32> -> vector<17x8xf32>
    %98 = tpu.concatenate %52, %67, %82, %97 in 1 : vector<17x8xf32>, vector<17x8xf32>, vector<17x8xf32>, vector<17x8xf32> -> vector<17x32xf32>
    %99 = vector.extract_strided_slice %36 {offsets = [17, 0], sizes = [17, 96], strides = [1, 1]} : vector<34x96xf32> to vector<17x96xf32>
    %100 = vector.extract_strided_slice %99 {offsets = [0, 0], sizes = [17, 8], strides = [1, 1]} : vector<17x96xf32> to vector<17x8xf32>
    %101 = vector.extract_strided_slice %99 {offsets = [0, 32], sizes = [17, 8], strides = [1, 1]} : vector<17x96xf32> to vector<17x8xf32>
    %102 = vector.extract_strided_slice %99 {offsets = [0, 64], sizes = [17, 8], strides = [1, 1]} : vector<17x96xf32> to vector<17x8xf32>
    %cst_32 = arith.constant dense<0.000000e+00> : vector<17x17xf32>
    %103 = tpu.matmul %100, %101, %cst_32 {dimension_numbers = #tpu.dot_dimension_numbers<[1], [1], [0], [0], [0, 0, 1, 0], [], []>} : vector<17x8xf32>, vector<17x8xf32>, vector<17x17xf32> -> vector<17x17xf32>
    %cst_33 = arith.constant dense<0xFF800000> : vector<17xf32>
    %104 = vector.multi_reduction <maximumf>, %103, %cst_33 [1] : vector<17x17xf32> to vector<17xf32>
    %105 = vector.shape_cast %104 : vector<17xf32> to vector<17x1xf32>
    %106 = vector.broadcast %105 : vector<17x1xf32> to vector<17x17xf32>
    %107 = arith.subf %103, %106 : vector<17x17xf32>
    %108 = math.exp %107 : vector<17x17xf32>
    %cst_34 = arith.constant dense<0.000000e+00> : vector<17xf32>
    %109 = vector.multi_reduction <add>, %108, %cst_34 [1] : vector<17x17xf32> to vector<17xf32>
    %110 = vector.shape_cast %109 : vector<17xf32> to vector<17x1xf32>
    %111 = tpu.reciprocal %110 {approx = true} : vector<17x1xf32> -> vector<17x1xf32>
    %112 = vector.broadcast %111 : vector<17x1xf32> to vector<17x17xf32>
    %113 = arith.mulf %108, %112 : vector<17x17xf32>
    %cst_35 = arith.constant dense<0.000000e+00> : vector<17x8xf32>
    %114 = tpu.matmul %113, %102, %cst_35 {dimension_numbers = #tpu.dot_dimension_numbers<[1], [0], [0], [1], [0, 0, 1, 1], [], []>} : vector<17x17xf32>, vector<17x8xf32>, vector<17x8xf32> -> vector<17x8xf32>
    %115 = vector.extract_strided_slice %99 {offsets = [0, 8], sizes = [17, 8], strides = [1, 1]} : vector<17x96xf32> to vector<17x8xf32>
    %116 = vector.extract_strided_slice %99 {offsets = [0, 40], sizes = [17, 8], strides = [1, 1]} : vector<17x96xf32> to vector<17x8xf32>
    %117 = vector.extract_strided_slice %99 {offsets = [0, 72], sizes = [17, 8], strides = [1, 1]} : vector<17x96xf32> to vector<17x8xf32>
    %cst_36 = arith.constant dense<0.000000e+00> : vector<17x17xf32>
    %118 = tpu.matmul %115, %116, %cst_36 {dimension_numbers = #tpu.dot_dimension_numbers<[1], [1], [0], [0], [0, 0, 1, 0], [], []>} : vector<17x8xf32>, vector<17x8xf32>, vector<17x17xf32> -> vector<17x17xf32>
    %cst_37 = arith.constant dense<0xFF800000> : vector<17xf32>
    %119 = vector.multi_reduction <maximumf>, %118, %cst_37 [1] : vector<17x17xf32> to vector<17xf32>
    %120 = vector.shape_cast %119 : vector<17xf32> to vector<17x1xf32>
    %121 = vector.broadcast %120 : vector<17x1xf32> to vector<17x17xf32>
    %122 = arith.subf %118, %121 : vector<17x17xf32>
    %123 = math.exp %122 : vector<17x17xf32>
    %cst_38 = arith.constant dense<0.000000e+00> : vector<17xf32>
    %124 = vector.multi_reduction <add>, %123, %cst_38 [1] : vector<17x17xf32> to vector<17xf32>
    %125 = vector.shape_cast %124 : vector<17xf32> to vector<17x1xf32>
    %126 = tpu.reciprocal %125 {approx = true} : vector<17x1xf32> -> vector<17x1xf32>
    %127 = vector.broadcast %126 : vector<17x1xf32> to vector<17x17xf32>
    %128 = arith.mulf %123, %127 : vector<17x17xf32>
    %cst_39 = arith.constant dense<0.000000e+00> : vector<17x8xf32>
    %129 = tpu.matmul %128, %117, %cst_39 {dimension_numbers = #tpu.dot_dimension_numbers<[1], [0], [0], [1], [0, 0, 1, 1], [], []>} : vector<17x17xf32>, vector<17x8xf32>, vector<17x8xf32> -> vector<17x8xf32>
    %130 = vector.extract_strided_slice %99 {offsets = [0, 16], sizes = [17, 8], strides = [1, 1]} : vector<17x96xf32> to vector<17x8xf32>
    %131 = vector.extract_strided_slice %99 {offsets = [0, 48], sizes = [17, 8], strides = [1, 1]} : vector<17x96xf32> to vector<17x8xf32>
    %132 = vector.extract_strided_slice %99 {offsets = [0, 80], sizes = [17, 8], strides = [1, 1]} : vector<17x96xf32> to vector<17x8xf32>
    %cst_40 = arith.constant dense<0.000000e+00> : vector<17x17xf32>
    %133 = tpu.matmul %130, %131, %cst_40 {dimension_numbers = #tpu.dot_dimension_numbers<[1], [1], [0], [0], [0, 0, 1, 0], [], []>} : vector<17x8xf32>, vector<17x8xf32>, vector<17x17xf32> -> vector<17x17xf32>
    %cst_41 = arith.constant dense<0xFF800000> : vector<17xf32>
    %134 = vector.multi_reduction <maximumf>, %133, %cst_41 [1] : vector<17x17xf32> to vector<17xf32>
    %135 = vector.shape_cast %134 : vector<17xf32> to vector<17x1xf32>
    %136 = vector.broadcast %135 : vector<17x1xf32> to vector<17x17xf32>
    %137 = arith.subf %133, %136 : vector<17x17xf32>
    %138 = math.exp %137 : vector<17x17xf32>
    %cst_42 = arith.constant dense<0.000000e+00> : vector<17xf32>
    %139 = vector.multi_reduction <add>, %138, %cst_42 [1] : vector<17x17xf32> to vector<17xf32>
    %140 = vector.shape_cast %139 : vector<17xf32> to vector<17x1xf32>
    %141 = tpu.reciprocal %140 {approx = true} : vector<17x1xf32> -> vector<17x1xf32>
    %142 = vector.broadcast %141 : vector<17x1xf32> to vector<17x17xf32>
    %143 = arith.mulf %138, %142 : vector<17x17xf32>
    %cst_43 = arith.constant dense<0.000000e+00> : vector<17x8xf32>
    %144 = tpu.matmul %143, %132, %cst_43 {dimension_numbers = #tpu.dot_dimension_numbers<[1], [0], [0], [1], [0, 0, 1, 1], [], []>} : vector<17x17xf32>, vector<17x8xf32>, vector<17x8xf32> -> vector<17x8xf32>
    %145 = vector.extract_strided_slice %99 {offsets = [0, 24], sizes = [17, 8], strides = [1, 1]} : vector<17x96xf32> to vector<17x8xf32>
    %146 = vector.extract_strided_slice %99 {offsets = [0, 56], sizes = [17, 8], strides = [1, 1]} : vector<17x96xf32> to vector<17x8xf32>
    %147 = vector.extract_strided_slice %99 {offsets = [0, 88], sizes = [17, 8], strides = [1, 1]} : vector<17x96xf32> to vector<17x8xf32>
    %cst_44 = arith.constant dense<0.000000e+00> : vector<17x17xf32>
    %148 = tpu.matmul %145, %146, %cst_44 {dimension_numbers = #tpu.dot_dimension_numbers<[1], [1], [0], [0], [0, 0, 1, 0], [], []>} : vector<17x8xf32>, vector<17x8xf32>, vector<17x17xf32> -> vector<17x17xf32>
    %cst_45 = arith.constant dense<0xFF800000> : vector<17xf32>
    %149 = vector.multi_reduction <maximumf>, %148, %cst_45 [1] : vector<17x17xf32> to vector<17xf32>
    %150 = vector.shape_cast %149 : vector<17xf32> to vector<17x1xf32>
    %151 = vector.broadcast %150 : vector<17x1xf32> to vector<17x17xf32>
    %152 = arith.subf %148, %151 : vector<17x17xf32>
    %153 = math.exp %152 : vector<17x17xf32>
    %cst_46 = arith.constant dense<0.000000e+00> : vector<17xf32>
    %154 = vector.multi_reduction <add>, %153, %cst_46 [1] : vector<17x17xf32> to vector<17xf32>
    %155 = vector.shape_cast %154 : vector<17xf32> to vector<17x1xf32>
    %156 = tpu.reciprocal %155 {approx = true} : vector<17x1xf32> -> vector<17x1xf32>
    %157 = vector.broadcast %156 : vector<17x1xf32> to vector<17x17xf32>
    %158 = arith.mulf %153, %157 : vector<17x17xf32>
    %cst_47 = arith.constant dense<0.000000e+00> : vector<17x8xf32>
    %159 = tpu.matmul %158, %147, %cst_47 {dimension_numbers = #tpu.dot_dimension_numbers<[1], [0], [0], [1], [0, 0, 1, 1], [], []>} : vector<17x17xf32>, vector<17x8xf32>, vector<17x8xf32> -> vector<17x8xf32>
    %160 = tpu.concatenate %114, %129, %144, %159 in 1 : vector<17x8xf32>, vector<17x8xf32>, vector<17x8xf32>, vector<17x8xf32> -> vector<17x32xf32>
    %161 = tpu.concatenate %98, %160 in 0 : vector<17x32xf32>, vector<17x32xf32> -> vector<34x32xf32>
    %c0_48 = arith.constant 0 : index
    %c0_49 = arith.constant 0 : index
    %c0_50 = arith.constant 0 : index
    %162 = vector.load %arg13[%c0_48, %c0_49, %c0_50] : memref<1x32x32xf32, #tpu.memory_space<vmem>>, vector<1x32x32xf32>
    %163 = vector.shape_cast %162 : vector<1x32x32xf32> to vector<32x32xf32>
    %cst_51 = arith.constant dense<0.000000e+00> : vector<34x32xf32>
    %164 = tpu.matmul %161, %163, %cst_51 {dimension_numbers = #tpu.dot_dimension_numbers<[1], [0], [0], [1], [0, 0, 1, 1], [], []>} : vector<34x32xf32>, vector<32x32xf32>, vector<34x32xf32> -> vector<34x32xf32>
    %c0_52 = arith.constant 0 : index
    %c0_53 = arith.constant 0 : index
    %c0_54 = arith.constant 0 : index
    %165 = vector.load %arg14[%c0_52, %c0_53, %c0_54] : memref<1x1x32xf32, #tpu.memory_space<vmem>>, vector<1x1x32xf32>
    %166 = vector.shape_cast %165 : vector<1x1x32xf32> to vector<1x32xf32>
    %167 = vector.broadcast %166 : vector<1x32xf32> to vector<34x32xf32>
    %168 = arith.addf %164, %167 : vector<34x32xf32>
    %169 = arith.addf %3, %168 : vector<34x32xf32>
    %170 = vector.extract_strided_slice %5 {offsets = [2, 0], sizes = [1, 32], strides = [1, 1]} : vector<4x32xf32> to vector<1x32xf32>
    %171 = vector.extract_strided_slice %5 {offsets = [3, 0], sizes = [1, 32], strides = [1, 1]} : vector<4x32xf32> to vector<1x32xf32>
    %cst_55 = arith.constant dense<0.000000e+00> : vector<34xf32>
    %172 = vector.multi_reduction <add>, %169, %cst_55 [1] : vector<34x32xf32> to vector<34xf32>
    %173 = vector.shape_cast %172 : vector<34xf32> to vector<34x1xf32>
    %cst_56 = arith.constant 3.200000e+01 : f32
    %174 = vector.broadcast %cst_56 : f32 to vector<34x1xf32>
    %175 = arith.divf %173, %174 : vector<34x1xf32>
    %176 = vector.broadcast %175 : vector<34x1xf32> to vector<34x32xf32>
    %177 = arith.subf %169, %176 : vector<34x32xf32>
    %178 = arith.mulf %177, %177 : vector<34x32xf32>
    %cst_57 = arith.constant dense<0.000000e+00> : vector<34xf32>
    %179 = vector.multi_reduction <add>, %178, %cst_57 [1] : vector<34x32xf32> to vector<34xf32>
    %180 = vector.shape_cast %179 : vector<34xf32> to vector<34x1xf32>
    %cst_58 = arith.constant 3.200000e+01 : f32
    %181 = vector.broadcast %cst_58 : f32 to vector<34x1xf32>
    %182 = arith.divf %180, %181 : vector<34x1xf32>
    %183 = vector.broadcast %175 : vector<34x1xf32> to vector<34x32xf32>
    %184 = arith.subf %169, %183 : vector<34x32xf32>
    %cst_59 = arith.constant 9.99999997E-7 : f32
    %185 = vector.broadcast %cst_59 : f32 to vector<34x1xf32>
    %186 = arith.addf %182, %185 : vector<34x1xf32>
    %187 = math.rsqrt %186 : vector<34x1xf32>
    %188 = vector.broadcast %187 : vector<34x1xf32> to vector<34x32xf32>
    %189 = arith.mulf %184, %188 : vector<34x32xf32>
    %190 = vector.broadcast %170 : vector<1x32xf32> to vector<34x32xf32>
    %191 = arith.mulf %189, %190 : vector<34x32xf32>
    %192 = vector.broadcast %171 : vector<1x32xf32> to vector<34x32xf32>
    %193 = arith.addf %191, %192 : vector<34x32xf32>
    %c0_60 = arith.constant 0 : index
    %c0_61 = arith.constant 0 : index
    %c0_62 = arith.constant 0 : index
    %194 = vector.load %arg15[%c0_60, %c0_61, %c0_62] : memref<1x32x128xf32, #tpu.memory_space<vmem>>, vector<1x32x128xf32>
    %195 = vector.shape_cast %194 : vector<1x32x128xf32> to vector<32x128xf32>
    %cst_63 = arith.constant dense<0.000000e+00> : vector<34x128xf32>
    %196 = tpu.matmul %193, %195, %cst_63 {dimension_numbers = #tpu.dot_dimension_numbers<[1], [0], [0], [1], [0, 0, 1, 1], [], []>} : vector<34x32xf32>, vector<32x128xf32>, vector<34x128xf32> -> vector<34x128xf32>
    %c0_64 = arith.constant 0 : index
    %c0_65 = arith.constant 0 : index
    %c0_66 = arith.constant 0 : index
    %197 = vector.load %arg16[%c0_64, %c0_65, %c0_66] : memref<1x1x128xf32, #tpu.memory_space<vmem>>, vector<1x1x128xf32>
    %198 = vector.shape_cast %197 : vector<1x1x128xf32> to vector<1x128xf32>
    %199 = vector.broadcast %198 : vector<1x128xf32> to vector<34x128xf32>
    %200 = arith.addf %196, %199 : vector<34x128xf32>
    %cst_67 = arith.constant 5.000000e-01 : f32
    %201 = vector.broadcast %cst_67 : f32 to vector<34x128xf32>
    %202 = arith.mulf %201, %200 : vector<34x128xf32>
    %cst_68 = arith.constant 0.707106769 : f32
    %203 = vector.broadcast %cst_68 : f32 to vector<34x128xf32>
    %204 = arith.mulf %200, %203 : vector<34x128xf32>
    %205 = math.absf %204 : vector<34x128xf32>
    %cst_69 = arith.constant 0.327591091 : f32
    %206 = vector.broadcast %cst_69 : f32 to vector<34x128xf32>
    %207 = arith.mulf %206, %205 : vector<34x128xf32>
    %cst_70 = arith.constant 1.000000e+00 : f32
    %208 = vector.broadcast %cst_70 : f32 to vector<34x128xf32>
    %209 = arith.addf %208, %207 : vector<34x128xf32>
    %cst_71 = arith.constant 1.000000e+00 : f32
    %210 = vector.broadcast %cst_71 : f32 to vector<34x128xf32>
    %211 = arith.divf %210, %209 : vector<34x128xf32>
    %cst_72 = arith.constant 1.06140542 : f32
    %212 = vector.broadcast %cst_72 : f32 to vector<34x128xf32>
    %213 = arith.mulf %212, %211 : vector<34x128xf32>
    %cst_73 = arith.constant -1.45315206 : f32
    %214 = vector.broadcast %cst_73 : f32 to vector<34x128xf32>
    %215 = arith.addf %213, %214 : vector<34x128xf32>
    %216 = arith.mulf %215, %211 : vector<34x128xf32>
    %cst_74 = arith.constant 1.42141378 : f32
    %217 = vector.broadcast %cst_74 : f32 to vector<34x128xf32>
    %218 = arith.addf %216, %217 : vector<34x128xf32>
    %219 = arith.mulf %218, %211 : vector<34x128xf32>
    %cst_75 = arith.constant -0.284496725 : f32
    %220 = vector.broadcast %cst_75 : f32 to vector<34x128xf32>
    %221 = arith.addf %219, %220 : vector<34x128xf32>
    %222 = arith.mulf %221, %211 : vector<34x128xf32>
    %cst_76 = arith.constant 0.254829586 : f32
    %223 = vector.broadcast %cst_76 : f32 to vector<34x128xf32>
    %224 = arith.addf %222, %223 : vector<34x128xf32>
    %225 = arith.mulf %224, %211 : vector<34x128xf32>
    %cst_77 = arith.constant 0.000000e+00 : f32
    %226 = vector.broadcast %cst_77 : f32 to vector<34x128xf32>
    %227 = arith.subf %226, %205 : vector<34x128xf32>
    %228 = arith.mulf %227, %205 : vector<34x128xf32>
    %229 = math.exp %228 : vector<34x128xf32>
    %230 = arith.mulf %225, %229 : vector<34x128xf32>
    %cst_78 = arith.constant 1.000000e+00 : f32
    %231 = vector.broadcast %cst_78 : f32 to vector<34x128xf32>
    %232 = arith.subf %231, %230 : vector<34x128xf32>
    %cst_79 = arith.constant 0.000000e+00 : f32
    %233 = vector.broadcast %cst_79 : f32 to vector<34x128xf32>
    %234 = arith.cmpf oge, %204, %233 : vector<34x128xf32>
    %cst_80 = arith.constant 0.000000e+00 : f32
    %235 = vector.broadcast %cst_80 : f32 to vector<34x128xf32>
    %236 = arith.subf %235, %232 : vector<34x128xf32>
    %237 = arith.select %234, %232, %236 : vector<34x128xi1>, vector<34x128xf32>
    %cst_81 = arith.constant 1.000000e+00 : f32
    %238 = vector.broadcast %cst_81 : f32 to vector<34x128xf32>
    %239 = arith.addf %238, %237 : vector<34x128xf32>
    %240 = arith.mulf %202, %239 : vector<34x128xf32>
    %c0_82 = arith.constant 0 : index
    %c0_83 = arith.constant 0 : index
    %c0_84 = arith.constant 0 : index
    %241 = vector.load %arg17[%c0_82, %c0_83, %c0_84] : memref<1x128x32xf32, #tpu.memory_space<vmem>>, vector<1x128x32xf32>
    %242 = vector.shape_cast %241 : vector<1x128x32xf32> to vector<128x32xf32>
    %cst_85 = arith.constant dense<0.000000e+00> : vector<34x32xf32>
    %243 = tpu.matmul %240, %242, %cst_85 {dimension_numbers = #tpu.dot_dimension_numbers<[1], [0], [0], [1], [0, 0, 1, 1], [], []>} : vector<34x128xf32>, vector<128x32xf32>, vector<34x32xf32> -> vector<34x32xf32>
    %c0_86 = arith.constant 0 : index
    %c0_87 = arith.constant 0 : index
    %c0_88 = arith.constant 0 : index
    %244 = vector.load %arg18[%c0_86, %c0_87, %c0_88] : memref<1x1x32xf32, #tpu.memory_space<vmem>>, vector<1x1x32xf32>
    %245 = vector.shape_cast %244 : vector<1x1x32xf32> to vector<1x32xf32>
    %246 = vector.broadcast %245 : vector<1x32xf32> to vector<34x32xf32>
    %247 = arith.addf %243, %246 : vector<34x32xf32>
    %248 = arith.addf %169, %247 : vector<34x32xf32>
    %c0_89 = arith.constant 0 : index
    %c0_90 = arith.constant 0 : index
    %249 = vector.load %arg20[%c0_89, %c0_90] : memref<34x32xf32, #tpu.memory_space<vmem>>, vector<34x32xf32>
    tpu.vector_store %arg20[%c0_89, %c0_90], %248 {strides = array<i32>} : memref<34x32xf32, #tpu.memory_space<vmem>>, vector<34x32xf32>,
    %c1_i32 = arith.constant 1 : i32
    %250 = arith.cmpi eq, %arg0, %c1_i32 : i32
    %251 = arith.extui %250 : i1 to i32
    %c0_i32_91 = arith.constant 0 : i32
    %252 = arith.cmpi ne, %251, %c0_i32_91 : i32
    scf.if %252 {
      %c0_92 = arith.constant 0 : index
      %c0_93 = arith.constant 0 : index
      %253 = vector.load %arg7[%c0_92, %c0_93] : memref<2x32xf32, #tpu.memory_space<vmem>>, vector<2x32xf32>
      %254 = vector.extract_strided_slice %253 {offsets = [0, 0], sizes = [1, 32], strides = [1, 1]} : vector<2x32xf32> to vector<1x32xf32>
      %255 = vector.extract_strided_slice %253 {offsets = [1, 0], sizes = [1, 32], strides = [1, 1]} : vector<2x32xf32> to vector<1x32xf32>
      %cst_94 = arith.constant dense<0.000000e+00> : vector<34xf32>
      %256 = vector.multi_reduction <add>, %248, %cst_94 [1] : vector<34x32xf32> to vector<34xf32>
      %257 = vector.shape_cast %256 : vector<34xf32> to vector<34x1xf32>
      %cst_95 = arith.constant 3.200000e+01 : f32
      %258 = vector.broadcast %cst_95 : f32 to vector<34x1xf32>
      %259 = arith.divf %257, %258 : vector<34x1xf32>
      %260 = vector.broadcast %259 : vector<34x1xf32> to vector<34x32xf32>
      %261 = arith.subf %248, %260 : vector<34x32xf32>
      %262 = arith.mulf %261, %261 : vector<34x32xf32>
      %cst_96 = arith.constant dense<0.000000e+00> : vector<34xf32>
      %263 = vector.multi_reduction <add>, %262, %cst_96 [1] : vector<34x32xf32> to vector<34xf32>
      %264 = vector.shape_cast %263 : vector<34xf32> to vector<34x1xf32>
      %cst_97 = arith.constant 3.200000e+01 : f32
      %265 = vector.broadcast %cst_97 : f32 to vector<34x1xf32>
      %266 = arith.divf %264, %265 : vector<34x1xf32>
      %267 = vector.broadcast %259 : vector<34x1xf32> to vector<34x32xf32>
      %268 = arith.subf %248, %267 : vector<34x32xf32>
      %cst_98 = arith.constant 9.99999997E-7 : f32
      %269 = vector.broadcast %cst_98 : f32 to vector<34x1xf32>
      %270 = arith.addf %266, %269 : vector<34x1xf32>
      %271 = math.rsqrt %270 : vector<34x1xf32>
      %272 = vector.broadcast %271 : vector<34x1xf32> to vector<34x32xf32>
      %273 = arith.mulf %268, %272 : vector<34x32xf32>
      %274 = vector.broadcast %254 : vector<1x32xf32> to vector<34x32xf32>
      %275 = arith.mulf %273, %274 : vector<34x32xf32>
      %276 = vector.broadcast %255 : vector<1x32xf32> to vector<34x32xf32>
      %277 = arith.addf %275, %276 : vector<34x32xf32>
      %c0_99 = arith.constant 0 : index
      %c0_100 = arith.constant 0 : index
      %278 = vector.load %arg8[%c0_99, %c0_100] : memref<32x48xf32, #tpu.memory_space<vmem>>, vector<32x48xf32>
      %cst_101 = arith.constant dense<0.000000e+00> : vector<34x48xf32>
      %279 = tpu.matmul %277, %278, %cst_101 {dimension_numbers = #tpu.dot_dimension_numbers<[1], [0], [0], [1], [0, 0, 1, 1], [], []>} : vector<34x32xf32>, vector<32x48xf32>, vector<34x48xf32> -> vector<34x48xf32>
      %c0_102 = arith.constant 0 : index
      %c0_103 = arith.constant 0 : index
      %280 = vector.load %arg9[%c0_102, %c0_103] : memref<1x48xf32, #tpu.memory_space<vmem>>, vector<1x48xf32>
      %281 = vector.broadcast %280 : vector<1x48xf32> to vector<34x48xf32>
      %282 = arith.addf %279, %281 : vector<34x48xf32>
      %283 = vector.extract_strided_slice %282 {offsets = [1, 0], sizes = [16, 48], strides = [1, 1]} : vector<34x48xf32> to vector<16x48xf32>
      %c0_104 = arith.constant 0 : index
      %c0_105 = arith.constant 0 : index
      %c0_106 = arith.constant 0 : index
      %284 = vector.load %arg19[%c0_104, %c0_105, %c0_106] : memref<2x16x48xf32, #tpu.memory_space<vmem>>, vector<1x16x48xf32>
      %285 = vector.shape_cast %284 : vector<1x16x48xf32> to vector<16x48xf32>
      %286 = vector.shape_cast %283 : vector<16x48xf32> to vector<1x16x48xf32>
      tpu.vector_store %arg19[%c0_104, %c0_105, %c0_106], %286 {strides = array<i32>} : memref<2x16x48xf32, #tpu.memory_space<vmem>>, vector<1x16x48xf32>,
      %287 = vector.extract_strided_slice %282 {offsets = [18, 0], sizes = [16, 48], strides = [1, 1]} : vector<34x48xf32> to vector<16x48xf32>
      %c1 = arith.constant 1 : index
      %c0_107 = arith.constant 0 : index
      %c0_108 = arith.constant 0 : index
      %288 = vector.load %arg19[%c1, %c0_107, %c0_108] : memref<2x16x48xf32, #tpu.memory_space<vmem>>, vector<1x16x48xf32>
      %289 = vector.shape_cast %288 : vector<1x16x48xf32> to vector<16x48xf32>
      %290 = vector.shape_cast %287 : vector<16x48xf32> to vector<1x16x48xf32>
      tpu.vector_store %arg19[%c1, %c0_107, %c0_108], %290 {strides = array<i32>} : memref<2x16x48xf32, #tpu.memory_space<vmem>>, vector<1x16x48xf32>,
    } else {
    }
    return
  }
  func.func @transform_0(%arg0: i32, %arg1: memref<2x16xi32, #tpu.memory_space<smem>>) -> (i32, i32, i32) {
    %c0_i32 = arith.constant 0 : i32
    %c0_i32_0 = arith.constant 0 : i32
    %c0_i32_1 = arith.constant 0 : i32
    %c0_i32_2 = arith.constant 0 : i32
    return %c0_i32, %c0_i32_0, %c0_i32_1 : i32, i32, i32
  }
  func.func @transform_1(%arg0: i32, %arg1: memref<2x16xi32, #tpu.memory_space<smem>>) -> (i32, i32) {
    %c0_i32 = arith.constant 0 : i32
    %c0_i32_0 = arith.constant 0 : i32
    %c0_i32_1 = arith.constant 0 : i32
    return %c0_i32, %c0_i32_0 : i32, i32
  }
  func.func @transform_2(%arg0: i32, %arg1: memref<2x16xi32, #tpu.memory_space<smem>>) -> (i32, i32) {
    %c0_i32 = arith.constant 0 : i32
    %c0_i32_0 = arith.constant 0 : i32
    %c0_i32_1 = arith.constant 0 : i32
    return %c0_i32, %c0_i32_0 : i32, i32
  }
  func.func @transform_3(%arg0: i32, %arg1: memref<2x16xi32, #tpu.memory_space<smem>>) -> (i32, i32) {
    %c0_i32 = arith.constant 0 : i32
    %c0_i32_0 = arith.constant 0 : i32
    %c0_i32_1 = arith.constant 0 : i32
    return %c0_i32, %c0_i32_0 : i32, i32
  }
  func.func @transform_4(%arg0: i32, %arg1: memref<2x16xi32, #tpu.memory_space<smem>>) -> (i32, i32) {
    %c0_i32 = arith.constant 0 : i32
    %c0_i32_0 = arith.constant 0 : i32
    %c0_i32_1 = arith.constant 0 : i32
    return %c0_i32, %c0_i32_0 : i32, i32
  }
  func.func @transform_5(%arg0: i32, %arg1: memref<2x16xi32, #tpu.memory_space<smem>>) -> (i32, i32) {
    %c0_i32 = arith.constant 0 : i32
    %c0_i32_0 = arith.constant 0 : i32
    %c0_i32_1 = arith.constant 0 : i32
    return %c0_i32, %c0_i32_0 : i32, i32
  }
  func.func @transform_6(%arg0: i32, %arg1: memref<2x16xi32, #tpu.memory_space<smem>>) -> (i32, i32) {
    %c0_i32 = arith.constant 0 : i32
    %c0_i32_0 = arith.constant 0 : i32
    %c0_i32_1 = arith.constant 0 : i32
    return %c0_i32, %c0_i32_0 : i32, i32
  }
  func.func @transform_7(%arg0: i32, %arg1: memref<2x16xi32, #tpu.memory_space<smem>>) -> (i32, i32) {
    %c0_i32 = arith.constant 0 : i32
    %c0_i32_0 = arith.constant 0 : i32
    %c0_i32_1 = arith.constant 0 : i32
    return %c0_i32, %c0_i32_0 : i32, i32
  }
  func.func @transform_8(%arg0: i32, %arg1: memref<2x16xi32, #tpu.memory_space<smem>>) -> (i32, i32, i32) {
    %c0_i32 = arith.constant 0 : i32
    %c0_i32_0 = arith.constant 0 : i32
    %c0_i32_1 = arith.constant 0 : i32
    return %arg0, %c0_i32, %c0_i32_0 : i32, i32, i32
  }
  func.func @transform_9(%arg0: i32, %arg1: memref<2x16xi32, #tpu.memory_space<smem>>) -> (i32, i32, i32) {
    %c0_i32 = arith.constant 0 : i32
    %c0_i32_0 = arith.constant 0 : i32
    %c0_i32_1 = arith.constant 0 : i32
    return %arg0, %c0_i32, %c0_i32_0 : i32, i32, i32
  }
  func.func @transform_10(%arg0: i32, %arg1: memref<2x16xi32, #tpu.memory_space<smem>>) -> (i32, i32, i32) {
    %c0_i32 = arith.constant 0 : i32
    %c0_i32_0 = arith.constant 0 : i32
    %c0_i32_1 = arith.constant 0 : i32
    return %arg0, %c0_i32, %c0_i32_0 : i32, i32, i32
  }
  func.func @transform_11(%arg0: i32, %arg1: memref<2x16xi32, #tpu.memory_space<smem>>) -> (i32, i32, i32) {
    %c0_i32 = arith.constant 0 : i32
    %c0_i32_0 = arith.constant 0 : i32
    %c0_i32_1 = arith.constant 0 : i32
    return %arg0, %c0_i32, %c0_i32_0 : i32, i32, i32
  }
  func.func @transform_12(%arg0: i32, %arg1: memref<2x16xi32, #tpu.memory_space<smem>>) -> (i32, i32, i32) {
    %c0_i32 = arith.constant 0 : i32
    %c0_i32_0 = arith.constant 0 : i32
    %c0_i32_1 = arith.constant 0 : i32
    return %arg0, %c0_i32, %c0_i32_0 : i32, i32, i32
  }
  func.func @transform_13(%arg0: i32, %arg1: memref<2x16xi32, #tpu.memory_space<smem>>) -> (i32, i32, i32) {
    %c0_i32 = arith.constant 0 : i32
    %c0_i32_0 = arith.constant 0 : i32
    %c0_i32_1 = arith.constant 0 : i32
    return %arg0, %c0_i32, %c0_i32_0 : i32, i32, i32
  }
  func.func @transform_14(%arg0: i32, %arg1: memref<2x16xi32, #tpu.memory_space<smem>>) -> (i32, i32, i32) {
    %c0_i32 = arith.constant 0 : i32
    %c0_i32_0 = arith.constant 0 : i32
    %c0_i32_1 = arith.constant 0 : i32
    return %arg0, %c0_i32, %c0_i32_0 : i32, i32, i32
  }
  func.func @transform_15(%arg0: i32, %arg1: memref<2x16xi32, #tpu.memory_space<smem>>) -> (i32, i32, i32) {
    %c0_i32 = arith.constant 0 : i32
    %c0_i32_0 = arith.constant 0 : i32
    %c0_i32_1 = arith.constant 0 : i32
    return %arg0, %c0_i32, %c0_i32_0 : i32, i32, i32
  }
  func.func @transform_16(%arg0: i32, %arg1: memref<2x16xi32, #tpu.memory_space<smem>>) -> (i32, i32, i32) {
    %c0_i32 = arith.constant 0 : i32
    %c0_i32_0 = arith.constant 0 : i32
    %c0_i32_1 = arith.constant 0 : i32
    return %arg0, %c0_i32, %c0_i32_0 : i32, i32, i32
  }
  func.func @transform_17(%arg0: i32, %arg1: memref<2x16xi32, #tpu.memory_space<smem>>) -> (i32, i32, i32) {
    %c0_i32 = arith.constant 0 : i32
    %c0_i32_0 = arith.constant 0 : i32
    %c0_i32_1 = arith.constant 0 : i32
    %c0_i32_2 = arith.constant 0 : i32
    return %c0_i32, %c0_i32_0, %c0_i32_1 : i32, i32, i32
  }
}

</mosaic_0001>

<bundles_post_ra>
// kernel: tpu_custom_call.1
= control target key start
LH: loop header
LB: loop body
LE: loop exit
PB: predicated region body
PF: predicated region fallthrough
CT: control target
= control target key end

     0   :  { %s6891_s0 = inlined_call_operand.vmem [shape: s32[2,16], index: 0, kind: input, shape index: {}]   ;;  %s6892_s1 = inlined_call_operand.vmem [shape: f32[2,9,48], index: 1, kind: input, shape index: {}]   ;;  %s6893_s2 = inlined_call_operand.vmem [shape: f32[48,32], index: 2, kind: input, shape index: {}]   ;;  %s6894_s3 = inlined_call_operand.vmem [shape: f32[1,32], index: 3, kind: input, shape index: {}]   ;;  %s6895_s4 = inlined_call_operand.vmem [shape: f32[1,32], index: 4, kind: input, shape index: {}]   ;;  %s6896_s5 = inlined_call_operand.vmem [shape: f32[17,32], index: 5, kind: input, shape index: {}]   ;;  %s6897_s6 = inlined_call_operand.vmem [shape: f32[2,32], index: 6, kind: input, shape index: {}]   ;;  %s6898_s7 = inlined_call_operand.vmem [shape: f32[32,48], index: 7, kind: input, shape index: {}]   ;;  %s6899_s8 = inlined_call_operand.vmem [shape: f32[1,48], index: 8, kind: input, shape index: {}]   ;;  %s6900_s9 = inlined_call_operand.vmem [shape: f32[2,4,32], index: 9, kind: input, shape index: {}]   ;;  %s6901_s10 = inlined_call_operand.vmem [shape: f32[2,32,96], index: 10, kind: input, shape index: {}]   ;;  %s6902_s11 = inlined_call_operand.vmem [shape: f32[2,1,96], index: 11, kind: input, shape index: {}]   ;;  %s6903_s12 = inlined_call_operand.vmem [shape: f32[2,32,32], index: 12, kind: input, shape index: {}]   ;;  %s6904_s13 = inlined_call_operand.vmem [shape: f32[2,1,32], index: 13, kind: input, shape index: {}]   ;;  %s6905_s14 = inlined_call_operand.vmem [shape: f32[2,32,128], index: 14, kind: input, shape index: {}]   ;;  %s6906_s15 = inlined_call_operand.vmem [shape: f32[2,1,128], index: 15, kind: input, shape index: {}]   ;;  %s6907_s16 = inlined_call_operand.vmem [shape: f32[2,128,32], index: 16, kind: input, shape index: {}]   ;;  %s6908_s17 = inlined_call_operand.vmem [shape: f32[2,1,32], index: 17, kind: input, shape index: {}]   ;;  %s6909_s18 = inlined_call_operand.hbm [shape: f32[2,16,48], index: 18, kind: output, shape index: {}]  }
   0x1   :  { %6926 = sst [smem:[#allocation26_spill]] %s6891_s0 }
   0x2   :  { %6927 = sst [smem:[#allocation27_spill]] %s6892_s1  ;;  %s6943_s29 = sld [smem:[#allocation26_spill]] }
   0x3   :  { %6928 = sst [smem:[#allocation28_spill]] %s6893_s2 }
   0x4   :  { %6929 = sst [smem:[#allocation29_spill]] %s6895_s4 }
   0x5   :  { %6930 = sst [smem:[#allocation30_spill]] %s6897_s6 }
   0x6   :  { %6931 = sst [smem:[#allocation31_spill]] %s6898_s7 }
   0x7   :  { %6932 = sst [smem:[#allocation32_spill]] %s6899_s8 }
   0x8   :  { %6933 = sst [smem:[#allocation33_spill]] %s6900_s9  ;;  %s23_s8 = sshll.u32 %s6943_s29, 4  ;;  %s24_s8 = int_to_ptr.vmem [resolvable:$true] %s23_s8 }
   0x9   :  { %6934 = sst [smem:[#allocation34_spill]] %s6901_s10  ;;  %s5444_s30 = scalar_lea.vmem %s24_s8, 32 }
   0xa   :  { %6935 = sst [smem:[#allocation35_spill]] %s6902_s11  ;;  %p5445_p0 = scmp.ne.s32.totalorder %s24_s8, %s5444_s30 }
   0xb   :  { %6936 = sst [smem:[#allocation36_spill]] %s6903_s12  ;;  %p5449_p1 = scmp.lt.s32.totalorder %s24_s8, %s24_s8 }
   0xc   :  { %6937 = sst [smem:[#allocation37_spill]] %s6904_s13  ;;  %p5450_p2 = scmp.lt.s32.totalorder %s5444_s30, %s5444_s30 }
   0xd   :  { %6938 = sst [smem:[#allocation38_spill]] %s6905_s14 }
   0xe   :  { %6939 = sst [smem:[#allocation39_spill]] %s6906_s15  ;;  %p5451_p3 = por %p5450_p2, %p5449_p1 }
   0xf   :  { %6940 = sst [smem:[#allocation40_spill]] %s6907_s16 }
  0x10   :  { %6941 = sst [smem:[#allocation41_spill]] %s6908_s17  ;;  %p5452_p4 = pnand %p5451_p3, %p5445_p0 }
  0x11   :  { %6942 = sst [smem:[#allocation42_spill]] %s6909_s18 }
  0x12   :  { %5455 = shalt.err (!%p5452_p4)  }
  0x13   :  { %s5496_s0 = smov [#allocation5]  }
  0x14   :  { %26 = dma.vmem_to_smem %s24_s8, 32, %s5496_s0, [#allocation4] }
  0x15   :  { %5486 = dma.done.wait [#allocation4], 32 }
  0x16   :  { %5487 = vsyncadd [#allocation4], 4294967264 }
  0x17   :  { %28 = sfence }
  0x18   :  { %29 = vsyncpa [#allocation7], 0  ;;  %s5617_s19 = smov 0  }
  0x19 LB: > { %6944 = sst [smem:[#allocation10_spill]] %s5494_s19  ;;  %s5623_s1 = sadd.s32 4294967295, %s5494_s19   ;;  %s5494_s19 = sphi %s5617_s19, %s35_s19  }
  0x1a   : > { %6945 = sst [smem:[#allocation11_spill]] %s5623_s1  ;;  %p4301_p5 = scmp.ge.s32.totalorder %s5494_s19, 1 }
  0x1b   : > { %p561_p6 = scmp.lt.s32.totalorder %s5494_s19, 3 }
  0x1d   : > { %p562_p7 = pnand %p4301_p5, %p561_p6 }
  0x1f   : > { %565 = sbr.rel (%p562_p7) target bundleno = 4331 (0x10eb), region = 88 }
  0x26   : > { %p639_p8 = scmp.lt.s32.totalorder %s5623_s1, 1  ;;  %s6947_s9 = sld [smem:[#allocation33_spill]] }
  0x27   : > { %s6949_s10 = sld [smem:[#allocation34_spill]]  ;;  %s6952_s12 = sld [smem:[#allocation36_spill]] }
  0x28   : > { %s5629_s8 = scalar_select %p639_p8, %s5623_s1, 1 }
  0x29   : > { %s6955_s14 = sld [smem:[#allocation38_spill]]  ;;  %s6958_s16 = sld [smem:[#allocation40_spill]] }
  0x2a   : > { %6946 = sst [smem:[#allocation12_spill]] %s5629_s8  ;;  %s4302_s20 = sshll.u32 %s5629_s8, 2 }
  0x2b   : > { %s4461_s21 = sshll.u32 %s5629_s8, 5  ;;  %s4464_s27 = sshll.u32 %s5629_s8, 7 }
  0x2c   : > { %s5636_s23 = scalar_lea.vmem %s6947_s9, %s4302_s20  ;;  %p4311_p9 = scmp.ne.s32.totalorder %s5623_s1, 0 }
  0x2d   : > { %6948 = sst [smem:[#allocation13_spill]] %s5636_s23  ;;  %s5641_s26 = scalar_lea.vmem %s6949_s10, %s4461_s21 }
  0x2e   : > { %6950 = sst [smem:[#allocation14_spill]] %s5641_s26  ;;  %s5650_s19 = scalar_lea.vmem %s6952_s12, %s4461_s21 }
  0x2f   : > { %6953 = sst [smem:[#allocation15_spill]] %s5650_s19  ;;  %s5659_s9 = scalar_lea.vmem %s6955_s14, %s4461_s21 }
  0x30   : > { %6956 = sst [smem:[#allocation16_spill]] %s5659_s9  ;;  %s5669_s30 = scalar_lea.vmem %s6958_s16, %s4464_s27 }
  0x31   : > { %6959 = sst [smem:[#allocation17_spill]] %s5669_s30  ;;  %678 = sbr.rel (%p4311_p9) target bundleno = 342 (0x156), region = 92 }
  0x38   : > { %s6961_s20 = sld [smem:[#allocation28_spill]]  ;;  %s6962_s10 = sld [smem:[#allocation27_spill]]  ;;  %vm694_vm0 = vcmask 392192   ;;  %vm778_vm1 = vcmask 253952   ;;  %v4312_v14 = vld [vmem:[%s6894_s3] ss:$0 sm:$0xff] }
  0x39   : > { %s6963_s4 = sld [smem:[#allocation29_spill]]  ;;  %s883_s21 = sld [smem:[#allocation5]]  ;;  %vm776_vm2 = vcmask 261120   ;;  %v5802_v23 = vld [vmem:[%s6896_s5] sm:$0xff]  ;;  %vm1120_vm3 = vcmask 1040384   ;;  %v1110_v49 = vld [vmem:[%s6896_s5 + $0x8] sm:$0xff] }
  0x3a   : > { %s4320_s2 = sld [smem:[#allocation5 + $0x1]]  ;;  %s4321_s24 = sld [smem:[#allocation5 + $0x2]]  ;;  %v1121_v24 = vrot.slane %v5802_v23, 7  ;;  %v1111_v53 = vld [vmem:[%s6896_s5 + $0x10] sm:$0x1]  ;;  %v1122_v62 = vrot.slane %v1110_v49, 7 }
  0x3b   : > { %s4322_s25 = sld [smem:[#allocation5 + $0x3]]  ;;  %s4323_s29 = sld [smem:[#allocation5 + $0x4]]  ;;  %vm1139_vm4 = vcmask 254976  }
  0x3c   : > { %s4324_s27 = sld [smem:[#allocation5 + $0x5]]  ;;  %s4325_s12 = sld [smem:[#allocation5 + $0x6]] }
  0x3d   : > { %s4327_s0 = sld [smem:[#allocation5 + $0x8]]  ;;  %s4328_s16 = sld [smem:[#allocation5 + $0x9]] }
  0x3e   : > { %v681_v0 = vld [vmem:[%s6961_s20] sm:$0xff]  ;;  %v682_v1 = vld [vmem:[%s6961_s20 + $0x8] sm:$0xff]  ;;  %v683_v2 = vld [vmem:[%s6961_s20 + $0x10] sm:$0xff]  ;;  %s4332_s7 = sld [smem:[#allocation5 + $0xd]]  ;;  %s4334_s1 = sld [smem:[#allocation5 + $0xf]] }
  0x3f   : > { %v5043_v3 = vpack.c.bf16 %v682_v1, %v681_v0  ;;  %v684_v4 = vld [vmem:[%s6961_s20 + $0x18] sm:$0xff]  ;;  %v685_v6 = vld [vmem:[%s6961_s20 + $0x20] sm:$0xff]  ;;  %v686_v7 = vld [vmem:[%s6961_s20 + $0x28] sm:$0xff]  ;;  %p884_p10 = scmp.lt.s32.totalorder %s883_s21, 8  ;;  %s885_s28 = sadd.s32 1, %s883_s21  ;;  %v1124_v1 = vrot.slane %v1111_v53, 7 }
  0x40   : > { %v5047_v5 = vpack.c.bf16 %v684_v4, %v683_v2  ;;  %v679_v8 = vld [vmem:[%s6962_s10] sm:$0xff]  ;;  %v4315_v9 = vld [vmem:[%s6962_s10 + $0x10] sm:$0xff]  ;;  %v5051_v10 = vpack.c.bf16 %v686_v7, %v685_v6  ;;  %v680_v11 = vld [vmem:[%s6962_s10 + $0x8] sm:$0x1]  ;;  %p891_p11 = scmp.lt.s32.totalorder %s4320_s2, 8  ;;  %s892_s6 = sadd.s32 1, %s4320_s2  ;;  %v1129_v2 = vsel %vm1120_vm3, %v1111_v53, %v1121_v24 }
  0x41   : > { %5044 = vmatprep.subr.bf16.mxu0 %v5043_v3  ;;  %5056 = vmatprep.subr.bf16.mxu1 %v5043_v3  ;;  %v4316_v12 = vld [vmem:[%s6962_s10 + $0x18] sm:$0x1]  ;;  %v879_v13 = vld [vmem:[%s6963_s4] sm:$0x1]  ;;  %p898_p12 = scmp.lt.s32.totalorder %s4321_s24, 8  ;;  %s899_s22 = sadd.s32 1, %s4321_s24  ;;  %v1125_v7 = vsel %vm1120_vm3, %v1122_v62, %v1124_v1 }
  0x42   : > { %5046 = vmatpush3.bf16.msra.mxu0 %v5043_v3  ;;  %5058 = vmatpush3.bf16.msra.mxu1 %v5043_v3  ;;  %880 = vst.msk [vmem:[#allocation3 + $0x12] sm:$0x1] %vm778_vm1, %v879_v13  ;;  %s4326_s10 = sld [smem:[#allocation5 + $0x7]]  ;;  %s7004_s28 = smov (!%p884_p10, %s885_s28), 18 }
  0x43   : > { %5048 = vmatprep.subr.bf16.mxu0 %v5047_v5  ;;  %5060 = vmatprep.subr.bf16.mxu1 %v5047_v5  ;;  %s7006_s6 = smov (!%p891_p11, %s892_s6), 18  ;;  %s7008_s22 = smov (!%p898_p12, %s899_s22), 18 }
  0x44   : > { %4646 = vmatprep.mubr.msk.f32.mxu0 %vm694_vm0, %v679_v8  ;;  %4661 = vmatprep.mubr.msk.f32.mxu1 %vm694_vm0, %v4315_v9  ;;  %p905_p13 = scmp.lt.s32.totalorder %s4322_s25, 8  ;;  %s906_s18 = sadd.s32 1, %s4322_s25 }
  0x45   : > { %p912_p0 = scmp.lt.s32.totalorder %s4323_s29, 8  ;;  %s913_s4 = sadd.s32 1, %s4323_s29 }
  0x46   : > { %5050 = vmatpush3.bf16.msra.mxu0 %v5047_v5  ;;  %5062 = vmatpush3.bf16.msra.mxu1 %v5047_v5  ;;  %p919_p1 = scmp.lt.s32.totalorder %s4324_s27, 8  ;;  %s920_s14 = sadd.s32 1, %s4324_s27  ;;  %v1123_v5 = vsel %vm1120_vm3, %v1121_v24, %v1122_v62 }
  0x47   : > { %5052 = vmatprep.subr.bf16.mxu0 %v5051_v10  ;;  %5064 = vmatprep.subr.bf16.mxu1 %v5051_v10  ;;  %s7010_s18 = smov (!%p905_p13, %s906_s18), 18  ;;  %s7012_s4 = smov (!%p912_p0, %s913_s4), 18 }
  0x48   : > { %s7014_s14 = smov (!%p919_p1, %s920_s14), 18  ;;  %p926_p2 = scmp.lt.s32.totalorder %s4325_s12, 8 }
  0x49   : > { %s4329_s21 = sld [smem:[#allocation5 + $0xa]]  ;;  %s927_s2 = sadd.s32 1, %s4325_s12 }
  0x4a   : > { %5054 = vmatpush3.bf16.msra.mxu0 %v5051_v10  ;;  %5066 = vmatpush3.bf16.msra.mxu1 %v5051_v10  ;;  %p933_p3 = scmp.lt.s32.totalorder %s4326_s10, 8  ;;  %s934_s24 = sadd.s32 1, %s4326_s10 }
  0x4b   : > { %s7016_s2 = smov (!%p926_p2, %s927_s2), 18  ;;  %p940_p4 = scmp.lt.s32.totalorder %s4327_s0, 8 }
  0x4c   : > { %s7018_s24 = smov (!%p933_p3, %s934_s24), 18  ;;  %s941_s25 = sadd.s32 1, %s4327_s0 }
  0x4d   : > { %4647 = vmatmul.mubr.msk.f32.vlgmr.msra.gmra.mrb[0].mxu0 %vm694_vm0, %v680_v11  ;;  %4662 = vmatmul.mubr.msk.f32.vlgmr.msra.gmra.mrb[0].mxu1 %vm694_vm0, %v4316_v12  ;;  %p947_p5 = scmp.lt.s32.totalorder %s4328_s16, 8  ;;  %s948_s29 = sadd.s32 1, %s4328_s16 }
  0x4e   : > { %s7020_s25 = smov (!%p940_p4, %s941_s25), 18  ;;  %s4330_s20 = sld [smem:[#allocation5 + $0xb]] }
  0x4f   : > { %p954_p6 = scmp.lt.s32.totalorder %s4329_s21, 8  ;;  %s955_s27 = sadd.s32 1, %s4329_s21 }
  0x50   : > { %s7022_s29 = smov (!%p947_p5, %s948_s29), 18  ;;  %s4331_s12 = sld [smem:[#allocation5 + $0xc]] }
  0x51   : > { %s7024_s27 = smov (!%p954_p6, %s955_s27), 18  ;;  %s4333_s10 = sld [smem:[#allocation5 + $0xe]] }
  0x52   : > { %s4335_s17 = sld [smem:[#allocation5 + $0x80]]  ;;  %s4336_s15 = sld [smem:[#allocation5 + $0x81]] }
  0x53   : > { %p975_p9 = scmp.lt.s32.totalorder %s4332_s7, 8  ;;  %s976_s16 = sadd.s32 1, %s4332_s7 }
  0x54   : > { %p961_p7 = scmp.lt.s32.totalorder %s4330_s20, 8  ;;  %s962_s30 = sadd.s32 1, %s4330_s20 }
  0x55   : > { %s4337_s21 = sld [smem:[#allocation5 + $0x82]]  ;;  %s7030_s16 = smov (!%p975_p9, %s976_s16), 18 }
  0x56   : > { %p968_p8 = scmp.lt.s32.totalorder %s4331_s12, 8  ;;  %s969_s0 = sadd.s32 1, %s4331_s12 }
  0x57   : > { %s7026_s30 = smov (!%p961_p7, %s962_s30), 18  ;;  %p982_p10 = scmp.lt.s32.totalorder %s4333_s10, 8 }
  0x58   : > { %s7028_s0 = smov (!%p968_p8, %s969_s0), 18  ;;  %s4338_s9 = sld [smem:[#allocation5 + $0x83]] }
  0x59   : > { %s983_s13 = sadd.s32 1, %s4333_s10  ;;  %p989_p11 = scmp.lt.s32.totalorder %s4334_s1, 8 }
  0x5a   : > { %s990_s19 = sadd.s32 1, %s4334_s1  ;;  %p998_p12 = scmp.lt.s32.totalorder %s4335_s17, 8 }
  0x5b   : > { %s999_s11 = sadd.s32 10, %s4335_s17  ;;  %s4339_s8 = sld [smem:[#allocation5 + $0x84]] }
  0x5c   : > { %s7032_s13 = smov (!%p982_p10, %s983_s13), 18  ;;  %s7034_s19 = smov (!%p989_p11, %s990_s19), 18 }
  0x5d   : > { %6964 = sst [smem:[#allocation18_spill]] %s7034_s19  ;;  %s7036_s11 = smov (!%p998_p12, %s999_s11), 18 }
  0x5e   : > { %6965 = sst [smem:[#allocation19_spill]] %s7036_s11  ;;  %p1005_p13 = scmp.lt.s32.totalorder %s4336_s15, 8 }
  0x5f   : > { %s4340_s7 = sld [smem:[#allocation5 + $0x85]]  ;;  %s1006_s20 = sadd.s32 10, %s4336_s15 }
  0x60   : > { %p1012_p0 = scmp.lt.s32.totalorder %s4337_s21, 8  ;;  %s1013_s12 = sadd.s32 10, %s4337_s21 }
  0x61   : > { %s7038_s20 = smov (!%p1005_p13, %s1006_s20), 18  ;;  %p1019_p1 = scmp.lt.s32.totalorder %s4338_s9, 8 }
  0x62   : > { %6966 = sst [smem:[#allocation20_spill]] %s7038_s20  ;;  %s7040_s12 = smov (!%p1012_p0, %s1013_s12), 18 }
  0x63   : > { %6967 = sst [smem:[#allocation21_spill]] %s7040_s12  ;;  %s1020_s1 = sadd.s32 10, %s4338_s9 }
  0x64   : > { %p1026_p2 = scmp.lt.s32.totalorder %s4339_s8, 8  ;;  %s4341_s17 = sld [smem:[#allocation5 + $0x86]] }
  0x65   : > { %s1027_s10 = sadd.s32 10, %s4339_s8  ;;  %s4342_s23 = sld [smem:[#allocation5 + $0x87]] }
  0x66   : > { %s7042_s1 = smov (!%p1019_p1, %s1020_s1), 18  ;;  %p1033_p3 = scmp.lt.s32.totalorder %s4340_s7, 8 }
  0x67   : > { %6968 = sst [smem:[#allocation22_spill]] %s7042_s1  ;;  %s1034_s26 = sadd.s32 10, %s4340_s7 }
  0x68   : > { %s7044_s10 = smov (!%p1026_p2, %s1027_s10), 18  ;;  %s4343_s11 = sld [smem:[#allocation5 + $0x88]] }
  0x69   : > { %6969 = sst [smem:[#allocation23_spill]] %s7044_s10  ;;  %s7046_s26 = smov (!%p1033_p3, %s1034_s26), 18 }
  0x6a   : > { %p1040_p4 = scmp.lt.s32.totalorder %s4341_s17, 8  ;;  %s4344_s15 = sld [smem:[#allocation5 + $0x89]] }
  0x6b   : > { %s1041_s21 = sadd.s32 10, %s4341_s17  ;;  %p1047_p5 = scmp.lt.s32.totalorder %s4342_s23, 8 }
  0x6c   : > { %s1048_s20 = sadd.s32 10, %s4342_s23  ;;  %s4345_s12 = sld [smem:[#allocation5 + $0x8a]] }
  0x6d   : > { %s4346_s9 = sld [smem:[#allocation5 + $0x8b]]  ;;  %s7048_s21 = smov (!%p1040_p4, %s1041_s21), 18 }
  0x6e   : > { %6970 = sst [smem:[#allocation24_spill]] %s7048_s21  ;;  %s7050_s20 = smov (!%p1047_p5, %s1048_s20), 18 }
  0x6f   : > { %6971 = sst [smem:[#allocation25_spill]] %s7050_s20  ;;  %p1054_p6 = scmp.lt.s32.totalorder %s4343_s11, 8 }
  0x70   : > { %s4347_s8 = sld [smem:[#allocation5 + $0x8c]]  ;;  %s1055_s1 = sadd.s32 10, %s4343_s11 }
  0x71   : > { %p1061_p7 = scmp.lt.s32.totalorder %s4344_s15, 8  ;;  %s5762_s7 = sld [smem:[#allocation5 + $0x8d]] }
  0x72   : > { %s1062_s10 = sadd.s32 10, %s4344_s15  ;;  %s5764_s19 = sld [smem:[#allocation5 + $0x8e]] }
  0x73   : > { %s7052_s1 = smov (!%p1054_p6, %s1055_s1), 18  ;;  %p1068_p8 = scmp.lt.s32.totalorder %s4345_s12, 8 }
  0x74   : > { %s5768_s23 = sld [smem:[#allocation5 + $0x8f]]  ;;  %s7054_s10 = smov (!%p1061_p7, %s1062_s10), 18 }
  0x75   : > { %s1069_s17 = sadd.s32 10, %s4345_s12  ;;  %p1075_p9 = scmp.lt.s32.totalorder %s4346_s9, 8 }
  0x76   : > { %s1076_s20 = sadd.s32 10, %s4346_s9  ;;  %p1082_p10 = scmp.lt.s32.totalorder %s4347_s8, 8 }
  0x77   : > { %s1083_s11 = sadd.s32 10, %s4347_s8  ;;  %s7056_s17 = smov (!%p1068_p8, %s1069_s17), 18 }
  0x78   : > { %s7058_s20 = smov (!%p1075_p9, %s1076_s20), 18  ;;  %s7060_s11 = smov (!%p1082_p10, %s1083_s11), 18 }
  0x79   : > { %p1089_p11 = scmp.lt.s32.totalorder %s5762_s7, 8  ;;  %s1090_s12 = sadd.s32 10, %s5762_s7 }
  0x7a   : > { %p1096_p12 = scmp.lt.s32.totalorder %s5764_s19, 8  ;;  %s1097_s21 = sadd.s32 10, %s5764_s19 }
  0x7b   : > { %p1103_p13 = scmp.lt.s32.totalorder %s5768_s23, 8  ;;  %s1104_s9 = sadd.s32 10, %s5768_s23 }
  0x7c   : > { %s7062_s12 = smov (!%p1089_p11, %s1090_s12), 18  ;;  %s7064_s21 = smov (!%p1096_p12, %s1097_s21), 18 }
  0x7d   : > { %s7066_s9 = smov (!%p1103_p13, %s1104_s9), 18  ;;  %s887_s23 = scalar_lea.vmem [#allocation3], %s7004_s28 }
  0x7e   : > { %s894_s7 = scalar_lea.vmem [#allocation3], %s7006_s6  ;;  %s901_s15 = scalar_lea.vmem [#allocation3], %s7008_s22 }
  0x7f   : > { %s908_s19 = scalar_lea.vmem [#allocation3], %s7010_s18  ;;  %s915_s8 = scalar_lea.vmem [#allocation3], %s7012_s4 }
  0x80   : > { %s922_s6 = scalar_lea.vmem [#allocation3], %s7014_s14  ;;  %s929_s28 = scalar_lea.vmem [#allocation3], %s7016_s2 }
  0x81   : > { %s936_s22 = scalar_lea.vmem [#allocation3], %s7018_s24  ;;  %s943_s4 = scalar_lea.vmem [#allocation3], %s7020_s25 }
  0x82   : > { %s950_s18 = scalar_lea.vmem [#allocation3], %s7022_s29  ;;  %s957_s14 = scalar_lea.vmem [#allocation3], %s7024_s27 }
  0x83   : > { %s6972_s2 = sld [smem:[#allocation18_spill]]  ;;  %s964_s24 = scalar_lea.vmem [#allocation3], %s7026_s30 }
  0x84   : > { %s978_s25 = scalar_lea.vmem [#allocation3], %s7030_s16  ;;  %s6975_s29 = sld [smem:[#allocation21_spill]] }
  0x85   : > { %s985_s27 = scalar_lea.vmem [#allocation3], %s7032_s13  ;;  %s6977_s30 = sld [smem:[#allocation23_spill]] }
  0x86   : > { %s6979_s13 = sld [smem:[#allocation25_spill]] }
 0x120   : > { %v4648_v15 = vpop.f32.mrb[0].mxu0  ;;  %v4663_v16 = vpop.f32.mrb[0].mxu1 }
 0x121   : > { %v773_v17 = vadd.f32 %v4648_v15, %v4312_v14  ;;  %v874_v18 = vadd.f32 %v4663_v16, %v4312_v14  ;;  %v767_v19 = vpop.f32.mrb[1].mxu0  ;;  %v868_v20 = vpop.f32.mrb[1].mxu1 }
 0x122   : > { %v768_v21 = vadd.f32 %v4312_v14, %v767_v19  ;;  %v869_v22 = vadd.f32 %v4312_v14, %v868_v20 }
 0x123   : > { %779 = vst.msk [vmem:[#allocation3 + $0x8] sm:$0x1] %vm778_vm1, %v773_v17  ;;  %878 = vst.msk [vmem:[#allocation3 + $0x11] sm:$0x1] %vm778_vm1, %v874_v18 }
 0x124   : > { %777 = vst.msk [vmem:[#allocation3] sm:$0xff] %vm776_vm2, %v768_v21  ;;  %877 = vst.msk [vmem:[#allocation3 + $0x9] sm:$0xff] %vm776_vm2, %v869_v22 }
 0x12b   : > { %v881_v25 = vld [vmem:[#allocation3] sm:$0x1]  ;;  %v888_v26 = vld [vmem:[%s887_s23] sm:$0x1]  ;;  %s6973_s23 = sld [smem:[#allocation19_spill]] }
 0x12c   : > { %v895_v27 = vld [vmem:[%s894_s7] sm:$0x1]  ;;  %882 = vst.msk [vmem:[#allocation2] sm:$0x1] %vm778_vm1, %v881_v25  ;;  %889 = vst.msk [vmem:[#allocation2 + $0x1] sm:$0x1] %vm778_vm1, %v888_v26 }
 0x12d   : > { %896 = vst.msk [vmem:[#allocation2 + $0x2] sm:$0x1] %vm778_vm1, %v895_v27  ;;  %v902_v28 = vld [vmem:[%s901_s15] sm:$0x1]  ;;  %s971_s7 = scalar_lea.vmem [#allocation3], %s7028_s0  ;;  %s6974_s15 = sld [smem:[#allocation20_spill]] }
 0x12e   : > { %v909_v29 = vld [vmem:[%s908_s19] sm:$0x1]  ;;  %903 = vst.msk [vmem:[#allocation2 + $0x3] sm:$0x1] %vm778_vm1, %v902_v28  ;;  %s6976_s19 = sld [smem:[#allocation22_spill]] }
 0x12f   : > { %v916_v30 = vld [vmem:[%s915_s8] sm:$0x1]  ;;  %910 = vst.msk [vmem:[#allocation2 + $0x4] sm:$0x1] %vm778_vm1, %v909_v29  ;;  %s992_s8 = scalar_lea.vmem [#allocation3], %s6972_s2 }
 0x130   : > { %917 = vst.msk [vmem:[#allocation2 + $0x5] sm:$0x1] %vm778_vm1, %v916_v30  ;;  %v923_v31 = vld [vmem:[%s922_s6] sm:$0x1]  ;;  %v995_v42 = vld [vmem:[#allocation3 + $0x9] sm:$0x1] }
 0x131   : > { %v930_v32 = vld [vmem:[%s929_s28] sm:$0x1]  ;;  %924 = vst.msk [vmem:[#allocation2 + $0x6] sm:$0x1] %vm778_vm1, %v923_v31  ;;  %996 = vst.msk [vmem:[#allocation2 + $0x11] sm:$0x1] %vm778_vm1, %v995_v42 }
 0x132   : > { %v937_v33 = vld [vmem:[%s936_s22] sm:$0x1]  ;;  %931 = vst.msk [vmem:[#allocation2 + $0x7] sm:$0x1] %vm778_vm1, %v930_v32  ;;  %s1001_s0 = scalar_lea.vmem [#allocation3], %s6973_s23  ;;  %s6978_s6 = sld [smem:[#allocation24_spill]] }
 0x133   : > { %938 = vst.msk [vmem:[#allocation2 + $0x8] sm:$0x1] %vm778_vm1, %v937_v33  ;;  %v944_v34 = vld [vmem:[%s943_s4] sm:$0x1]  ;;  %s1008_s16 = scalar_lea.vmem [#allocation3], %s6974_s15  ;;  %s1015_s28 = scalar_lea.vmem [#allocation3], %s6975_s29 }
 0x134   : > { %v951_v35 = vld [vmem:[%s950_s18] sm:$0x1]  ;;  %945 = vst.msk [vmem:[#allocation2 + $0x9] sm:$0x1] %vm778_vm1, %v944_v34  ;;  %s1022_s22 = scalar_lea.vmem [#allocation3], %s6976_s19  ;;  %s1029_s4 = scalar_lea.vmem [#allocation3], %s6977_s30 }
 0x135   : > { %v958_v36 = vld [vmem:[%s957_s14] sm:$0x1]  ;;  %952 = vst.msk [vmem:[#allocation2 + $0xa] sm:$0x1] %vm778_vm1, %v951_v35  ;;  %s1036_s18 = scalar_lea.vmem [#allocation3], %s7046_s26  ;;  %s1050_s23 = scalar_lea.vmem [#allocation3], %s6979_s13 }
 0x136   : > { %959 = vst.msk [vmem:[#allocation2 + $0xb] sm:$0x1] %vm778_vm1, %v958_v36  ;;  %v965_v37 = vld [vmem:[%s964_s24] sm:$0x1]  ;;  %s1057_s26 = scalar_lea.vmem [#allocation3], %s7052_s1  ;;  %s1071_s29 = scalar_lea.vmem [#allocation3], %s7056_s17 }
 0x137   : > { %v972_v38 = vld [vmem:[%s971_s7] sm:$0x1]  ;;  %966 = vst.msk [vmem:[#allocation2 + $0xc] sm:$0x1] %vm778_vm1, %v965_v37  ;;  %s1085_s1 = scalar_lea.vmem [#allocation3], %s7060_s11  ;;  %s1092_s19 = scalar_lea.vmem [#allocation3], %s7062_s12 }
 0x138   : > { %v979_v39 = vld [vmem:[%s978_s25] sm:$0x1]  ;;  %973 = vst.msk [vmem:[#allocation2 + $0xd] sm:$0x1] %vm778_vm1, %v972_v38  ;;  %s1043_s24 = scalar_lea.vmem [#allocation3], %s6978_s6  ;;  %s1064_s25 = scalar_lea.vmem [#allocation3], %s7054_s10 }
 0x139   : > { %980 = vst.msk [vmem:[#allocation2 + $0xe] sm:$0x1] %vm778_vm1, %v979_v39  ;;  %v986_v40 = vld [vmem:[%s985_s27] sm:$0x1]  ;;  %s1078_s27 = scalar_lea.vmem [#allocation3], %s7058_s20  ;;  %s1106_s20 = scalar_lea.vmem [#allocation3], %s7066_s9 }
 0x13a   : > { %v993_v41 = vld [vmem:[%s992_s8] sm:$0x1]  ;;  %987 = vst.msk [vmem:[#allocation2 + $0xf] sm:$0x1] %vm778_vm1, %v986_v40  ;;  %s1099_s8 = scalar_lea.vmem [#allocation3], %s7064_s21 }
 0x13b   : > { %994 = vst.msk [vmem:[#allocation2 + $0x10] sm:$0x1] %vm778_vm1, %v993_v41  ;;  %v1002_v43 = vld [vmem:[%s1001_s0] sm:$0x1] }
 0x13c   : > { %v1009_v44 = vld [vmem:[%s1008_s16] sm:$0x1]  ;;  %1003 = vst.msk [vmem:[#allocation2 + $0x12] sm:$0x1] %vm778_vm1, %v1002_v43 }
 0x13d   : > { %v1016_v45 = vld [vmem:[%s1015_s28] sm:$0x1]  ;;  %1010 = vst.msk [vmem:[#allocation2 + $0x13] sm:$0x1] %vm778_vm1, %v1009_v44 }
 0x13e   : > { %1017 = vst.msk [vmem:[#allocation2 + $0x14] sm:$0x1] %vm778_vm1, %v1016_v45  ;;  %v1023_v46 = vld [vmem:[%s1022_s22] sm:$0x1] }
 0x13f   : > { %v1030_v47 = vld [vmem:[%s1029_s4] sm:$0x1]  ;;  %1024 = vst.msk [vmem:[#allocation2 + $0x15] sm:$0x1] %vm778_vm1, %v1023_v46 }
 0x140   : > { %v1037_v48 = vld [vmem:[%s1036_s18] sm:$0x1]  ;;  %1031 = vst.msk [vmem:[#allocation2 + $0x16] sm:$0x1] %vm778_vm1, %v1030_v47 }
 0x141   : > { %1038 = vst.msk [vmem:[#allocation2 + $0x17] sm:$0x1] %vm778_vm1, %v1037_v48  ;;  %v1044_v50 = vld [vmem:[%s1043_s24] sm:$0x1]  ;;  %v1113_v0 = vld [vmem:[#allocation2 + $0x8] sm:$0xff] }
 0x142   : > { %v1051_v51 = vld [vmem:[%s1050_s23] sm:$0x1]  ;;  %1045 = vst.msk [vmem:[#allocation2 + $0x18] sm:$0x1] %vm778_vm1, %v1044_v50  ;;  %v1131_v3 = vadd.f32 %v1113_v0, %v1110_v49 }
 0x143   : > { %v1058_v52 = vld [vmem:[%s1057_s26] sm:$0x1]  ;;  %1052 = vst.msk [vmem:[#allocation2 + $0x19] sm:$0x1] %vm778_vm1, %v1051_v51 }
 0x144   : > { %1059 = vst.msk [vmem:[#allocation2 + $0x1a] sm:$0x1] %vm778_vm1, %v1058_v52  ;;  %v1065_v54 = vld [vmem:[%s1064_s25] sm:$0x1] }
 0x145   : > { %v1072_v55 = vld [vmem:[%s1071_s29] sm:$0x1]  ;;  %1066 = vst.msk [vmem:[#allocation2 + $0x1b] sm:$0x1] %vm778_vm1, %v1065_v54 }
 0x146   : > { %v1079_v56 = vld [vmem:[%s1078_s27] sm:$0x1]  ;;  %1073 = vst.msk [vmem:[#allocation2 + $0x1c] sm:$0x1] %vm778_vm1, %v1072_v55 }
 0x147   : > { %1080 = vst.msk [vmem:[#allocation2 + $0x1d] sm:$0x1] %vm778_vm1, %v1079_v56  ;;  %v1086_v57 = vld [vmem:[%s1085_s1] sm:$0x1] }
 0x148   : > { %v1093_v58 = vld [vmem:[%s1092_s19] sm:$0x1]  ;;  %1087 = vst.msk [vmem:[#allocation2 + $0x1e] sm:$0x1] %vm778_vm1, %v1086_v57  ;;  %v1114_v4 = vld [vmem:[#allocation2 + $0x10] sm:$0xff] }
 0x149   : > { %v1100_v59 = vld [vmem:[%s1099_s8] sm:$0x1]  ;;  %1094 = vst.msk [vmem:[#allocation2 + $0x1f] sm:$0x1] %vm778_vm1, %v1093_v58  ;;  %v1132_v6 = vadd.f32 %v1129_v2, %v1114_v4 }
 0x14a   : > { %1101 = vst.msk [vmem:[#allocation2 + $0x20] sm:$0x1] %vm778_vm1, %v1100_v59  ;;  %v1107_v60 = vld [vmem:[%s1106_s20] sm:$0x1] }
 0x14b   : > { %v1112_v61 = vld [vmem:[#allocation2] sm:$0xff]  ;;  %1108 = vst.msk [vmem:[#allocation2 + $0x21] sm:$0x1] %vm778_vm1, %v1107_v60 }
 0x14c   : > { %v1130_v63 = vadd.f32 %v1112_v61, %v5802_v23  ;;  %1136 = vst.msk [vmem:[#allocation2 + $0x8] sm:$0xff] %vm776_vm2, %v1131_v3  ;;  %1137 = vst.msk [vmem:[#allocation2 + $0x10] sm:$0xff] %vm776_vm2, %v1132_v6 }
 0x14e   : > { %1135 = vst.msk [vmem:[#allocation2] sm:$0xff] %vm776_vm2, %v1130_v63 }
 0x150   : > { %v1115_v8 = vld [vmem:[#allocation2 + $0x18] sm:$0xff] }
 0x151   : > { %v1133_v10 = vadd.f32 %v1123_v5, %v1115_v8 }
 0x152   : > { %v1116_v9 = vld [vmem:[#allocation2 + $0x20] sm:$0x3] }
 0x153   : > { %v1134_v11 = vadd.f32 %v1125_v7, %v1116_v9  ;;  %1138 = vst.msk [vmem:[#allocation2 + $0x18] sm:$0xff] %vm776_vm2, %v1133_v10 }
 0x155   : > { %1140 = vst.msk [vmem:[#allocation2 + $0x20] sm:$0x3] %vm1139_vm4, %v1134_v11 }
 0x156 PF: > { %v1141_v12 = vld [vmem:[#allocation2] sm:$0xff]  ;;  %vm1147_vm5 = vcmask 261120   ;;  %v1143_v13 = vld [vmem:[#allocation2 + $0x10] sm:$0xff]  ;;  %v1142_v14 = vld [vmem:[#allocation2 + $0x8] sm:$0xff]  ;;  %s6980_s10 = sld [smem:[#allocation14_spill]]  ;;  %v5497_v36 = vmov 0.0|0.0   ;;  %v1215_v43 = vlaneseq }
 0x157   : > { %v1148_v15 = vsel %vm1147_vm5, %v1141_v12, 0.0  ;;  %v1154_v16 = vsel %vm1147_vm5, %v1143_v13, 0.0  ;;  %v1151_v17 = vsel %vm1147_vm5, %v1142_v14, 0.0  ;;  %5067 = vmatprep.subr.bf16.mxu0 %v5497_v36  ;;  %vm5498_vm6 = vmmov 0   ;;  %5073 = vmatprep.subr.bf16.mxu1 %v5497_v36  ;;  %s6981_s17 = sld [smem:[#allocation13_spill]]  ;;  %s6982_s11 = sld [smem:[#allocation12_spill]] }
 0x158   : > { %1149 = vadd.xlane.f32.xlu0 %v1148_v15  ;;  %1155 = vadd.xlane.f32.xlu1 %v1154_v16  ;;  %v5499_v39 = vmov 0.0   ;;  %v5907_v49 = vshrl.u32 %v1215_v43, 7  ;;  %s6983_s9 = sld [smem:[#allocation35_spill]]  ;;  %s5500_s0 = smov 96   ;;  %vm1160_vm7 = vcmask 254976   ;;  %vm1358_vm8 = vcmask 64512  }
 0x159   : > { %4672 = vmatprep.mubr.msk.f32.mxu0 %vm5498_vm6, %v5499_v39  ;;  %4693 = vmatprep.mubr.msk.f32.mxu1 %vm5498_vm6, %v5499_v39  ;;  %vm5963_vm9 = vmpackc.low %vm1358_vm8, %vm1358_vm8  ;;  %vm1451_vm10 = vcmask 138240   ;;  %vm1458_vm11 = vcmask 131072   ;;  %s5501_s16 = smov 64   ;;  %s5502_s6 = smov 88   ;;  %vm2343_vm12 = vcmask 1046528   ;;  %vm1503_vm13 = vcmask 1040384  }
 0x15a   : > { %v1217_v52 = vsub.s32 0, %v5907_v49  ;;  %v1226_v54 = vsub.s32 1, %v5907_v49  ;;  %s5503_s28 = smov 80   ;;  %s5504_s13 = smov 120   ;;  %vm2333_vm14 = vcmask 130048   ;;  %vm2337_vm15 = vcmask 195584  }
 0x15b   : > { %s5505_s22 = smov 112   ;;  %s5506_s4 = smov 104  }
 0x15c   : > { %1152 = vadd.xlane.f32.xlu0 %v1151_v17  ;;  %v1233_v33 = vld [vmem:[%s6980_s10] sm:$0xff]  ;;  %v1234_v34 = vld [vmem:[%s6980_s10 + $0x8] sm:$0xff]  ;;  %v1235_v35 = vld [vmem:[%s6980_s10 + $0x10] sm:$0xff]  ;;  %s5507_s18 = smov 72   ;;  %s5508_s14 = smov 56  }
 0x15d   : > { %v5068_v37 = vpack.c.bf16 %v1234_v34, %v1233_v33  ;;  %v1236_v38 = vld [vmem:[%s6980_s10 + $0x18] sm:$0xff]  ;;  %v1146_v53 = vld [vmem:[%s6981_s17] sm:$0xf]  ;;  %s5509_s2 = smov 48   ;;  %s5510_s24 = smov 40  }
 0x15e   : > { %v5071_v40 = vpack.c.bf16 %v1236_v38, %v1235_v35  ;;  %v5914_v55 = vrot.slane %v1146_v53, %v1217_v52  ;;  %v5918_v58 = vrot.slane %v1146_v53, %v1226_v54  ;;  %s6984_s30 = scalar_lea.vmem %s6983_s9, %s6982_s11  ;;  %v1145_v16 = vld [vmem:[#allocation2 + $0x20] sm:$0x3]  ;;  %s6987_s23 = sld [smem:[#allocation15_spill]] }
 0x15f   : > { %5069 = vmatpush3.bf16.msra.mxu0 %v5068_v37  ;;  %v5940_v7 = vld [vmem:[%s6984_s30] ss:$0 sm:$0xff]  ;;  %v1161_v17 = vsel %vm1160_vm7, %v1145_v16, 0.0  ;;  %s5511_s26 = smov 8   ;;  %s5512_s7 = smov 16  }
 0x160   : > { %5070 = vmatprep.subr.bf16.mxu0 %v5497_v36  ;;  %s5513_s15 = smov 24   ;;  %s6988_s27 = sld [smem:[#allocation37_spill]] }
 0x161   : > { %s6990_s19 = sld [smem:[#allocation16_spill]]  ;;  %s6991_s8 = sld [smem:[#allocation17_spill]] }
 0x162   : > { %s6994_s30 = sld [smem:[#allocation41_spill]] }
 0x163   : > { %5072 = vmatpush3.bf16.msra.mxu0 %v5071_v40 }
 0x164   : > { %5087 = vmatprep.subr.bf16.mxu0 %v5497_v36 }
 0x166   : > { %s6989_s1 = scalar_lea.vmem %s6988_s27, %s6982_s11 }
 0x1e5   : > { %v1150_v18 = vpop.xlane.xlu0 %1149  ;;  %v1156_v19 = vpop.xlane.xlu1 %1155 }
 0x1e6   : > { %v1165_v20 = vmul.f32 0.03125, %v1150_v18  ;;  %v1167_v21 = vmul.f32 0.03125, %v1156_v19  ;;  %v1144_v18 = vld [vmem:[#allocation2 + $0x18] sm:$0xff] }
 0x1e7   : > { %v1157_v19 = vsel %vm1147_vm5, %v1144_v18, 0.0 }
 0x1e8   : > { %v1170_v22 = vsub.f32 %v1141_v12, %v1165_v20  ;;  %v1172_v23 = vsub.f32 %v1143_v13, %v1167_v21 }
 0x1e9   : > { %v1153_v24 = vpop.xlane.xlu0 %1152 }
 0x1ea   : > { %v1166_v25 = vmul.f32 0.03125, %v1153_v24  ;;  %v1175_v26 = vmul.f32 %v1170_v22, %v1170_v22  ;;  %v1177_v27 = vmul.f32 %v1172_v23, %v1172_v23 }
 0x1ec   : > { %v1171_v28 = vsub.f32 %v1142_v14, %v1166_v25  ;;  %v1180_v29 = vsel %vm1147_vm5, %v1175_v26, 0.0  ;;  %v1186_v30 = vsel %vm1147_vm5, %v1177_v27, 0.0 }
 0x1ed   : > { %1181 = vadd.xlane.f32.xlu1 %v1180_v29 }
 0x1ee   : > { %v1176_v31 = vmul.f32 %v1171_v28, %v1171_v28 }
 0x1f0   : > { %v1183_v32 = vsel %vm1147_vm5, %v1176_v31, 0.0 }
 0x1f1   : > { %1187 = vadd.xlane.f32.xlu1 %v1186_v30  ;;  %1184 = vadd.xlane.f32.xlu0 %v1183_v32 }
 0x27a   : > { %v1182_v41 = vpop.xlane.xlu1 %1181 }
 0x27b   : > { %v1195_v42 = vmul.f32 0.03125, %v1182_v41 }
 0x27d   : > { %v1200_v44 = vadd.f32 1e-06, %v1195_v42 }
 0x27e   : > { %v1188_v45 = vpop.xlane.xlu1 %1187  ;;  %v1185_v46 = vpop.xlane.xlu0 %1184 }
 0x27f   : > { %5292 = vrsqrt.f32 %v1200_v44  ;;  %v1197_v47 = vmul.f32 0.03125, %v1188_v45  ;;  %v1196_v48 = vmul.f32 0.03125, %v1185_v46 }
 0x281   : > { %v1202_v50 = vadd.f32 1e-06, %v1197_v47  ;;  %v1201_v51 = vadd.f32 1e-06, %v1196_v48 }
 0x283   : > { %5294 = vrsqrt.f32 %v1202_v50 }
 0x284   : > { %5296 = vrsqrt.f32 %v1201_v51 }
 0x289   : > { %v5293_v56 = vpop.eup %5292 }
 0x28a   : > { %v1210_v57 = vmul.f32 %v5293_v56, %v1170_v22 }
 0x28c   : > { %v1219_v59 = vmul.f32 %v5914_v55, %v1210_v57 }
 0x28d   : > { %v5295_v60 = vpop.eup %5294 }
 0x28e   : > { %v5297_v61 = vpop.eup %5296  ;;  %v1228_v62 = vadd.f32 %v5918_v58, %v1219_v59  ;;  %v1212_v0 = vmul.f32 %v5295_v60, %v1172_v23 }
 0x28f   : > { %v1211_v63 = vmul.f32 %v5297_v61, %v1171_v28 }
 0x290   : > { %4673 = vmatmul.mubr.msk.f32.vlgmr.msra.gmra.mrb[0].mxu0 %vm1147_vm5, %v1228_v62  ;;  %v1221_v3 = vmul.f32 %v5914_v55, %v1212_v0 }
 0x291   : > { %4675 = vmatprep.mubr.msk.f32.mxu0 %vm5498_vm6, %v5499_v39  ;;  %v1220_v1 = vmul.f32 %v5914_v55, %v1211_v63 }
 0x292   : > { %v1230_v4 = vadd.f32 %v5918_v58, %v1221_v3 }
 0x293   : > { %v1229_v2 = vadd.f32 %v5918_v58, %v1220_v1 }
 0x295   : > { %4676 = vmatmul.mubr.msk.f32.gmra.mrb[2].mxu0 %vm1147_vm5, %v1229_v2 }
 0x296   : > { %4678 = vmatprep.mubr.msk.f32.mxu0 %vm5498_vm6, %v5499_v39 }
 0x299   : > { %4679 = vmatmul.mubr.msk.f32.gmra.mrb[4].mxu0 %vm1147_vm5, %v1230_v4 }
 0x29a   : > { %4681 = vmatprep.mubr.msk.f32.mxu0 %vm5498_vm6, %v5499_v39 }
 0x363   : > { %v1325_v5 = vpop.f32.mrb[0].mxu0 }
 0x364   : > { %v4674_v6 = vpop.f32.mrb[1].mxu0  ;;  %v5943_v9 = vadd.f32 %v5940_v7, %v1325_v5 }
 0x368   : > { %v1330_v8 = vpop.f32.mrb[2].mxu0 }
 0x369   : > { %v5946_v10 = vadd.f32 %v5940_v7, %v1330_v8  ;;  %v4677_v11 = vpop.f32.mrb[3].mxu0 }
 0x36b   : > { %v5950_v12 = vpack.i.bf16 %v5946_v10, %v5943_v9 }
 0x36c   : > { %v1335_v13 = vpop.f32.mrb[4].mxu0 }
 0x36d   : > { %v5953_v14 = vadd.f32 %v5940_v7, %v1335_v13  ;;  %5213 = vrot.lane.b32.xlu0 %v5950_v12, %s5500_s0  ;;  %v4680_v15 = vpop.f32.mrb[5].mxu0 }
 0x36f   : > { %1356 = vrot.lane.b32.xlu1 %v5953_v14, %s5500_s0 }
 0x38c   : > { %1162 = vadd.xlane.f32.xlu0 %v1161_v17 }
 0x393   : > { %1158 = vadd.xlane.f32.xlu1 %v1157_v19 }
 0x3df   : > { %v5214_v20 = vpop.permute.xlu0 %5213 }
 0x3e0   : > { %v5216_v21 = vunpack.i.h.bf16 %v5214_v20  ;;  %v5215_v22 = vunpack.i.l.bf16 %v5214_v20 }
 0x3e1   : > { %v1357_v25 = vpop.permute.xlu1 %1356 }
 0x3e2   : > { %v5074_v24 = vpack.c.bf16 %v5216_v21, %v5215_v22 }
 0x3e4   : > { %5076 = vmatpush3.bf16.xpose.msk.msra.mxu1 %vm5963_vm9, %v5074_v24 }
 0x3e5   : > { %4691 = vmatprep.subr.mxu1 %v5499_v39 }
 0x3ec   : > { %4692 = vmatpush3.xpose.msk.msra.mxu1 %vm1358_vm8, %v1357_v25 }
 0x3ed   : > { %5077 = vmatprep.subr.bf16.mxu1 %v5497_v36 }
 0x3ef   : > { %4694 = vmatmul.mubr.msk.f32.vlgmr.msra.gmra.mrb[0].mxu1 %vm1358_vm8, %v5943_v9 }
 0x3f0   : > { %4696 = vmatprep.mubr.msk.f32.mxu1 %vm5498_vm6, %v5499_v39 }
 0x3f3   : > { %4697 = vmatmul.mubr.msk.f32.gmra.mrb[2].mxu1 %vm1358_vm8, %v5946_v10 }
 0x3f4   : > { %4699 = vmatprep.mubr.msk.f32.mxu1 %vm5498_vm6, %v5499_v39 }
 0x3f7   : > { %4700 = vmatmul.mubr.msk.f32.gmra.mrb[4].mxu1 %vm1358_vm8, %v5953_v14 }
 0x3f8   : > { %4708 = vmatprep.mubr.msk.f32.mxu1 %vm5498_vm6, %v5499_v39 }
 0x419   : > { %v1163_v26 = vpop.xlane.xlu0 %1162 }
 0x41a   : > { %v1169_v27 = vmul.f32 0.03125, %v1163_v26 }
 0x41c   : > { %v1174_v28 = vsub.f32 %v1145_v16, %v1169_v27 }
 0x41e   : > { %v1179_v29 = vmul.f32 %v1174_v28, %v1174_v28 }
 0x420   : > { %v1159_v30 = vpop.xlane.xlu1 %1158  ;;  %v1192_v31 = vsel %vm1160_vm7, %v1179_v29, 0.0 }
 0x421   : > { %v1168_v32 = vmul.f32 0.03125, %v1159_v30  ;;  %1193 = vadd.xlane.f32.xlu1 %v1192_v31 }
 0x423   : > { %v1173_v33 = vsub.f32 %v1144_v18, %v1168_v32 }
 0x425   : > { %v1178_v34 = vmul.f32 %v1173_v33, %v1173_v33 }
 0x427   : > { %v1189_v35 = vsel %vm1147_vm5, %v1178_v34, 0.0 }
 0x428   : > { %1190 = vadd.xlane.f32.xlu0 %v1189_v35 }
 0x4ae   : > { %v1194_v37 = vpop.xlane.xlu1 %1193 }
 0x4af   : > { %v1199_v38 = vmul.f32 0.03125, %v1194_v37 }
 0x4b1   : > { %v1204_v40 = vadd.f32 1e-06, %v1199_v38 }
 0x4b3   : > { %5298 = vrsqrt.f32 %v1204_v40 }
 0x4b5   : > { %v1191_v41 = vpop.xlane.xlu0 %1190 }
 0x4b6   : > { %v1198_v42 = vmul.f32 0.03125, %v1191_v41 }
 0x4b8   : > { %v1203_v43 = vadd.f32 1e-06, %v1198_v42 }
 0x4ba   : > { %5300 = vrsqrt.f32 %v1203_v43 }
 0x4bd   : > { %v5299_v44 = vpop.eup %5298 }
 0x4be   : > { %v1214_v51 = vmul.f32 %v5299_v44, %v1174_v28  ;;  %v2344_v28 = vrot.slane %v5953_v14, 1 }
 0x4c0   : > { %v1223_v61 = vmul.f32 %v5914_v55, %v1214_v51 }
 0x4c2   : > { %v1437_v45 = vpop.f32.mrb[0].mxu1  ;;  %v1232_v1 = vadd.f32 %v5918_v58, %v1223_v61 }
 0x4c3   : > { %v4695_v46 = vpop.f32.mrb[1].mxu1  ;;  %v1452_v47 = vsel %vm1451_vm10, %v1437_v45, -inf }
 0x4c4   : > { %v5301_v48 = vpop.eup %5300  ;;  %1453 = vmax.xlane.f32.xlu0 %v1452_v47 }
 0x4c5   : > { %v1213_v50 = vmul.f32 %v5301_v48, %v1173_v33 }
 0x4c6   : > { %v1442_v53 = vpop.f32.mrb[2].mxu1 }
 0x4c7   : > { %v4698_v56 = vpop.f32.mrb[3].mxu1  ;;  %v1455_v57 = vsel %vm1451_vm10, %v1442_v53, -inf  ;;  %v1222_v59 = vmul.f32 %v5914_v55, %v1213_v50 }
 0x4c8   : > { %1456 = vmax.xlane.f32.xlu1 %v1455_v57 }
 0x4c9   : > { %v1231_v60 = vadd.f32 %v5918_v58, %v1222_v59 }
 0x4ca   : > { %v1447_v62 = vpop.f32.mrb[4].mxu1 }
 0x4cb   : > { %4682 = vmatmul.mubr.msk.f32.gmra.mrb[6].mxu0 %vm1147_vm5, %v1231_v60  ;;  %v4701_v63 = vpop.f32.mrb[5].mxu1  ;;  %v1459_v0 = vsel %vm1458_vm11, %v1447_v62, -inf }
 0x4cc   : > { %1460 = vmax.xlane.f32.xlu0 %v1459_v0  ;;  %4684 = vmatprep.mubr.msk.f32.mxu0 %vm5498_vm6, %v5499_v39 }
 0x4cf   : > { %4685 = vmatmul.mubr.msk.f32.gmra.mrb[8].mxu0 %vm1147_vm5, %v1232_v1 }
 0x4d0   : > { %4753 = vmatprep.mubr.msk.f32.mxu0 %vm5498_vm6, %v5499_v39 }
 0x551   : > { %v1454_v2 = vpop.xlane.xlu0 %1453 }
 0x552   : > { %v1462_v3 = vsub.f32 %v1437_v45, %v1454_v2 }
 0x554   : > { %v1465_v55 = vmul.f32 1.442695, %v1462_v3 }
 0x555   : > { %v1457_v4 = vpop.xlane.xlu1 %1456 }
 0x556   : > { %5302 = vpow2.f32 %v1465_v55  ;;  %v1463_v5 = vsub.f32 %v1442_v53, %v1457_v4 }
 0x558   : > { %v1467_v6 = vmul.f32 1.442695, %v1463_v5 }
 0x559   : > { %v1461_v15 = vpop.xlane.xlu0 %1460 }
 0x55a   : > { %5304 = vpow2.f32 %v1467_v6  ;;  %v1464_v16 = vsub.f32 %v1447_v62, %v1461_v15 }
 0x55c   : > { %v1469_v17 = vmul.f32 1.442695, %v1464_v16 }
 0x55e   : > { %5306 = vpow2.f32 %v1469_v17 }
 0x560   : > { %v5999_v8 = vpop.eup %5302 }
 0x561   : > { %v1471_v11 = vsel %vm1451_vm10, %v5999_v8, 0.0 }
 0x562   : > { %1472 = vadd.xlane.f32.xlu1 %v1471_v11 }
 0x564   : > { %v6003_v58 = vpop.eup %5304 }
 0x565   : > { %v1474_v13 = vsel %vm1451_vm10, %v6003_v58, 0.0 }
 0x566   : > { %1475 = vadd.xlane.f32.xlu0 %v1474_v13 }
 0x568   : > { %v6025_v18 = vpop.eup %5306 }
 0x569   : > { %v1477_v20 = vsel %vm1458_vm11, %v6025_v18, 0.0 }
 0x573   : > { %1490 = vrot.lane.b32.xlu1 %v5953_v14, %s5501_s16 }
 0x577   : > { %5223 = vrot.lane.b32.xlu1 %v5950_v12, %s5502_s6 }
 0x57b   : > { %1596 = vrot.lane.b32.xlu1 %v5953_v14, %s5502_s6 }
 0x57c   : > { %5218 = vrot.lane.b32.xlu0 %v5950_v12, %s5501_s16 }
 0x580   : > { %5228 = vrot.lane.b32.xlu0 %v5950_v12, %s5503_s28 }
 0x584   : > { %1588 = vrot.lane.b32.xlu0 %v5946_v10, %s5504_s13 }
 0x588   : > { %1832 = vrot.lane.b32.xlu0 %v5953_v14, %s5503_s28 }
 0x58c   : > { %1822 = vrot.lane.b32.xlu0 %v5943_v9, %s5505_s22 }
 0x590   : > { %1826 = vrot.lane.b32.xlu0 %v5953_v14, %s5505_s22 }
 0x59e   : > { %v1340_v19 = vpop.f32.mrb[6].mxu0 }
 0x59f   : > { %v1341_v21 = vadd.f32 %v5940_v7, %v1340_v19  ;;  %1478 = vadd.xlane.f32.xlu1 %v1477_v20  ;;  %v4683_v22 = vpop.f32.mrb[7].mxu0 }
 0x5a1   : > { %v2345_v25 = vrot.slane %v1341_v21, 1 }
 0x5a2   : > { %v1345_v24 = vpop.f32.mrb[8].mxu0 }
 0x5a3   : > { %v1346_v26 = vadd.f32 %v5940_v7, %v1345_v24  ;;  %v4686_v27 = vpop.f32.mrb[9].mxu0  ;;  %v6034_v30 = vsel %vm2343_vm12, %v2344_v28, %v2345_v25 }
 0x5a5   : > { %v6032_v29 = vrot.slane %v1346_v26, 1 }
 0x5a7   : > { %v6037_v31 = vsel %vm2343_vm12, %v2345_v25, %v6032_v29 }
 0x5a8   : > { %v6041_v32 = vpack.i.bf16 %v6037_v31, %v6034_v30 }
 0x5aa   : > { %5238 = vrot.lane.b32.xlu0 %v6041_v32, %s5500_s0 }
 0x5ae   : > { %2060 = vrot.lane.b32.xlu0 %v5946_v10, %s5506_s4 }
 0x5b0   : > { %1586 = vrot.lane.b32.xlu1 %v5943_v9, %s5504_s13 }
 0x5b2   : > { %2353 = vrot.lane.b32.xlu0 %v6032_v29, %s5500_s0  ;;  %s6995_s0 = scalar_lea.vmem %s6994_s30, %s6982_s11 }
 0x5b4   : > { %1590 = vrot.lane.b32.xlu1 %v5953_v14, %s5504_s13 }
 0x5b6   : > { %2589 = vrot.lane.b32.xlu0 %v6032_v29, %s5502_s6 }
 0x5b8   : > { %5233 = vrot.lane.b32.xlu1 %v5950_v12, %s5507_s18 }
 0x5ba   : > { %2579 = vrot.lane.b32.xlu0 %v6034_v30, %s5504_s13 }
 0x5bc   : > { %1824 = vrot.lane.b32.xlu1 %v5946_v10, %s5505_s22 }
 0x5be   : > { %2583 = vrot.lane.b32.xlu0 %v6032_v29, %s5504_s13 }
 0x5c0   : > { %2068 = vrot.lane.b32.xlu1 %v5953_v14, %s5507_s18 }
 0x5c2   : > { %5253 = vrot.lane.b32.xlu0 %v6041_v32, %s5507_s18 }
 0x5c4   : > { %2058 = vrot.lane.b32.xlu1 %v5943_v9, %s5506_s4 }
 0x5c6   : > { %2817 = vrot.lane.b32.xlu0 %v6037_v31, %s5505_s22 }
 0x5c8   : > { %2062 = vrot.lane.b32.xlu1 %v5953_v14, %s5506_s4 }
 0x5ca   : > { %3061 = vrot.lane.b32.xlu0 %v6032_v29, %s5507_s18 }
 0x5cc   : > { %5243 = vrot.lane.b32.xlu1 %v6041_v32, %s5502_s6 }
 0x5ce   : > { %3053 = vrot.lane.b32.xlu0 %v6037_v31, %s5506_s4 }
 0x5d0   : > { %5248 = vrot.lane.b32.xlu1 %v6041_v32, %s5503_s28 }
 0x5d4   : > { %2581 = vrot.lane.b32.xlu1 %v6037_v31, %s5504_s13 }
 0x5d8   : > { %2825 = vrot.lane.b32.xlu1 %v6032_v29, %s5503_s28 }
 0x5dc   : > { %2815 = vrot.lane.b32.xlu1 %v6034_v30, %s5505_s22 }
 0x5e0   : > { %2819 = vrot.lane.b32.xlu1 %v6032_v29, %s5505_s22 }
 0x5e4   : > { %3051 = vrot.lane.b32.xlu1 %v6034_v30, %s5506_s4 }
 0x5e8   : > { %3055 = vrot.lane.b32.xlu1 %v6032_v29, %s5506_s4 }
 0x5ef   : > { %v1473_v7 = vpop.xlane.xlu1 %1472 }
 0x5f0   : > { %5308 = vrcp.f32 %v1473_v7 }
 0x5f3   : > { %v1476_v9 = vpop.xlane.xlu0 %1475  ;;  %v1491_v33 = vpop.permute.xlu1 %1490 }
 0x5f4   : > { %5310 = vrcp.f32 %v1476_v9 }
 0x5f7   : > { %v5219_v10 = vpop.permute.xlu0 %5218  ;;  %v5224_v43 = vpop.permute.xlu1 %5223 }
 0x5f8   : > { %v5221_v34 = vunpack.i.h.bf16 %v5219_v10  ;;  %v5220_v35 = vunpack.i.l.bf16 %v5219_v10  ;;  %v5226_v48 = vunpack.i.h.bf16 %v5224_v43  ;;  %v5225_v50 = vunpack.i.l.bf16 %v5224_v43 }
 0x5fa   : > { %v5078_v37 = vpack.c.bf16 %v5221_v34, %v5220_v35  ;;  %v5309_v40 = vpop.eup %5308  ;;  %v5081_v56 = vpack.c.bf16 %v5226_v48, %v5225_v50 }
 0x5fb   : > { %v5229_v38 = vpop.permute.xlu0 %5228  ;;  %v1483_v45 = vmul.f32 %v5309_v40, %v5999_v8  ;;  %v1597_v59 = vpop.permute.xlu1 %1596 }
 0x5fc   : > { %v5231_v41 = vunpack.i.h.bf16 %v5229_v38  ;;  %v5230_v42 = vunpack.i.l.bf16 %v5229_v38  ;;  %5079 = vmatpush3.bf16.msra.mxu1 %v5078_v37 }
 0x5fd   : > { %4706 = vmatprep.subr.mxu1 %v5499_v39 }
 0x5fe   : > { %v5088_v44 = vpack.c.bf16 %v5231_v41, %v5230_v42  ;;  %v5311_v47 = vpop.eup %5310 }
 0x5ff   : > { %v1589_v46 = vpop.permute.xlu0 %1588  ;;  %v1484_v51 = vmul.f32 %v5311_v47, %v6003_v58 }
 0x600   : > { %4707 = vmatpush3.msk.msra.mxu1 %vm1503_vm13, %v1491_v33  ;;  %5090 = vmatpush3.bf16.xpose.msk.msra.mxu0 %vm5963_vm9, %v5088_v44 }
 0x601   : > { %4709 = vmatmul.mubr.msk.f32.vlgmr.msra.gmra.mrb[6].mxu1 %vm1451_vm10, %v1483_v45  ;;  %5080 = vmatprep.subr.bf16.mxu1 %v5497_v36 }
 0x602   : > { %4711 = vmatprep.mubr.msk.f32.mxu1 %vm5498_vm6, %v5499_v39  ;;  %4751 = vmatprep.subr.mxu0 %v5499_v39 }
 0x603   : > { %v1833_v53 = vpop.permute.xlu0 %1832 }
 0x605   : > { %4712 = vmatmul.mubr.msk.f32.gmra.mrb[8].mxu1 %vm1451_vm10, %v1484_v51 }
 0x606   : > { %4714 = vmatprep.mubr.msk.f32.mxu1 %vm5498_vm6, %v5499_v39 }
 0x607   : > { %5083 = vmatpush3.bf16.xpose.msk.msra.mxu1 %vm5963_vm9, %v5081_v56  ;;  %v1823_v57 = vpop.permute.xlu0 %1822 }
 0x608   : > { %4752 = vmatpush3.xpose.msk.msra.mxu0 %vm1358_vm8, %v1833_v53  ;;  %4721 = vmatprep.subr.mxu1 %v5499_v39 }
 0x609   : > { %5094 = vmatprep.subr.bf16.mxu0 %v5497_v36 }
 0x60b   : > { %4754 = vmatmul.mubr.msk.f32.vlgmr.msra.gmra.mrb[10].mxu0 %vm1358_vm8, %v1823_v57  ;;  %v1827_v5 = vpop.permute.xlu0 %1826 }
 0x60c   : > { %4756 = vmatprep.mubr.msk.f32.mxu0 %vm5498_vm6, %v5499_v39 }
 0x60f   : > { %4722 = vmatpush3.xpose.msk.msra.mxu1 %vm1358_vm8, %v1597_v59 }
 0x610   : > { %5084 = vmatprep.subr.bf16.mxu1 %v5497_v36 }
 0x61c   : > { %v5239_v8 = vpop.permute.xlu0 %5238 }
 0x61d   : > { %v5241_v11 = vunpack.i.h.bf16 %v5239_v8  ;;  %v5240_v58 = vunpack.i.l.bf16 %v5239_v8 }
 0x61f   : > { %v5102_v16 = vpack.c.bf16 %v5241_v11, %v5240_v58 }
 0x620   : > { %v2061_v15 = vpop.permute.xlu0 %2060 }
 0x62c   : > { %v1479_v60 = vpop.xlane.xlu1 %1478 }
 0x62d   : > { %5312 = vrcp.f32 %v1479_v60 }
 0x630   : > { %v1587_v61 = vpop.permute.xlu1 %1586 }
 0x634   : > { %v1591_v62 = vpop.permute.xlu1 %1590 }
 0x637   : > { %v5313_v63 = vpop.eup %5312 }
 0x638   : > { %v5234_v0 = vpop.permute.xlu1 %5233  ;;  %v1485_v1 = vmul.f32 %v5313_v63, %v6025_v18  ;;  %v2354_v18 = vpop.permute.xlu0 %2353 }
 0x639   : > { %v5236_v2 = vunpack.i.h.bf16 %v5234_v0  ;;  %v5235_v3 = vunpack.i.l.bf16 %v5234_v0 }
 0x63a   : > { %4715 = vmatmul.mubr.msk.f32.gmra.mrb[10].mxu1 %vm1451_vm10, %v1485_v1 }
 0x63b   : > { %v5095_v55 = vpack.c.bf16 %v5236_v2, %v5235_v3  ;;  %4723 = vmatprep.mubr.msk.f32.mxu1 %vm5498_vm6, %v5499_v39 }
 0x63c   : > { %v1825_v4 = vpop.permute.xlu1 %1824  ;;  %v2590_v22 = vpop.permute.xlu0 %2589 }
 0x63d   : > { %4757 = vmatmul.mubr.msk.f32.gmra.mrb[12].mxu0 %vm1358_vm8, %v1825_v4 }
 0x63e   : > { %5097 = vmatpush3.bf16.xpose.msk.msra.mxu0 %vm5963_vm9, %v5095_v55  ;;  %4724 = vmatmul.mubr.msk.f32.vlgmr.msra.gmra.mrb[12].mxu1 %vm1358_vm8, %v1587_v61 }
 0x63f   : > { %4759 = vmatprep.mubr.msk.f32.mxu0 %vm5498_vm6, %v5499_v39  ;;  %4726 = vmatprep.mubr.msk.f32.mxu1 %vm5498_vm6, %v5499_v39 }
 0x640   : > { %v2069_v6 = vpop.permute.xlu1 %2068  ;;  %4781 = vmatprep.subr.mxu0 %v5499_v39  ;;  %v2580_v25 = vpop.permute.xlu0 %2579 }
 0x641   : > { %4760 = vmatmul.mubr.msk.f32.gmra.mrb[14].mxu0 %vm1358_vm8, %v1827_v5 }
 0x642   : > { %4727 = vmatmul.mubr.msk.f32.gmra.mrb[14].mxu1 %vm1358_vm8, %v1589_v46  ;;  %4783 = vmatprep.mubr.msk.f32.mxu0 %vm5498_vm6, %v5499_v39 }
 0x643   : > { %4729 = vmatprep.mubr.msk.f32.mxu1 %vm5498_vm6, %v5499_v39 }
 0x644   : > { %v2059_v13 = vpop.permute.xlu1 %2058 }
 0x646   : > { %4782 = vmatpush3.xpose.msk.msra.mxu0 %vm1358_vm8, %v2069_v6  ;;  %4730 = vmatmul.mubr.msk.f32.gmra.mrb[16].mxu1 %vm1358_vm8, %v1591_v62 }
 0x647   : > { %5101 = vmatprep.subr.bf16.mxu0 %v5497_v36  ;;  %4738 = vmatprep.mubr.msk.f32.mxu1 %vm5498_vm6, %v5499_v39 }
 0x648   : > { %v2063_v17 = vpop.permute.xlu1 %2062 }
 0x649   : > { %4784 = vmatmul.mubr.msk.f32.vlgmr.msra.gmra.mrb[16].mxu0 %vm1358_vm8, %v2059_v13 }
 0x64a   : > { %5104 = vmatpush3.bf16.xpose.msk.msra.mxu0 %vm5963_vm9, %v5102_v16  ;;  %4786 = vmatprep.mubr.msk.f32.mxu0 %vm5498_vm6, %v5499_v39 }
 0x64b   : > { %4811 = vmatprep.subr.mxu0 %v5499_v39 }
 0x64c   : > { %v5244_v19 = vpop.permute.xlu1 %5243 }
 0x64d   : > { %4787 = vmatmul.mubr.msk.f32.gmra.mrb[18].mxu0 %vm1358_vm8, %v2061_v15  ;;  %v5246_v20 = vunpack.i.h.bf16 %v5244_v19  ;;  %v5245_v21 = vunpack.i.l.bf16 %v5244_v19 }
 0x64e   : > { %4789 = vmatprep.mubr.msk.f32.mxu0 %vm5498_vm6, %v5499_v39 }
 0x64f   : > { %v5109_v24 = vpack.c.bf16 %v5246_v20, %v5245_v21 }
 0x650   : > { %v5249_v26 = vpop.permute.xlu1 %5248 }
 0x651   : > { %4790 = vmatmul.mubr.msk.f32.gmra.mrb[20].mxu0 %vm1358_vm8, %v2063_v17  ;;  %v5251_v27 = vunpack.i.h.bf16 %v5249_v26  ;;  %v5250_v28 = vunpack.i.l.bf16 %v5249_v26 }
 0x652   : > { %4812 = vmatpush3.xpose.msk.msra.mxu0 %vm1358_vm8, %v2354_v18  ;;  %4813 = vmatprep.mubr.msk.f32.mxu0 %vm5498_vm6, %v5499_v39 }
 0x653   : > { %5108 = vmatprep.subr.bf16.mxu0 %v5497_v36  ;;  %v5116_v7 = vpack.c.bf16 %v5251_v27, %v5250_v28 }
 0x654   : > { %v2582_v9 = vpop.permute.xlu1 %2581 }
 0x655   : > { %4814 = vmatmul.mubr.msk.f32.vlgmr.msra.gmra.mrb[22].mxu0 %vm1358_vm8, %v6034_v30  ;;  %v2584_v30 = vpop.permute.xlu0 %2583 }
 0x656   : > { %5111 = vmatpush3.bf16.xpose.msk.msra.mxu0 %vm5963_vm9, %v5109_v24  ;;  %4816 = vmatprep.mubr.msk.f32.mxu0 %vm5498_vm6, %v5499_v39 }
 0x657   : > { %4841 = vmatprep.subr.mxu0 %v5499_v39 }
 0x658   : > { %v2826_v10 = vpop.permute.xlu1 %2825 }
 0x659   : > { %4817 = vmatmul.mubr.msk.f32.gmra.mrb[24].mxu0 %vm1358_vm8, %v6037_v31  ;;  %v5254_v31 = vpop.permute.xlu0 %5253 }
 0x65a   : > { %4819 = vmatprep.mubr.msk.f32.mxu0 %vm5498_vm6, %v5499_v39  ;;  %v5256_v33 = vunpack.i.h.bf16 %v5254_v31  ;;  %v5255_v34 = vunpack.i.l.bf16 %v5254_v31 }
 0x65c   : > { %v5123_v35 = vpack.c.bf16 %v5256_v33, %v5255_v34  ;;  %v2816_v37 = vpop.permute.xlu1 %2815 }
 0x65d   : > { %4820 = vmatmul.mubr.msk.f32.gmra.mrb[26].mxu0 %vm1358_vm8, %v6032_v29  ;;  %v2818_v38 = vpop.permute.xlu0 %2817 }
 0x65e   : > { %4842 = vmatpush3.xpose.msk.msra.mxu0 %vm1358_vm8, %v2590_v22  ;;  %4843 = vmatprep.mubr.msk.f32.mxu0 %vm5498_vm6, %v5499_v39 }
 0x65f   : > { %5115 = vmatprep.subr.bf16.mxu0 %v5497_v36 }
 0x660   : > { %v2820_v40 = vpop.permute.xlu1 %2819 }
 0x661   : > { %4844 = vmatmul.mubr.msk.f32.vlgmr.msra.gmra.mrb[28].mxu0 %vm1358_vm8, %v2580_v25  ;;  %v3062_v41 = vpop.permute.xlu0 %3061 }
 0x662   : > { %5118 = vmatpush3.bf16.xpose.msk.msra.mxu0 %vm5963_vm9, %v5116_v7  ;;  %4846 = vmatprep.mubr.msk.f32.mxu0 %vm5498_vm6, %v5499_v39 }
 0x663   : > { %4871 = vmatprep.subr.mxu0 %v5499_v39 }
 0x664   : > { %v3052_v23 = vpop.permute.xlu1 %3051 }
 0x665   : > { %4847 = vmatmul.mubr.msk.f32.gmra.mrb[30].mxu0 %vm1358_vm8, %v2582_v9  ;;  %v3054_v42 = vpop.permute.xlu0 %3053 }
 0x666   : > { %4849 = vmatprep.mubr.msk.f32.mxu0 %vm5498_vm6, %v5499_v39 }
 0x668   : > { %v3056_v43 = vpop.permute.xlu1 %3055 }
 0x669   : > { %4850 = vmatmul.mubr.msk.f32.gmra.mrb[32].mxu0 %vm1358_vm8, %v2584_v30 }
 0x66a   : > { %4872 = vmatpush3.xpose.msk.msra.mxu0 %vm1358_vm8, %v2826_v10  ;;  %4873 = vmatprep.mubr.msk.f32.mxu0 %vm5498_vm6, %v5499_v39 }
 0x66b   : > { %5122 = vmatprep.subr.bf16.mxu0 %v5497_v36 }
 0x66d   : > { %4874 = vmatmul.mubr.msk.f32.vlgmr.msra.gmra.mrb[34].mxu0 %vm1358_vm8, %v2816_v37 }
 0x66e   : > { %5125 = vmatpush3.bf16.xpose.msk.msra.mxu0 %vm5963_vm9, %v5123_v35  ;;  %4876 = vmatprep.mubr.msk.f32.mxu0 %vm5498_vm6, %v5499_v39 }
 0x66f   : > { %4901 = vmatprep.subr.mxu0 %v5499_v39 }
 0x671   : > { %4877 = vmatmul.mubr.msk.f32.gmra.mrb[36].mxu0 %vm1358_vm8, %v2818_v38 }
 0x672   : > { %4879 = vmatprep.mubr.msk.f32.mxu0 %vm5498_vm6, %v5499_v39 }
 0x675   : > { %4880 = vmatmul.mubr.msk.f32.gmra.mrb[38].mxu0 %vm1358_vm8, %v2820_v40 }
 0x676   : > { %4902 = vmatpush3.xpose.msk.msra.mxu0 %vm1358_vm8, %v3062_v41  ;;  %4903 = vmatprep.mubr.msk.f32.mxu0 %vm5498_vm6, %v5499_v39 }
 0x677   : > { %5129 = vmatprep.subr.bf16.mxu0 %v5497_v36 }
 0x679   : > { %4904 = vmatmul.mubr.msk.f32.vlgmr.msra.gmra.mrb[40].mxu0 %vm1358_vm8, %v3052_v23 }
 0x67a   : > { %4906 = vmatprep.mubr.msk.f32.mxu0 %vm5498_vm6, %v5499_v39 }
 0x67d   : > { %4907 = vmatmul.mubr.msk.f32.gmra.mrb[42].mxu0 %vm1358_vm8, %v3054_v42 }
 0x67e   : > { %4909 = vmatprep.mubr.msk.f32.mxu0 %vm5498_vm6, %v5499_v39 }
 0x681   : > { %4910 = vmatmul.mubr.msk.f32.gmra.mrb[44].mxu0 %vm1358_vm8, %v3056_v43 }
 0x682   : > { %4935 = vmatprep.mubr.msk.f32.mxu0 %vm5498_vm6, %v5499_v39 }
 0x6d4   : > { %v6199_v44 = vpop.f32.mrb[6].mxu1 }
 0x6d5   : > { %v4710_v45 = vpop.f32.mrb[7].mxu1 }
 0x6d8   : > { %v6201_v46 = vpop.f32.mrb[8].mxu1 }
 0x6d9   : > { %v4713_v47 = vpop.f32.mrb[9].mxu1 }
 0x6de   : > { %v6203_v48 = vpop.f32.mrb[10].mxu0 }
 0x6df   : > { %v4755_v50 = vpop.f32.mrb[11].mxu0  ;;  %v1926_v51 = vsel %vm1451_vm10, %v6203_v48, -inf }
 0x6e0   : > { %1927 = vmax.xlane.f32.xlu0 %v1926_v51 }
 0x70d   : > { %v6207_v53 = vpop.f32.mrb[10].mxu1 }
 0x70e   : > { %v4716_v56 = vpop.f32.mrb[11].mxu1 }
 0x710   : > { %v6209_v57 = vpop.f32.mrb[12].mxu0 }
 0x711   : > { %v6211_v59 = vpop.f32.mrb[12].mxu1  ;;  %v4758_v60 = vpop.f32.mrb[13].mxu0  ;;  %v1929_v61 = vsel %vm1451_vm10, %v6209_v57, -inf }
 0x712   : > { %v4725_v62 = vpop.f32.mrb[13].mxu1  ;;  %1930 = vmax.xlane.f32.xlu0 %v1929_v61 }
 0x714   : > { %v6215_v63 = vpop.f32.mrb[14].mxu0 }
 0x715   : > { %v6217_v0 = vpop.f32.mrb[14].mxu1  ;;  %v4761_v1 = vpop.f32.mrb[15].mxu0  ;;  %v1932_v2 = vsel %vm1458_vm11, %v6215_v63, -inf }
 0x716   : > { %v4728_v3 = vpop.f32.mrb[15].mxu1  ;;  %1933 = vmax.xlane.f32.xlu1 %v1932_v2 }
 0x719   : > { %v6221_v55 = vpop.f32.mrb[16].mxu1 }
 0x71a   : > { %v4731_v4 = vpop.f32.mrb[17].mxu1 }
 0x71c   : > { %v6223_v5 = vpop.f32.mrb[16].mxu0 }
 0x71d   : > { %v4785_v6 = vpop.f32.mrb[17].mxu0  ;;  %v2162_v8 = vsel %vm1451_vm10, %v6223_v5, -inf }
 0x71e   : > { %2163 = vmax.xlane.f32.xlu0 %v2162_v8 }
 0x720   : > { %v6227_v11 = vpop.f32.mrb[18].mxu0 }
 0x721   : > { %v4788_v58 = vpop.f32.mrb[19].mxu0  ;;  %v2165_v13 = vsel %vm1451_vm10, %v6227_v11, -inf }
 0x722   : > { %2166 = vmax.xlane.f32.xlu1 %v2165_v13 }
 0x724   : > { %v6231_v15 = vpop.f32.mrb[20].mxu0 }
 0x725   : > { %v4791_v16 = vpop.f32.mrb[21].mxu0  ;;  %v2168_v17 = vsel %vm1458_vm11, %v6231_v15, -inf }
 0x726   : > { %2169 = vmax.xlane.f32.xlu0 %v2168_v17 }
 0x728   : > { %v6235_v18 = vpop.f32.mrb[22].mxu0 }
 0x729   : > { %v4815_v19 = vpop.f32.mrb[23].mxu0  ;;  %v2447_v20 = vsel %vm1451_vm10, %v6235_v18, -inf }
 0x72a   : > { %2448 = vmax.xlane.f32.xlu1 %v2447_v20 }
 0x72c   : > { %v6239_v21 = vpop.f32.mrb[24].mxu0 }
 0x72d   : > { %v4818_v22 = vpop.f32.mrb[25].mxu0  ;;  %v2450_v24 = vsel %vm1451_vm10, %v6239_v21, -inf }
 0x72e   : > { %2451 = vmax.xlane.f32.xlu0 %v2450_v24 }
 0x730   : > { %v6243_v25 = vpop.f32.mrb[26].mxu0 }
 0x731   : > { %v4821_v26 = vpop.f32.mrb[27].mxu0  ;;  %v2453_v27 = vsel %vm1458_vm11, %v6243_v25, -inf }
 0x732   : > { %2454 = vmax.xlane.f32.xlu1 %v2453_v27 }
 0x734   : > { %v6247_v28 = vpop.f32.mrb[28].mxu0 }
 0x735   : > { %v4845_v30 = vpop.f32.mrb[29].mxu0  ;;  %v2683_v7 = vsel %vm1451_vm10, %v6247_v28, -inf }
 0x736   : > { %2684 = vmax.xlane.f32.xlu0 %v2683_v7 }
 0x738   : > { %v6251_v9 = vpop.f32.mrb[30].mxu0 }
 0x739   : > { %v4848_v31 = vpop.f32.mrb[31].mxu0  ;;  %v2686_v10 = vsel %vm1451_vm10, %v6251_v9, -inf }
 0x73a   : > { %2687 = vmax.xlane.f32.xlu1 %v2686_v10 }
 0x73c   : > { %v6255_v33 = vpop.f32.mrb[32].mxu0 }
 0x73d   : > { %v4851_v34 = vpop.f32.mrb[33].mxu0  ;;  %v2689_v35 = vsel %vm1458_vm11, %v6255_v33, -inf }
 0x73e   : > { %2690 = vmax.xlane.f32.xlu0 %v2689_v35 }
 0x740   : > { %v6259_v37 = vpop.f32.mrb[34].mxu0 }
 0x741   : > { %v4875_v38 = vpop.f32.mrb[35].mxu0  ;;  %v2919_v40 = vsel %vm1451_vm10, %v6259_v37, -inf }
 0x742   : > { %2920 = vmax.xlane.f32.xlu1 %v2919_v40 }
 0x744   : > { %v6263_v41 = vpop.f32.mrb[36].mxu0 }
 0x745   : > { %v4878_v23 = vpop.f32.mrb[37].mxu0  ;;  %v2922_v42 = vsel %vm1451_vm10, %v6263_v41, -inf }
 0x746   : > { %2923 = vmax.xlane.f32.xlu0 %v2922_v42  ;;  %v1690_v42 = vsel %vm1451_vm10, %v6211_v59, -inf }
 0x748   : > { %v6267_v43 = vpop.f32.mrb[38].mxu0 }
 0x749   : > { %v4881_v45 = vpop.f32.mrb[39].mxu0  ;;  %v2925_v47 = vsel %vm1458_vm11, %v6267_v43, -inf }
 0x74a   : > { %2926 = vmax.xlane.f32.xlu1 %v2925_v47 }
 0x74c   : > { %v6271_v50 = vpop.f32.mrb[40].mxu0 }
 0x74d   : > { %v4905_v51 = vpop.f32.mrb[41].mxu0  ;;  %v3155_v56 = vsel %vm1451_vm10, %v6271_v50, -inf }
 0x74e   : > { %3156 = vmax.xlane.f32.xlu0 %v3155_v56  ;;  %v1696_v51 = vsel %vm1458_vm11, %v6221_v55, -inf }
 0x750   : > { %v6275_v60 = vpop.f32.mrb[42].mxu0 }
 0x751   : > { %v4908_v61 = vpop.f32.mrb[43].mxu0  ;;  %v3158_v62 = vsel %vm1451_vm10, %v6275_v60, -inf }
 0x752   : > { %3159 = vmax.xlane.f32.xlu1 %v3158_v62 }
 0x754   : > { %v6279_v1 = vpop.f32.mrb[44].mxu0 }
 0x755   : > { %v4911_v2 = vpop.f32.mrb[45].mxu0  ;;  %v3161_v3 = vsel %vm1458_vm11, %v6279_v1, -inf }
 0x756   : > { %3162 = vmax.xlane.f32.xlu0 %v3161_v3 }
 0x76d   : > { %v1928_v4 = vpop.xlane.xlu0 %1927 }
 0x76e   : > { %v1935_v6 = vsub.f32 %v6203_v48, %v1928_v4 }
 0x770   : > { %v1938_v8 = vmul.f32 1.442695, %v1935_v6 }
 0x772   : > { %5314 = vpow2.f32 %v1938_v8 }
 0x77c   : > { %v6284_v58 = vpop.eup %5314 }
 0x77d   : > { %v1944_v13 = vsel %vm1451_vm10, %v6284_v58, 0.0 }
 0x77e   : > { %1945 = vadd.xlane.f32.xlu0 %v1944_v13 }
 0x794   : > { %5258 = vrot.lane.b32.xlu0 %v5950_v12, %s5508_s14 }
 0x79f   : > { %v1931_v16 = vpop.xlane.xlu0 %1930 }
 0x7a0   : > { %v1936_v17 = vsub.f32 %v6209_v57, %v1931_v16 }
 0x7a2   : > { %v1940_v19 = vmul.f32 1.442695, %v1936_v17 }
 0x7a3   : > { %v1934_v20 = vpop.xlane.xlu1 %1933 }
 0x7a4   : > { %5316 = vpow2.f32 %v1940_v19  ;;  %v1937_v56 = vsub.f32 %v6215_v63, %v1934_v20 }
 0x7a6   : > { %v1942_v3 = vmul.f32 1.442695, %v1937_v56 }
 0x7ab   : > { %v2164_v10 = vpop.xlane.xlu0 %2163 }
 0x7ac   : > { %v2171_v4 = vsub.f32 %v6223_v5, %v2164_v10 }
 0x7ae   : > { %v6291_v22 = vpop.eup %5316  ;;  %v2174_v13 = vmul.f32 1.442695, %v2171_v4 }
 0x7af   : > { %v2167_v48 = vpop.xlane.xlu1 %2166  ;;  %v1947_v24 = vsel %vm1451_vm10, %v6291_v22, 0.0 }
 0x7b0   : > { %v2172_v26 = vsub.f32 %v6227_v11, %v2167_v48  ;;  %1948 = vadd.xlane.f32.xlu1 %v1947_v24 }
 0x7b2   : > { %v2176_v27 = vmul.f32 1.442695, %v2172_v26 }
 0x7b3   : > { %v2170_v35 = vpop.xlane.xlu0 %2169 }
 0x7b4   : > { %5318 = vpow2.f32 %v2176_v27  ;;  %v2173_v16 = vsub.f32 %v6231_v15, %v2170_v35 }
 0x7b6   : > { %v2178_v19 = vmul.f32 1.442695, %v2173_v16 }
 0x7b7   : > { %v2449_v30 = vpop.xlane.xlu1 %2448 }
 0x7b8   : > { %v2456_v7 = vsub.f32 %v6235_v18, %v2449_v30 }
 0x7ba   : > { %v2459_v31 = vmul.f32 1.442695, %v2456_v7 }
 0x7bb   : > { %v2452_v18 = vpop.xlane.xlu0 %2451 }
 0x7bc   : > { %5320 = vpow2.f32 %v2459_v31  ;;  %v2457_v20 = vsub.f32 %v6239_v21, %v2452_v18 }
 0x7bd   : > { %5322 = vpow2.f32 %v1942_v3 }
 0x7be   : > { %v6297_v57 = vpop.eup %5318  ;;  %5324 = vpow2.f32 %v2174_v13  ;;  %v2461_v15 = vmul.f32 1.442695, %v2457_v20 }
 0x7bf   : > { %v2183_v34 = vsel %vm1451_vm10, %v6297_v57, 0.0  ;;  %v2455_v40 = vpop.xlane.xlu1 %2454  ;;  %5326 = vpow2.f32 %v2178_v19 }
 0x7c0   : > { %2184 = vadd.xlane.f32.xlu0 %v2183_v34  ;;  %5328 = vpow2.f32 %v2461_v15  ;;  %v2458_v7 = vsub.f32 %v6243_v25, %v2455_v40  ;;  %v1693_v34 = vsel %vm1451_vm10, %v6217_v0, -inf }
 0x7c1   : > { %1727 = vrot.lane.b32.xlu1 %v5953_v14, %s5508_s14 }
 0x7c2   : > { %v2463_v10 = vmul.f32 1.442695, %v2458_v7 }
 0x7c3   : > { %v2685_v23 = vpop.xlane.xlu0 %2684 }
 0x7c4   : > { %5330 = vpow2.f32 %v2463_v10  ;;  %v2692_v4 = vsub.f32 %v6247_v28, %v2685_v23 }
 0x7c5   : > { %5263 = vrot.lane.b32.xlu1 %v5950_v12, %s5509_s2 }
 0x7c6   : > { %v6305_v11 = vpop.eup %5320  ;;  %v2695_v13 = vmul.f32 1.442695, %v2692_v4 }
 0x7c7   : > { %v2465_v38 = vsel %vm1451_vm10, %v6305_v11, 0.0  ;;  %v2688_v45 = vpop.xlane.xlu1 %2687  ;;  %v6335_v24 = vpop.eup %5322 }
 0x7c8   : > { %2466 = vadd.xlane.f32.xlu0 %v2465_v38  ;;  %v1950_v26 = vsel %vm1458_vm11, %v6335_v24, 0.0  ;;  %v6341_v27 = vpop.eup %5324  ;;  %v2693_v16 = vsub.f32 %v6251_v9, %v2688_v45  ;;  %5332 = vpow2.f32 %v2695_v13 }
 0x7c9   : > { %v2180_v21 = vsel %vm1451_vm10, %v6341_v27, 0.0  ;;  %v6345_v30 = vpop.eup %5326 }
 0x7ca   : > { %v2186_v31 = vsel %vm1458_vm11, %v6345_v30, 0.0  ;;  %v6352_v35 = vpop.eup %5328  ;;  %v2697_v19 = vmul.f32 1.442695, %v2693_v16 }
 0x7cb   : > { %v2691_v47 = vpop.xlane.xlu0 %2690  ;;  %v2468_v18 = vsel %vm1451_vm10, %v6352_v35, 0.0 }
 0x7cc   : > { %1691 = vmax.xlane.f32.xlu0 %v1690_v42  ;;  %5334 = vpow2.f32 %v2697_v19 }
 0x7ce   : > { %v6356_v38 = vpop.eup %5330 }
 0x7cf   : > { %v6314_v61 = vpop.xlane.xlu1 %2920  ;;  %v2471_v25 = vsel %vm1458_vm11, %v6356_v38, 0.0 }
 0x7d0   : > { %1697 = vmax.xlane.f32.xlu0 %v1696_v51 }
 0x7d2   : > { %v6370_v15 = vpop.eup %5332 }
 0x7d3   : > { %v6316_v62 = vpop.xlane.xlu0 %2923 }
 0x7d4   : > { %v2929_v2 = vsub.f32 %v6263_v41, %v6316_v62 }
 0x7d7   : > { %v6321_v6 = vpop.xlane.xlu1 %2926 }
 0x7d8   : > { %v2930_v8 = vsub.f32 %v6267_v43, %v6321_v6 }
 0x7db   : > { %v6326_v63 = vpop.xlane.xlu0 %3156 }
 0x7dc   : > { %v3164_v17 = vsub.f32 %v6271_v50, %v6326_v63  ;;  %v2935_v63 = vmul.f32 1.442695, %v2930_v8 }
 0x7df   : > { %v3160_v9 = vpop.xlane.xlu1 %3159 }
 0x7e3   : > { %v6331_v5 = vpop.xlane.xlu0 %3162 }
 0x7e4   : > { %v3166_v48 = vsub.f32 %v6279_v1, %v6331_v5 }
 0x7e6   : > { %1963 = vrot.lane.b32.xlu0 %v5953_v14, %s5509_s2 }
 0x7e9   : > { %1951 = vadd.xlane.f32.xlu1 %v1950_v26  ;;  %v2701_v26 = vsel %vm1451_vm10, %v6370_v15, 0.0 }
 0x7ed   : > { %2181 = vadd.xlane.f32.xlu1 %v2180_v21  ;;  %v6374_v21 = vpop.eup %5334 }
 0x7f1   : > { %2187 = vadd.xlane.f32.xlu1 %v2186_v31 }
 0x7f5   : > { %1694 = vmax.xlane.f32.xlu1 %v1693_v34 }
 0x7f9   : > { %2469 = vadd.xlane.f32.xlu1 %v2468_v18 }
 0x805   : > { %2472 = vadd.xlane.f32.xlu0 %v2471_v25 }
 0x80a   : > { %5268 = vrot.lane.b32.xlu1 %v5950_v12, %s5510_s24  ;;  %v2694_v12 = vsub.f32 %v6255_v33, %v2691_v47  ;;  %v2928_v47 = vsub.f32 %v6259_v37, %v6314_v61 }
 0x80b   : > { %v6362_v40 = vpop.xlane.xlu0 %1945 }
 0x80c   : > { %v2699_v20 = vmul.f32 1.442695, %v2694_v12  ;;  %v2931_v31 = vmul.f32 1.442695, %v2928_v47  ;;  %v3167_v47 = vmul.f32 1.442695, %v3164_v17 }
 0x80e   : > { %5336 = vpow2.f32 %v2699_v20 }
 0x80f   : > { %v5259_v42 = vpop.permute.xlu0 %5258  ;;  %5338 = vpow2.f32 %v2931_v31  ;;  %v3165_v31 = vsub.f32 %v6275_v60, %v3160_v9 }
 0x810   : > { %v5261_v51 = vunpack.i.h.bf16 %v5259_v42  ;;  %v5260_v56 = vunpack.i.l.bf16 %v5259_v42  ;;  %v2933_v42 = vmul.f32 1.442695, %v2929_v2 }
 0x812   : > { %v5085_v3 = vpack.c.bf16 %v5261_v51, %v5260_v56 }
 0x814   : > { %5086 = vmatpush3.bf16.msra.mxu1 %v5085_v3 }
 0x815   : > { %4736 = vmatprep.subr.mxu1 %v5499_v39 }
 0x818   : > { %v6378_v28 = vpop.eup %5336 }
 0x819   : > { %v2707_v33 = vsel %vm1458_vm11, %v6378_v28, 0.0  ;;  %v6399_v61 = vpop.eup %5338 }
 0x81a   : > { %v2937_v3 = vsel %vm1451_vm10, %v6399_v61, 0.0 }
 0x81b   : > { %2199 = vrot.lane.b32.xlu0 %v5953_v14, %s5510_s24  ;;  %v2704_v14 = vsel %vm1451_vm10, %v6374_v21, 0.0 }
 0x82e   : > { %2702 = vadd.xlane.f32.xlu1 %v2701_v26 }
 0x832   : > { %2705 = vadd.xlane.f32.xlu1 %v2704_v14 }
 0x83a   : > { %2708 = vadd.xlane.f32.xlu0 %v2707_v33 }
 0x83d   : > { %v6382_v23 = vpop.xlane.xlu1 %1948 }
 0x841   : > { %v1728_v45 = vpop.permute.xlu1 %1727 }
 0x842   : > { %4737 = vmatpush3.msk.msra.mxu1 %vm1503_vm13, %v1728_v45 }
 0x843   : > { %5273 = vrot.lane.b32.xlu1 %v6041_v32, %s5501_s16  ;;  %5091 = vmatprep.subr.bf16.mxu1 %v5497_v36 }
 0x84d   : > { %v6390_v7 = vpop.xlane.xlu0 %2184 }
 0x855   : > { %v6392_v10 = vpop.xlane.xlu0 %2466 }
 0x859   : > { %v1692_v34 = vpop.xlane.xlu0 %1691 }
 0x85a   : > { %v1699_v18 = vsub.f32 %v6211_v59, %v1692_v34  ;;  %v3169_v34 = vmul.f32 1.442695, %v3165_v31 }
 0x85c   : > { %v1702_v25 = vmul.f32 1.442695, %v1699_v18 }
 0x85d   : > { %v1698_v51 = vpop.xlane.xlu0 %1697 }
 0x85e   : > { %5340 = vpow2.f32 %v1702_v25  ;;  %v1701_v56 = vsub.f32 %v6221_v55, %v1698_v51  ;;  %v5264_v55 = vpop.permute.xlu1 %5263 }
 0x85f   : > { %5342 = vpow2.f32 %v2933_v42 }
 0x860   : > { %v1706_v37 = vmul.f32 1.442695, %v1701_v56 }
 0x862   : > { %5344 = vpow2.f32 %v1706_v37  ;;  %v5266_v37 = vunpack.i.h.bf16 %v5264_v55 }
 0x867   : > { %2938 = vadd.xlane.f32.xlu1 %v2937_v3  ;;  %v5265_v3 = vunpack.i.l.bf16 %v5264_v55 }
 0x868   : > { %v5341_v4 = vpop.eup %5340 }
 0x869   : > { %v1708_v59 = vsel %vm1451_vm10, %v5341_v4, 0.0  ;;  %v6404_v13 = vpop.eup %5342 }
 0x86a   : > { %v2940_v41 = vsel %vm1451_vm10, %v6404_v13, 0.0 }
 0x86b   : > { %1709 = vadd.xlane.f32.xlu1 %v1708_v59 }
 0x86c   : > { %v6408_v62 = vpop.eup %5344 }
 0x86d   : > { %v1714_v2 = vsel %vm1458_vm11, %v6408_v62, 0.0 }
 0x86f   : > { %2941 = vadd.xlane.f32.xlu1 %v2940_v41  ;;  %v5092_v41 = vpack.c.bf16 %v5266_v37, %v5265_v3 }
 0x873   : > { %1715 = vadd.xlane.f32.xlu1 %v1714_v2 }
 0x876   : > { %v6412_v16 = vpop.xlane.xlu1 %1951 }
 0x87a   : > { %v6414_v19 = vpop.xlane.xlu1 %2181 }
 0x87e   : > { %v6416_v12 = vpop.xlane.xlu1 %2187 }
 0x882   : > { %v1695_v20 = vpop.xlane.xlu1 %1694 }
 0x883   : > { %v1700_v26 = vsub.f32 %v6217_v0, %v1695_v20  ;;  %v3171_v0 = vmul.f32 1.442695, %v3166_v48 }
 0x884   : > { %5278 = vrot.lane.b32.xlu1 %v6041_v32, %s5508_s14 }
 0x885   : > { %v1704_v14 = vmul.f32 1.442695, %v1700_v26 }
 0x886   : > { %v6452_v48 = vpop.xlane.xlu1 %2469 }
 0x887   : > { %5346 = vpow2.f32 %v1704_v14 }
 0x888   : > { %5348 = vpow2.f32 %v3167_v47 }
 0x889   : > { %5350 = vpow2.f32 %v3169_v34 }
 0x88a   : > { %5352 = vpow2.f32 %v3171_v0  ;;  %v5269_v9 = vpop.permute.xlu1 %5268 }
 0x88b   : > { %5354 = vpow2.f32 %v2935_v63 }
 0x891   : > { %v5347_v33 = vpop.eup %5346 }
 0x892   : > { %v1711_v45 = vsel %vm1451_vm10, %v5347_v33, 0.0  ;;  %v6429_v18 = vpop.eup %5348 }
 0x893   : > { %1712 = vadd.xlane.f32.xlu0 %v1711_v45  ;;  %v3173_v25 = vsel %vm1451_vm10, %v6429_v18, 0.0  ;;  %v6433_v42 = vpop.eup %5350 }
 0x894   : > { %v3176_v50 = vsel %vm1451_vm10, %v6433_v42, 0.0  ;;  %v6439_v60 = vpop.eup %5352 }
 0x895   : > { %v3179_v1 = vsel %vm1458_vm11, %v6439_v60, 0.0  ;;  %v6448_v17 = vpop.eup %5354 }
 0x896   : > { %v2943_v5 = vsel %vm1458_vm11, %v6448_v17, 0.0 }
 0x8a8   : > { %3174 = vadd.xlane.f32.xlu1 %v3173_v25  ;;  %v5271_v25 = vunpack.i.h.bf16 %v5269_v9 }
 0x8a9   : > { %2484 = vrot.lane.b32.xlu0 %v6032_v29, %s5501_s16 }
 0x8ac   : > { %3177 = vadd.xlane.f32.xlu1 %v3176_v50  ;;  %v5270_v50 = vunpack.i.l.bf16 %v5269_v9 }
 0x8b0   : > { %3180 = vadd.xlane.f32.xlu1 %v3179_v1 }
 0x8bb   : > { %v6458_v43 = vpop.xlane.xlu1 %2702 }
 0x8bf   : > { %v6462_v6 = vpop.xlane.xlu1 %2705 }
 0x8c1   : > { %5288 = vrot.lane.b32.xlu1 %v6041_v32, %s5510_s24 }
 0x8c3   : > { %v6466_v8 = vpop.permute.xlu1 %5273 }
 0x8c4   : > { %v5275_v1 = vunpack.i.l.bf16 %v6466_v8 }
 0x8c8   : > { %2944 = vadd.xlane.f32.xlu0 %v2943_v5 }
 0x8de   : > { %2720 = vrot.lane.b32.xlu0 %v6032_v29, %s5508_s14 }
 0x8e2   : > { %5283 = vrot.lane.b32.xlu0 %v6041_v32, %s5509_s2 }
 0x8e6   : > { %2956 = vrot.lane.b32.xlu0 %v6032_v29, %s5509_s2 }
 0x8ea   : > { %3192 = vrot.lane.b32.xlu0 %v6032_v29, %s5510_s24  ;;  %v1964_v29 = vpop.permute.xlu0 %1963 }
 0x8ee   : > { %v2473_v2 = vpop.xlane.xlu0 %2472 }
 0x8f2   : > { %v2200_v20 = vpop.permute.xlu0 %2199 }
 0x8f4   : > { %v6468_v51 = vpop.xlane.xlu1 %2938 }
 0x8f6   : > { %v6478_v55 = vpop.xlane.xlu0 %2708 }
 0x8f8   : > { %v1710_v56 = vpop.xlane.xlu1 %1709 }
 0x8f9   : > { %5356 = vrcp.f32 %v1710_v56 }
 0x8fc   : > { %v6476_v26 = vpop.xlane.xlu1 %2941 }
 0x903   : > { %v5357_v59 = vpop.eup %5356 }
 0x904   : > { %v1720_v32 = vmul.f32 %v5357_v59, %v5341_v4  ;;  %v1716_v4 = vpop.xlane.xlu1 %1715 }
 0x906   : > { %4739 = vmatmul.mubr.msk.f32.vlgmr.msra.gmra.mrb[18].mxu1 %vm1451_vm10, %v1720_v32 }
 0x907   : > { %5093 = vmatpush3.bf16.msra.mxu1 %v5092_v41  ;;  %4741 = vmatprep.mubr.msk.f32.mxu1 %vm5498_vm6, %v5499_v39 }
 0x908   : > { %4766 = vmatprep.subr.mxu1 %v5499_v39  ;;  %v5279_v5 = vpop.permute.xlu1 %5278 }
 0x909   : > { %v5280_v56 = vunpack.i.l.bf16 %v5279_v5 }
 0x90b   : > { %4767 = vmatpush3.msk.msra.mxu1 %vm1503_vm13, %v1964_v29 }
 0x90c   : > { %5098 = vmatprep.subr.bf16.mxu1 %v5497_v36 }
 0x920   : > { %v1713_v14 = vpop.xlane.xlu0 %1712 }
 0x921   : > { %5358 = vrcp.f32 %v1713_v14 }
 0x922   : > { %5360 = vrcp.f32 %v1716_v4 }
 0x923   : > { %5362 = vrcp.f32 %v6362_v40 }
 0x924   : > { %5364 = vrcp.f32 %v6382_v23  ;;  %v2485_v9 = vpop.permute.xlu0 %2484 }
 0x925   : > { %5366 = vrcp.f32 %v6412_v16 }
 0x926   : > { %5368 = vrcp.f32 %v6414_v19  ;;  %v5276_v19 = vunpack.i.h.bf16 %v6466_v8  ;;  %v5281_v8 = vunpack.i.h.bf16 %v5279_v5 }
 0x927   : > { %5370 = vrcp.f32 %v6390_v7 }
 0x928   : > { %5372 = vrcp.f32 %v6416_v12  ;;  %v5106_v63 = vpack.c.bf16 %v5276_v19, %v5275_v1  ;;  %v5113_v3 = vpack.c.bf16 %v5281_v8, %v5280_v56  ;;  %v3342_v19 = vld [vmem:[%s6987_s23] sm:$0xff]  ;;  %v3343_v1 = vld [vmem:[%s6987_s23 + $0x8] sm:$0xff] }
 0x929   : > { %5374 = vrcp.f32 %v6392_v10 }
 0x92a   : > { %5376 = vrcp.f32 %v6452_v48 }
 0x92b   : > { %v5359_v45 = vpop.eup %5358  ;;  %5378 = vrcp.f32 %v2473_v2 }
 0x92c   : > { %v1721_v47 = vmul.f32 %v5359_v45, %v5347_v33  ;;  %v5361_v31 = vpop.eup %5360  ;;  %v5099_v33 = vpack.c.bf16 %v5271_v25, %v5270_v50  ;;  %5380 = vrcp.f32 %v6458_v43 }
 0x92d   : > { %v1722_v34 = vmul.f32 %v5361_v31, %v6408_v62  ;;  %v5363_v0 = vpop.eup %5362  ;;  %5382 = vrcp.f32 %v6462_v6 }
 0x92e   : > { %4742 = vmatmul.mubr.msk.f32.gmra.mrb[20].mxu1 %vm1451_vm10, %v1721_v47  ;;  %v1956_v40 = vmul.f32 %v5363_v0, %v6284_v58  ;;  %v5365_v23 = vpop.eup %5364  ;;  %5384 = vrcp.f32 %v6478_v55 }
 0x92f   : > { %4744 = vmatprep.mubr.msk.f32.mxu1 %vm5498_vm6, %v5499_v39  ;;  %v1957_v62 = vmul.f32 %v5365_v23, %v6291_v22  ;;  %v5367_v16 = vpop.eup %5366  ;;  %5386 = vrcp.f32 %v6468_v51 }
 0x930   : > { %v1958_v58 = vmul.f32 %v5367_v16, %v6335_v24  ;;  %v5369_v7 = vpop.eup %5368  ;;  %5388 = vrcp.f32 %v6476_v26 }
 0x931   : > { %v2192_v22 = vmul.f32 %v5369_v7, %v6341_v27  ;;  %v5371_v12 = vpop.eup %5370 }
 0x932   : > { %4745 = vmatmul.mubr.msk.f32.gmra.mrb[22].mxu1 %vm1451_vm10, %v1722_v34  ;;  %v2193_v24 = vmul.f32 %v5371_v12, %v6297_v57  ;;  %v5373_v10 = vpop.eup %5372  ;;  %v5130_v12 = vpack.c.bf16 %v3343_v1, %v3342_v19 }
 0x933   : > { %4768 = vmatprep.mubr.msk.f32.mxu1 %vm5498_vm6, %v5499_v39  ;;  %v2194_v27 = vmul.f32 %v5373_v10, %v6345_v30  ;;  %v5375_v48 = vpop.eup %5374 }
 0x934   : > { %v2477_v57 = vmul.f32 %v5375_v48, %v6305_v11  ;;  %v5377_v37 = vpop.eup %5376  ;;  %5131 = vmatpush3.bf16.msra.mxu0 %v5130_v12 }
 0x935   : > { %v3175_v59 = vpop.xlane.xlu1 %3174  ;;  %v2478_v30 = vmul.f32 %v5377_v37, %v6352_v35  ;;  %v5379_v32 = vpop.eup %5378  ;;  %5132 = vmatprep.subr.bf16.mxu0 %v5497_v36 }
 0x936   : > { %4769 = vmatmul.mubr.msk.f32.vlgmr.msra.gmra.mrb[24].mxu1 %vm1451_vm10, %v1956_v40  ;;  %v2479_v43 = vmul.f32 %v5379_v32, %v6356_v38  ;;  %v5381_v29 = vpop.eup %5380 }
 0x937   : > { %5100 = vmatpush3.bf16.msra.mxu1 %v5099_v33  ;;  %4771 = vmatprep.mubr.msk.f32.mxu1 %vm5498_vm6, %v5499_v39  ;;  %v2713_v35 = vmul.f32 %v5381_v29, %v6370_v15 }
 0x938   : > { %4796 = vmatprep.subr.mxu1 %v5499_v39 }
 0x939   : > { %v3178_v11 = vpop.xlane.xlu1 %3177 }
 0x93a   : > { %4772 = vmatmul.mubr.msk.f32.gmra.mrb[26].mxu1 %vm1451_vm10, %v1957_v62 }
 0x93b   : > { %4797 = vmatpush3.msk.msra.mxu1 %vm1503_vm13, %v2200_v20  ;;  %4774 = vmatprep.mubr.msk.f32.mxu1 %vm5498_vm6, %v5499_v39  ;;  %v5383_v20 = vpop.eup %5382 }
 0x93c   : > { %5105 = vmatprep.subr.bf16.mxu1 %v5497_v36  ;;  %v2714_v55 = vmul.f32 %v5383_v20, %v6374_v21  ;;  %v5385_v51 = vpop.eup %5384 }
 0x93d   : > { %v3181_v6 = vpop.xlane.xlu1 %3180  ;;  %v2715_v47 = vmul.f32 %v5385_v51, %v6378_v28  ;;  %v5387_v26 = vpop.eup %5386 }
 0x93e   : > { %4775 = vmatmul.mubr.msk.f32.gmra.mrb[28].mxu1 %vm1451_vm10, %v1958_v58  ;;  %v2949_v21 = vmul.f32 %v5387_v26, %v6399_v61  ;;  %v5389_v25 = vpop.eup %5388 }
 0x93f   : > { %4798 = vmatprep.mubr.msk.f32.mxu1 %vm5498_vm6, %v5499_v39  ;;  %v2950_v28 = vmul.f32 %v5389_v25, %v6404_v13 }
 0x941   : > { %v5289_v14 = vpop.permute.xlu1 %5288 }
 0x942   : > { %4799 = vmatmul.mubr.msk.f32.vlgmr.msra.gmra.mrb[30].mxu1 %vm1451_vm10, %v2192_v22  ;;  %v5291_v31 = vunpack.i.h.bf16 %v5289_v14  ;;  %v5290_v34 = vunpack.i.l.bf16 %v5289_v14 }
 0x943   : > { %5107 = vmatpush3.bf16.msra.mxu1 %v5106_v63  ;;  %4801 = vmatprep.mubr.msk.f32.mxu1 %vm5498_vm6, %v5499_v39  ;;  %v3344_v63 = vld [vmem:[%s6987_s23 + $0x10] sm:$0xff] }
 0x944   : > { %4826 = vmatprep.subr.mxu1 %v5499_v39  ;;  %v5127_v50 = vpack.c.bf16 %v5291_v31, %v5290_v34 }
 0x946   : > { %4802 = vmatmul.mubr.msk.f32.gmra.mrb[32].mxu1 %vm1451_vm10, %v2193_v24  ;;  %v3345_v24 = vld [vmem:[%s6987_s23 + $0x18] sm:$0xff] }
 0x947   : > { %4827 = vmatpush3.msk.msra.mxu1 %vm1503_vm13, %v2485_v9  ;;  %4804 = vmatprep.mubr.msk.f32.mxu1 %vm5498_vm6, %v5499_v39  ;;  %v5133_v5 = vpack.c.bf16 %v3345_v24, %v3344_v63 }
 0x948   : > { %5112 = vmatprep.subr.bf16.mxu1 %v5497_v36 }
 0x949   : > { %5134 = vmatpush3.bf16.msra.mxu0 %v5133_v5 }
 0x94a   : > { %4805 = vmatmul.mubr.msk.f32.gmra.mrb[34].mxu1 %vm1451_vm10, %v2194_v27  ;;  %5141 = vmatprep.subr.bf16.mxu0 %v5497_v36 }
 0x94b   : > { %4828 = vmatprep.mubr.msk.f32.mxu1 %vm5498_vm6, %v5499_v39 }
 0x94e   : > { %4829 = vmatmul.mubr.msk.f32.vlgmr.msra.gmra.mrb[36].mxu1 %vm1451_vm10, %v2477_v57 }
 0x94f   : > { %5114 = vmatpush3.bf16.msra.mxu1 %v5113_v3  ;;  %4831 = vmatprep.mubr.msk.f32.mxu1 %vm5498_vm6, %v5499_v39 }
 0x950   : > { %4856 = vmatprep.subr.mxu1 %v5499_v39 }
 0x952   : > { %4832 = vmatmul.mubr.msk.f32.gmra.mrb[38].mxu1 %vm1451_vm10, %v2478_v30 }
 0x953   : > { %4834 = vmatprep.mubr.msk.f32.mxu1 %vm5498_vm6, %v5499_v39 }
 0x955   : > { %v2945_v41 = vpop.xlane.xlu0 %2944 }
 0x956   : > { %4835 = vmatmul.mubr.msk.f32.gmra.mrb[40].mxu1 %vm1451_vm10, %v2479_v43  ;;  %5390 = vrcp.f32 %v2945_v41 }
 0x957   : > { %4858 = vmatprep.mubr.msk.f32.mxu1 %vm5498_vm6, %v5499_v39  ;;  %5392 = vrcp.f32 %v3175_v59 }
 0x958   : > { %5394 = vrcp.f32 %v3178_v11 }
 0x959   : > { %v2721_v2 = vpop.permute.xlu0 %2720  ;;  %5396 = vrcp.f32 %v3181_v6 }
 0x95a   : > { %4857 = vmatpush3.msk.msra.mxu1 %vm1503_vm13, %v2721_v2 }
 0x95b   : > { %4859 = vmatmul.mubr.msk.f32.vlgmr.msra.gmra.mrb[42].mxu1 %vm1451_vm10, %v2713_v35  ;;  %5119 = vmatprep.subr.bf16.mxu1 %v5497_v36 }
 0x95c   : > { %4861 = vmatprep.mubr.msk.f32.mxu1 %vm5498_vm6, %v5499_v39 }
 0x95d   : > { %v5284_v38 = vpop.permute.xlu0 %5283 }
 0x95e   : > { %v5286_v4 = vunpack.i.h.bf16 %v5284_v38  ;;  %v5285_v15 = vunpack.i.l.bf16 %v5284_v38 }
 0x95f   : > { %4862 = vmatmul.mubr.msk.f32.gmra.mrb[44].mxu1 %vm1451_vm10, %v2714_v55 }
 0x960   : > { %v5120_v45 = vpack.c.bf16 %v5286_v4, %v5285_v15  ;;  %4864 = vmatprep.mubr.msk.f32.mxu1 %vm5498_vm6, %v5499_v39  ;;  %v5391_v40 = vpop.eup %5390 }
 0x961   : > { %v2957_v0 = vpop.permute.xlu0 %2956  ;;  %v2951_v23 = vmul.f32 %v5391_v40, %v6448_v17  ;;  %v5393_v33 = vpop.eup %5392 }
 0x962   : > { %5121 = vmatpush3.bf16.msra.mxu1 %v5120_v45  ;;  %v3185_v13 = vmul.f32 %v5393_v33, %v6429_v18  ;;  %v5395_v62 = vpop.eup %5394 }
 0x963   : > { %4865 = vmatmul.mubr.msk.f32.gmra.mrb[46].mxu1 %vm1451_vm10, %v2715_v47  ;;  %4886 = vmatprep.subr.mxu1 %v5499_v39  ;;  %v3186_v17 = vmul.f32 %v5395_v62, %v6433_v42  ;;  %v5397_v16 = vpop.eup %5396 }
 0x964   : > { %4888 = vmatprep.mubr.msk.f32.mxu1 %vm5498_vm6, %v5499_v39  ;;  %v3187_v58 = vmul.f32 %v5397_v16, %v6439_v60 }
 0x965   : > { %v3193_v61 = vpop.permute.xlu0 %3192 }
 0x966   : > { %4887 = vmatpush3.msk.msra.mxu1 %vm1503_vm13, %v2957_v0 }
 0x967   : > { %4889 = vmatmul.mubr.msk.f32.vlgmr.msra.gmra.mrb[48].mxu1 %vm1451_vm10, %v2949_v21  ;;  %5126 = vmatprep.subr.bf16.mxu1 %v5497_v36 }
 0x968   : > { %5128 = vmatpush3.bf16.msra.mxu1 %v5127_v50  ;;  %4891 = vmatprep.mubr.msk.f32.mxu1 %vm5498_vm6, %v5499_v39 }
 0x969   : > { %4916 = vmatprep.subr.mxu1 %v5499_v39 }
 0x96b   : > { %4892 = vmatmul.mubr.msk.f32.gmra.mrb[50].mxu1 %vm1451_vm10, %v2950_v28 }
 0x96c   : > { %4917 = vmatpush3.msk.msra.mxu1 %vm1503_vm13, %v3193_v61  ;;  %4894 = vmatprep.mubr.msk.f32.mxu1 %vm5498_vm6, %v5499_v39 }
 0x96d   : > { %5135 = vmatprep.subr.bf16.mxu1 %v5497_v36 }
 0x96f   : > { %4895 = vmatmul.mubr.msk.f32.gmra.mrb[52].mxu1 %vm1451_vm10, %v2951_v23 }
 0x970   : > { %4918 = vmatprep.mubr.msk.f32.mxu1 %vm5498_vm6, %v5499_v39 }
 0x973   : > { %4919 = vmatmul.mubr.msk.f32.vlgmr.msra.gmra.mrb[54].mxu1 %vm1451_vm10, %v3185_v13 }
 0x974   : > { %4921 = vmatprep.mubr.msk.f32.mxu1 %vm5498_vm6, %v5499_v39 }
 0x977   : > { %4922 = vmatmul.mubr.msk.f32.gmra.mrb[56].mxu1 %vm1451_vm10, %v3186_v17 }
 0x978   : > { %4924 = vmatprep.mubr.msk.f32.mxu1 %vm5498_vm6, %v5499_v39 }
 0x97b   : > { %4925 = vmatmul.mubr.msk.f32.gmra.mrb[58].mxu1 %vm1451_vm10, %v3187_v58 }
 0x97c   : > { %4958 = vmatprep.mubr.msk.f32.mxu1 %vm5498_vm6, %v5499_v39 }
 0x9d9   : > { %v1808_v18 = vpop.f32.mrb[18].mxu1 }
 0x9da   : > { %2297 = vrot.lane.b32.xlu0 %v1808_v18, %s5511_s26  ;;  %v4740_v42 = vpop.f32.mrb[19].mxu1 }
 0xa01   : > { %v1813_v7 = vpop.f32.mrb[20].mxu1 }
 0xa02   : > { %2299 = vrot.lane.b32.xlu1 %v1813_v7, %s5511_s26  ;;  %v4743_v22 = vpop.f32.mrb[21].mxu1 }
 0xa05   : > { %v1818_v60 = vpop.f32.mrb[22].mxu1 }
 0xa06   : > { %2301 = vrot.lane.b32.xlu0 %v1818_v60, %s5511_s26  ;;  %v4746_v10 = vpop.f32.mrb[23].mxu1 }
 0xa09   : > { %v2044_v9 = vpop.f32.mrb[24].mxu1 }
 0xa0a   : > { %2309 = vrot.lane.b32.xlu0 %v2044_v9, %s5512_s7  ;;  %v4770_v27 = vpop.f32.mrb[25].mxu1 }
 0xa0d   : > { %v2049_v48 = vpop.f32.mrb[26].mxu1 }
 0xa0e   : > { %2311 = vrot.lane.b32.xlu0 %v2049_v48, %s5512_s7  ;;  %v4773_v8 = vpop.f32.mrb[27].mxu1 }
 0xa11   : > { %v2054_v56 = vpop.f32.mrb[28].mxu1 }
 0xa12   : > { %2313 = vrot.lane.b32.xlu0 %v2054_v56, %s5512_s7  ;;  %v4776_v57 = vpop.f32.mrb[29].mxu1 }
 0xa15   : > { %v2280_v37 = vpop.f32.mrb[30].mxu1 }
 0xa16   : > { %2321 = vrot.lane.b32.xlu0 %v2280_v37, %s5513_s15  ;;  %v4800_v3 = vpop.f32.mrb[31].mxu1 }
 0xa19   : > { %v2285_v59 = vpop.f32.mrb[32].mxu1 }
 0xa1a   : > { %2323 = vrot.lane.b32.xlu0 %v2285_v59, %s5513_s15  ;;  %v4803_v30 = vpop.f32.mrb[33].mxu1 }
 0xa1d   : > { %v2290_v32 = vpop.f32.mrb[34].mxu1 }
 0xa1e   : > { %2325 = vrot.lane.b32.xlu1 %v2290_v32, %s5513_s15  ;;  %v4806_v11 = vpop.f32.mrb[35].mxu1 }
 0xa21   : > { %v2565_v43 = vpop.f32.mrb[36].mxu1 }
 0xa22   : > { %v4830_v41 = vpop.f32.mrb[37].mxu1 }
 0xa25   : > { %v6604_v29 = vpop.f32.mrb[38].mxu1 }
 0xa26   : > { %v4833_v35 = vpop.f32.mrb[39].mxu1 }
 0xa29   : > { %v6606_v6 = vpop.f32.mrb[40].mxu1 }
 0xa2a   : > { %v4836_v2 = vpop.f32.mrb[41].mxu1 }
 0xa2e   : > { %v2801_v20 = vpop.f32.mrb[42].mxu1 }
 0xa2f   : > { %3290 = vrot.lane.b32.xlu1 %v2801_v20, %s5511_s26  ;;  %v4860_v38 = vpop.f32.mrb[43].mxu1 }
 0xa32   : > { %v2806_v55 = vpop.f32.mrb[44].mxu1 }
 0xa33   : > { %3292 = vrot.lane.b32.xlu0 %v2806_v55, %s5511_s26  ;;  %v4863_v51 = vpop.f32.mrb[45].mxu1 }
 0xa36   : > { %v2811_v4 = vpop.f32.mrb[46].mxu1 }
 0xa37   : > { %v4866_v15 = vpop.f32.mrb[47].mxu1 }
 0xa38   : > { %v5428_v15 = vld [vmem:[#allocation2] sm:$0xff] }
 0xa3a   : > { %v3037_v14 = vpop.f32.mrb[48].mxu1 }
 0xa3b   : > { %3302 = vrot.lane.b32.xlu1 %v3037_v14, %s5512_s7  ;;  %v4890_v45 = vpop.f32.mrb[49].mxu1 }
 0xa3e   : > { %v3042_v47 = vpop.f32.mrb[50].mxu1 }
 0xa3f   : > { %3304 = vrot.lane.b32.xlu1 %v3042_v47, %s5512_s7  ;;  %v4893_v26 = vpop.f32.mrb[51].mxu1 }
 0xa42   : > { %v3047_v31 = vpop.f32.mrb[52].mxu1 }
 0xa43   : > { %v4896_v34 = vpop.f32.mrb[53].mxu1 }
 0xa44   : > { %v5429_v34 = vld [vmem:[#allocation2 + $0x8] sm:$0xff] }
 0xa46   : > { %v3273_v21 = vpop.f32.mrb[54].mxu1 }
 0xa47   : > { %3314 = vrot.lane.b32.xlu1 %v3273_v21, %s5513_s15  ;;  %v4920_v0 = vpop.f32.mrb[55].mxu1 }
 0xa4a   : > { %v3278_v25 = vpop.f32.mrb[56].mxu1 }
 0xa4b   : > { %3294 = vrot.lane.b32.xlu1 %v2811_v4, %s5511_s26  ;;  %3316 = vrot.lane.b32.xlu0 %v3278_v25, %s5513_s15  ;;  %v4923_v50 = vpop.f32.mrb[57].mxu1 }
 0xa4c   : > { %v2298_v61 = vpop.permute.xlu0 %2297 }
 0xa4d   : > { %v2330_v16 = vsel %vm1358_vm8, %v6199_v44, %v2298_v61 }
 0xa4e   : > { %v3283_v28 = vpop.f32.mrb[58].mxu1 }
 0xa4f   : > { %3306 = vrot.lane.b32.xlu0 %v3047_v31, %s5512_s7  ;;  %3318 = vrot.lane.b32.xlu1 %v3283_v28, %s5513_s15  ;;  %v4926_v40 = vpop.f32.mrb[59].mxu1 }
 0xa50   : > { %v5430_v40 = vld [vmem:[#allocation2 + $0x10] sm:$0xff] }
 0xa74   : > { %v2300_v58 = vpop.permute.xlu1 %2299 }
 0xa75   : > { %v2331_v19 = vsel %vm1358_vm8, %v6201_v46, %v2300_v58 }
 0xa78   : > { %v2302_v23 = vpop.permute.xlu0 %2301 }
 0xa79   : > { %v2332_v33 = vsel %vm1358_vm8, %v6207_v53, %v2302_v23 }
 0xa7c   : > { %v2310_v13 = vpop.permute.xlu0 %2309 }
 0xa7d   : > { %v2334_v18 = vsel %vm2333_vm14, %v2330_v16, %v2310_v13 }
 0xa80   : > { %v2312_v62 = vpop.permute.xlu0 %2311 }
 0xa81   : > { %v2335_v53 = vsel %vm2333_vm14, %v2331_v19, %v2312_v62  ;;  %v5432_v19 = vld [vmem:[#allocation2 + $0x20] sm:$0x3] }
 0xa84   : > { %v2314_v17 = vpop.permute.xlu0 %2313 }
 0xa85   : > { %v2336_v27 = vsel %vm2333_vm14, %v2332_v33, %v2314_v17  ;;  %v5431_v17 = vld [vmem:[#allocation2 + $0x18] sm:$0xff] }
 0xa88   : > { %v2322_v42 = vpop.permute.xlu0 %2321 }
 0xa89   : > { %v2338_v7 = vsel %vm2337_vm15, %v2334_v18, %v2322_v42 }
 0xa8a   : > { %4936 = vmatmul.mubr.msk.f32.vlgmr.msra.gmra.mrb[46].mxu0 %vm1147_vm5, %v2338_v7 }
 0xa8b   : > { %4938 = vmatprep.mubr.msk.f32.mxu0 %vm5498_vm6, %v5499_v39 }
 0xa8c   : > { %v2324_v1 = vpop.permute.xlu0 %2323 }
 0xa8d   : > { %v2339_v22 = vsel %vm2337_vm15, %v2335_v53, %v2324_v1 }
 0xa8e   : > { %4939 = vmatmul.mubr.msk.f32.gmra.mrb[48].mxu0 %vm1147_vm5, %v2339_v22 }
 0xa8f   : > { %4941 = vmatprep.mubr.msk.f32.mxu0 %vm5498_vm6, %v5499_v39 }
 0xa90   : > { %v2326_v44 = vpop.permute.xlu1 %2325 }
 0xa91   : > { %v2340_v8 = vsel %vm2337_vm15, %v2336_v27, %v2326_v44  ;;  %v3544_v27 = vld [vmem:[%s6990_s19] sm:$0xff] }
 0xaa1   : > { %v3291_v12 = vpop.permute.xlu1 %3290 }
 0xaa2   : > { %v3323_v24 = vsel %vm1358_vm8, %v2565_v43, %v3291_v12 }
 0xaa5   : > { %v3293_v46 = vpop.permute.xlu0 %3292 }
 0xaa6   : > { %v3324_v56 = vsel %vm1358_vm8, %v6604_v29, %v3293_v46 }
 0xaad   : > { %v3303_v60 = vpop.permute.xlu1 %3302 }
 0xaae   : > { %v3326_v10 = vsel %vm2333_vm14, %v3323_v24, %v3303_v60 }
 0xab1   : > { %v3305_v63 = vpop.permute.xlu1 %3304 }
 0xab2   : > { %v3327_v57 = vsel %vm2333_vm14, %v3324_v56, %v3305_v63  ;;  %v3546_v56 = vld [vmem:[%s6990_s19 + $0x10] sm:$0xff] }
 0xab9   : > { %v3315_v5 = vpop.permute.xlu1 %3314 }
 0xaba   : > { %v3329_v9 = vsel %vm2337_vm15, %v3326_v10, %v3315_v5 }
 0xabb   : > { %v3335_v48 = vrot.slane %v3329_v9, 7 }
 0xabd   : > { %v3295_v37 = vpop.permute.xlu1 %3294  ;;  %v3317_v3 = vpop.permute.xlu0 %3316  ;;  %v3341_v59 = vsel %vm1503_vm13, %v2340_v8, %v3335_v48 }
 0xabe   : > { %v3330_v30 = vsel %vm2337_vm15, %v3327_v57, %v3317_v3  ;;  %4942 = vmatmul.mubr.msk.f32.gmra.mrb[50].mxu0 %vm1147_vm5, %v3341_v59  ;;  %v3325_v11 = vsel %vm1358_vm8, %v6606_v6, %v3295_v37  ;;  %v4437_v6 = vld [vmem:[%s6989_s1] ss:$0 sm:$0xff]  ;;  %v3547_v57 = vld [vmem:[%s6990_s19 + $0x18] sm:$0xff] }
 0xabf   : > { %v3336_v32 = vrot.slane %v3330_v30, 7  ;;  %4944 = vmatprep.mubr.msk.f32.mxu0 %vm5498_vm6, %v5499_v39  ;;  %v5139_v37 = vpack.c.bf16 %v3547_v57, %v3546_v56 }
 0xac1   : > { %v3307_v43 = vpop.permute.xlu0 %3306  ;;  %v3319_v41 = vpop.permute.xlu1 %3318  ;;  %v3337_v29 = vsel %vm1503_vm13, %v3335_v48, %v3336_v32  ;;  %v3545_v48 = vld [vmem:[%s6990_s19 + $0x8] sm:$0xff] }
 0xac2   : > { %v3328_v35 = vsel %vm2333_vm14, %v3325_v11, %v3307_v43  ;;  %4945 = vmatmul.mubr.msk.f32.gmra.mrb[52].mxu0 %vm1147_vm5, %v3337_v29  ;;  %v5136_v8 = vpack.c.bf16 %v3545_v48, %v3544_v27 }
 0xac3   : > { %v3331_v2 = vsel %vm2337_vm15, %v3328_v35, %v3319_v41  ;;  %4947 = vmatprep.mubr.msk.f32.mxu0 %vm5498_vm6, %v5499_v39 }
 0xac4   : > { %v3338_v20 = vrot.slane %v3331_v2, 7  ;;  %5137 = vmatpush3.bf16.msra.mxu1 %v5136_v8 }
 0xac5   : > { %5138 = vmatprep.subr.bf16.mxu1 %v5497_v36 }
 0xac6   : > { %v3339_v38 = vsel %vm1503_vm13, %v3336_v32, %v3338_v20 }
 0xac7   : > { %4948 = vmatmul.mubr.msk.f32.gmra.mrb[54].mxu0 %vm1147_vm5, %v3339_v38 }
 0xac8   : > { %5005 = vmatprep.mubr.msk.f32.mxu0 %vm5498_vm6, %v5499_v39  ;;  %5140 = vmatpush3.bf16.msra.mxu1 %v5139_v37 }
 0xb5d   : > { %v3432_v55 = vpop.f32.mrb[46].mxu0 }
 0xb5e   : > { %v3433_v51 = vadd.f32 %v4437_v6, %v3432_v55  ;;  %v4937_v4 = vpop.f32.mrb[47].mxu0 }
 0xb60   : > { %v6663_v14 = vadd.f32 %v5428_v15, %v3433_v51 }
 0xb61   : > { %v3437_v45 = vpop.f32.mrb[48].mxu0 }
 0xb62   : > { %v3438_v47 = vadd.f32 %v4437_v6, %v3437_v45  ;;  %v4940_v26 = vpop.f32.mrb[49].mxu0  ;;  %v3461_v31 = vsel %vm1147_vm5, %v6663_v14, 0.0 }
 0xb63   : > { %3462 = vadd.xlane.f32.xlu0 %v3461_v31 }
 0xb64   : > { %v6667_v21 = vadd.f32 %v5429_v34, %v3438_v47  ;;  %v3528_v34 = vsub.s32 2, %v5907_v49 }
 0xb66   : > { %v3464_v0 = vsel %vm1147_vm5, %v6667_v21, 0.0 }
 0xb67   : > { %3465 = vadd.xlane.f32.xlu1 %v3464_v0  ;;  %v3537_v0 = vsub.s32 3, %v5907_v49 }
 0xb91   : > { %v3442_v25 = vpop.f32.mrb[50].mxu0 }
 0xb92   : > { %v3443_v50 = vadd.f32 %v4437_v6, %v3442_v25  ;;  %v4943_v28 = vpop.f32.mrb[51].mxu0  ;;  %v5433_v25 = vld [vmem:[%s6981_s17] sm:$0xf]  ;;  %s6992_s17 = sld [smem:[#allocation39_spill]] }
 0xb94   : > { %v6671_v61 = vadd.f32 %v5430_v40, %v3443_v50  ;;  %v3529_v50 = vrot.slane %v5433_v25, %v3528_v34  ;;  %v3538_v40 = vrot.slane %v5433_v25, %v3537_v0  ;;  %v3809_v0 = vld [vmem:[%s6991_s8 + $0x70] sm:$0xff]  ;;  %v3810_v25 = vld [vmem:[%s6991_s8 + $0x78] sm:$0xff] }
 0xb95   : > { %v3447_v23 = vpop.f32.mrb[52].mxu0 }
 0xb96   : > { %v3448_v33 = vadd.f32 %v4437_v6, %v3447_v23  ;;  %v4946_v13 = vpop.f32.mrb[53].mxu0  ;;  %v3467_v62 = vsel %vm1147_vm5, %v6671_v61, 0.0 }
 0xb97   : > { %3468 = vadd.xlane.f32.xlu0 %v3467_v62 }
 0xb98   : > { %v6675_v16 = vadd.f32 %v5431_v17, %v3448_v33  ;;  %s6993_s12 = scalar_lea.vmem %s6992_s17, %s6982_s11  ;;  %s6996_s11 = sld [smem:[#allocation11_spill]] }
 0xb9a   : > { %v3452_v58 = vpop.f32.mrb[54].mxu0  ;;  %v3470_v18 = vsel %vm1147_vm5, %v6675_v16, 0.0 }
 0xb9b   : > { %v3453_v42 = vadd.f32 %v4437_v6, %v3452_v58  ;;  %3471 = vadd.xlane.f32.xlu0 %v3470_v18  ;;  %v4949_v7 = vpop.f32.mrb[55].mxu0 }
 0xb9d   : > { %v6679_v53 = vadd.f32 %v5432_v19, %v3453_v42 }
 0xb9e   : > { %p4450_p0 = scmp.ne.s32.totalorder %s6996_s11, 1 }
 0xb9f   : > { %v3473_v1 = vsel %vm1160_vm7, %v6679_v53, 0.0  ;;  %s6997_s28 = sld [smem:[#allocation31_spill]] (!%p4450_p0)  ;;  %s6998_s7 = sld [smem:[#allocation30_spill]] (!%p4450_p0)  ;;  %vm4124_vm8 = vcmask (!%p4450_p0), 392192   ;;  %vm4126_vm9 = vcmask (!%p4450_p0), 385024   ;;  %vm4129_vm10 = vcmask (!%p4450_p0), 392194  }
 0xba0   : > { %3474 = vadd.xlane.f32.xlu0 %v3473_v1  ;;  %s6999_s29 = sld [smem:[#allocation32_spill]] (!%p4450_p0) }
 0xbf0   : > { %v3463_v22 = vpop.xlane.xlu0 %3462 }
 0xbf1   : > { %v3476_v44 = vmul.f32 0.03125, %v3463_v22 }
 0xbf3   : > { %v3481_v12 = vsub.f32 %v6663_v14, %v3476_v44 }
 0xbf4   : > { %v3466_v60 = vpop.xlane.xlu1 %3465 }
 0xbf5   : > { %v3477_v63 = vmul.f32 0.03125, %v3466_v60  ;;  %v3486_v24 = vmul.f32 %v3481_v12, %v3481_v12 }
 0xbf7   : > { %v3482_v46 = vsub.f32 %v6667_v21, %v3477_v63  ;;  %v3491_v10 = vsel %vm1147_vm5, %v3486_v24, 0.0 }
 0xbf8   : > { %3492 = vadd.xlane.f32.xlu1 %v3491_v10 }
 0xbf9   : > { %v3487_v5 = vmul.f32 %v3482_v46, %v3482_v46 }
 0xbfb   : > { %v3494_v9 = vsel %vm1147_vm5, %v3487_v5, 0.0 }
 0xbfc   : > { %3495 = vadd.xlane.f32.xlu0 %v3494_v9 }
 0xc24   : > { %v3469_v3 = vpop.xlane.xlu0 %3468 }
 0xc25   : > { %v3478_v59 = vmul.f32 0.03125, %v3469_v3 }
 0xc27   : > { %v3483_v30 = vsub.f32 %v6671_v61, %v3478_v59  ;;  %v3795_v59 = vld [vmem:[%s6991_s8] sm:$0xff] }
 0xc28   : > { %v3472_v32 = vpop.xlane.xlu0 %3471 }
 0xc29   : > { %v3479_v11 = vmul.f32 0.03125, %v3472_v32  ;;  %v3488_v43 = vmul.f32 %v3483_v30, %v3483_v30 }
 0xc2b   : > { %v3484_v41 = vsub.f32 %v6675_v16, %v3479_v11  ;;  %v3497_v29 = vsel %vm1147_vm5, %v3488_v43, 0.0  ;;  %v3797_v11 = vld [vmem:[%s6991_s8 + $0x10] sm:$0xff]  ;;  %v3798_v43 = vld [vmem:[%s6991_s8 + $0x18] sm:$0xff] }
 0xc2c   : > { %3498 = vadd.xlane.f32.xlu1 %v3497_v29  ;;  %v3799_v29 = vld [vmem:[%s6991_s8 + $0x20] sm:$0xff] }
 0xc2d   : > { %v3475_v35 = vpop.xlane.xlu0 %3474  ;;  %v3489_v2 = vmul.f32 %v3484_v41, %v3484_v41 }
 0xc2e   : > { %v3480_v20 = vmul.f32 0.03125, %v3475_v35  ;;  %v3800_v35 = vld [vmem:[%s6991_s8 + $0x28] sm:$0xff] }
 0xc2f   : > { %v3500_v38 = vsel %vm1147_vm5, %v3489_v2, 0.0  ;;  %v5148_v2 = vpack.c.bf16 %v3800_v35, %v3799_v29 }
 0xc30   : > { %v3485_v6 = vsub.f32 %v6679_v53, %v3480_v20  ;;  %3501 = vadd.xlane.f32.xlu0 %v3500_v38  ;;  %v3801_v20 = vld [vmem:[%s6991_s8 + $0x30] sm:$0xff]  ;;  %v3802_v38 = vld [vmem:[%s6991_s8 + $0x38] sm:$0xff] }
 0xc32   : > { %v3490_v55 = vmul.f32 %v3485_v6, %v3485_v6 }
 0xc34   : > { %v3503_v51 = vsel %vm1160_vm7, %v3490_v55, 0.0  ;;  %v3803_v55 = vld [vmem:[%s6991_s8 + $0x40] sm:$0xff] }
 0xc35   : > { %3504 = vadd.xlane.f32.xlu1 %v3503_v51  ;;  %v3804_v51 = vld [vmem:[%s6991_s8 + $0x48] sm:$0xff] }
 0xc85   : > { %v3493_v4 = vpop.xlane.xlu1 %3492 }
 0xc86   : > { %v3506_v15 = vmul.f32 0.03125, %v3493_v4  ;;  %v5154_v4 = vpack.c.bf16 %v3804_v51, %v3803_v55 }
 0xc88   : > { %v3511_v45 = vadd.f32 1e-06, %v3506_v15  ;;  %v3805_v15 = vld [vmem:[%s6991_s8 + $0x50] sm:$0xff] }
 0xc89   : > { %v3496_v47 = vpop.xlane.xlu0 %3495 }
 0xc8a   : > { %5398 = vrsqrt.f32 %v3511_v45  ;;  %v3507_v26 = vmul.f32 0.03125, %v3496_v47  ;;  %v3806_v45 = vld [vmem:[%s6991_s8 + $0x58] sm:$0xff] }
 0xc8b   : > { %v5157_v47 = vpack.c.bf16 %v3806_v45, %v3805_v15 }
 0xc8c   : > { %v3512_v31 = vadd.f32 1e-06, %v3507_v26  ;;  %v3807_v26 = vld [vmem:[%s6991_s8 + $0x60] sm:$0xff] }
 0xc8e   : > { %5400 = vrsqrt.f32 %v3512_v31  ;;  %v3808_v31 = vld [vmem:[%s6991_s8 + $0x68] sm:$0xff] }
 0xc8f   : > { %v5160_v34 = vpack.c.bf16 %v3808_v31, %v3807_v26 }
 0xc94   : > { %v5399_v28 = vpop.eup %5398 }
 0xc95   : > { %v3521_v23 = vmul.f32 %v5399_v28, %v3481_v12  ;;  %v6742_v28 = vld [vmem:[%s6993_s12] ss:$0 sm:$0xff] }
 0xc97   : > { %v3530_v33 = vmul.f32 %v3529_v50, %v3521_v23 }
 0xc98   : > { %v5401_v13 = vpop.eup %5400 }
 0xc99   : > { %v3539_v62 = vadd.f32 %v3538_v40, %v3530_v33  ;;  %v3522_v17 = vmul.f32 %v5401_v13, %v3482_v46 }
 0xc9b   : > { %4959 = vmatmul.mubr.msk.f32.vlgmr.msra.gmra.mrb[60].mxu1 %vm1147_vm5, %v3539_v62  ;;  %v3531_v58 = vmul.f32 %v3529_v50, %v3522_v17 }
 0xc9c   : > { %4961 = vmatprep.mubr.msk.f32.mxu1 %vm5498_vm6, %v5499_v39 }
 0xc9d   : > { %v3540_v18 = vadd.f32 %v3538_v40, %v3531_v58 }
 0xc9f   : > { %4962 = vmatmul.mubr.msk.f32.gmra.mrb[62].mxu1 %vm1147_vm5, %v3540_v18 }
 0xca0   : > { %4964 = vmatprep.mubr.msk.f32.mxu1 %vm5498_vm6, %v5499_v39 }
 0xcb9   : > { %v3499_v42 = vpop.xlane.xlu1 %3498 }
 0xcba   : > { %v3508_v7 = vmul.f32 0.03125, %v3499_v42 }
 0xcbc   : > { %v3513_v19 = vadd.f32 1e-06, %v3508_v7 }
 0xcbd   : > { %v3502_v1 = vpop.xlane.xlu0 %3501 }
 0xcbe   : > { %5402 = vrsqrt.f32 %v3513_v19  ;;  %v3509_v22 = vmul.f32 0.03125, %v3502_v1 }
 0xcc0   : > { %v3514_v44 = vadd.f32 1e-06, %v3509_v22 }
 0xcc2   : > { %5404 = vrsqrt.f32 %v3514_v44  ;;  %v3505_v12 = vpop.xlane.xlu1 %3504 }
 0xcc3   : > { %v3510_v60 = vmul.f32 0.03125, %v3505_v12 }
 0xcc5   : > { %v3515_v63 = vadd.f32 1e-06, %v3510_v60 }
 0xcc7   : > { %5406 = vrsqrt.f32 %v3515_v63 }
 0xcc8   : > { %v5403_v24 = vpop.eup %5402 }
 0xcc9   : > { %v3523_v46 = vmul.f32 %v5403_v24, %v3483_v30  ;;  %v3796_v30 = vld [vmem:[%s6991_s8 + $0x8] sm:$0xff] }
 0xcca   : > { %v5142_v32 = vpack.c.bf16 %v3796_v30, %v3795_v59 }
 0xccb   : > { %v3532_v10 = vmul.f32 %v3529_v50, %v3523_v46 }
 0xccc   : > { %v5405_v5 = vpop.eup %5404  ;;  %5143 = vmatpush3.bf16.msra.mxu0 %v5142_v32 }
 0xccd   : > { %v3541_v9 = vadd.f32 %v3538_v40, %v3532_v10  ;;  %v3524_v27 = vmul.f32 %v5405_v5, %v3484_v41  ;;  %5144 = vmatprep.subr.bf16.mxu0 %v5497_v36  ;;  %v5145_v41 = vpack.c.bf16 %v3798_v43, %v3797_v11 }
 0xccf   : > { %4965 = vmatmul.mubr.msk.f32.gmra.mrb[64].mxu1 %vm1147_vm5, %v3541_v9  ;;  %v3533_v48 = vmul.f32 %v3529_v50, %v3524_v27 }
 0xcd0   : > { %4967 = vmatprep.mubr.msk.f32.mxu1 %vm5498_vm6, %v5499_v39  ;;  %5146 = vmatpush3.bf16.msra.mxu0 %v5145_v41 }
 0xcd1   : > { %v5407_v8 = vpop.eup %5406  ;;  %v3542_v56 = vadd.f32 %v3538_v40, %v3533_v48  ;;  %5147 = vmatprep.subr.bf16.mxu0 %v5497_v36 }
 0xcd2   : > { %v3525_v57 = vmul.f32 %v5407_v8, %v3485_v6  ;;  %v5151_v6 = vpack.c.bf16 %v3802_v38, %v3801_v20 }
 0xcd3   : > { %4968 = vmatmul.mubr.msk.f32.gmra.mrb[66].mxu1 %vm1147_vm5, %v3542_v56 }
 0xcd4   : > { %4970 = vmatprep.mubr.msk.f32.mxu1 %vm5498_vm6, %v5499_v39  ;;  %v3534_v37 = vmul.f32 %v3529_v50, %v3525_v57  ;;  %5149 = vmatpush3.bf16.msra.mxu0 %v5148_v2  ;;  %v5163_v50 = vpack.c.bf16 %v3810_v25, %v3809_v0 }
 0xcd5   : > { %5150 = vmatprep.subr.bf16.mxu0 %v5497_v36 }
 0xcd6   : > { %v3543_v3 = vadd.f32 %v3538_v40, %v3534_v37 }
 0xcd8   : > { %4971 = vmatmul.mubr.msk.f32.gmra.mrb[68].mxu1 %vm1147_vm5, %v3543_v3  ;;  %5152 = vmatpush3.bf16.msra.mxu0 %v5151_v6 }
 0xcd9   : > { %5153 = vmatprep.subr.bf16.mxu0 %v5497_v36 }
 0xcdc   : > { %5155 = vmatpush3.bf16.msra.mxu0 %v5154_v4 }
 0xcdd   : > { %5156 = vmatprep.subr.bf16.mxu0 %v5497_v36 }
 0xce0   : > { %5158 = vmatpush3.bf16.msra.mxu0 %v5157_v47 }
 0xce1   : > { %5159 = vmatprep.subr.bf16.mxu0 %v5497_v36 }
 0xce4   : > { %5161 = vmatpush3.bf16.msra.mxu0 %v5160_v34 }
 0xce5   : > { %5162 = vmatprep.subr.bf16.mxu0 %v5497_v36 }
 0xce8   : > { %5164 = vmatpush3.bf16.msra.mxu0 %v5163_v50 }
 0xd6e   : > { %v3636_v40 = vpop.f32.mrb[60].mxu1 }
 0xd6f   : > { %v3637_v23 = vadd.f32 %v6742_v28, %v3636_v40  ;;  %v4960_v33 = vpop.f32.mrb[61].mxu1 }
 0xd71   : > { %v3665_v13 = vmul.f32 0.70710677, %v3637_v23  ;;  %v3660_v26 = vmul.f32 0.5, %v3637_v23 }
 0xd72   : > { %v3641_v62 = vpop.f32.mrb[62].mxu1 }
 0xd73   : > { %v3670_v17 = vand.u32 2147483647, %v3665_v13  ;;  %v3642_v58 = vadd.f32 %v6742_v28, %v3641_v62  ;;  %v4963_v36 = vpop.f32.mrb[63].mxu1  ;;  %vm3770_vm0 = vcmp.ge.f32.partialorder %v3665_v13, 0.0 }
 0xd75   : > { %v3675_v18 = vmul.f32 0.3275911, %v3670_v17  ;;  %v3666_v42 = vmul.f32 0.70710677, %v3642_v58  ;;  %v3740_v44 = vsub.f32 0.0, %v3670_v17  ;;  %v3661_v50 = vmul.f32 0.5, %v3642_v58 }
 0xd77   : > { %v3680_v7 = vadd.f32 1.0, %v3675_v18  ;;  %v3671_v19 = vand.u32 2147483647, %v3666_v42  ;;  %v3745_v60 = vmul.f32 %v3740_v44, %v3670_v17  ;;  %vm3771_vm1 = vcmp.ge.f32.partialorder %v3666_v42, 0.0 }
 0xd79   : > { %5408 = vrcp.f32 %v3680_v7  ;;  %v3676_v1 = vmul.f32 0.3275911, %v3671_v19  ;;  %v3741_v63 = vsub.f32 0.0, %v3671_v19  ;;  %v3750_v5 = vmul.f32 1.442695, %v3745_v60 }
 0xd7b   : > { %v3681_v22 = vadd.f32 1.0, %v3676_v1  ;;  %v3746_v9 = vmul.f32 %v3741_v63, %v3671_v19 }
 0xd7d   : > { %5410 = vrcp.f32 %v3681_v22  ;;  %v3752_v57 = vmul.f32 1.442695, %v3746_v9 }
 0xd7e   : > { %5412 = vpow2.f32 %v3750_v5 }
 0xd7f   : > { %5414 = vpow2.f32 %v3752_v57 }
 0xd83   : > { %v5409_v12 = vpop.eup %5408 }
 0xd84   : > { %v3695_v24 = vmul.f32 1.0614054, %v5409_v12 }
 0xd86   : > { %v3700_v46 = vadd.f32 -1.4531521, %v3695_v24 }
 0xd87   : > { %v5411_v10 = vpop.eup %5410 }
 0xd88   : > { %v3705_v27 = vmul.f32 %v5409_v12, %v3700_v46  ;;  %v3696_v48 = vmul.f32 1.0614054, %v5411_v10  ;;  %v5413_v2 = vpop.eup %5412 }
 0xd89   : > { %v5415_v51 = vpop.eup %5414 }
 0xd8a   : > { %v3710_v8 = vadd.f32 1.4214138, %v3705_v27  ;;  %v3701_v56 = vadd.f32 -1.4531521, %v3696_v48 }
 0xd8c   : > { %v3715_v37 = vmul.f32 %v5409_v12, %v3710_v8  ;;  %v3706_v3 = vmul.f32 %v5411_v10, %v3701_v56 }
 0xd8e   : > { %v3720_v59 = vadd.f32 -0.28449672, %v3715_v37  ;;  %v3711_v30 = vadd.f32 1.4214138, %v3706_v3 }
 0xd90   : > { %v3725_v32 = vmul.f32 %v5409_v12, %v3720_v59  ;;  %v3716_v11 = vmul.f32 %v5411_v10, %v3711_v30 }
 0xd92   : > { %v3730_v43 = vadd.f32 0.2548296, %v3725_v32  ;;  %v3721_v41 = vadd.f32 -0.28449672, %v3716_v11 }
 0xd94   : > { %v3735_v29 = vmul.f32 %v5409_v12, %v3730_v43  ;;  %v3726_v35 = vmul.f32 %v5411_v10, %v3721_v41 }
 0xd96   : > { %v3760_v20 = vmul.f32 %v5413_v2, %v3735_v29  ;;  %v3731_v38 = vadd.f32 0.2548296, %v3726_v35 }
 0xd98   : > { %v3765_v6 = vsub.f32 1.0, %v3760_v20  ;;  %v3736_v55 = vmul.f32 %v5411_v10, %v3731_v38 }
 0xd9a   : > { %v3775_v4 = vsub.f32 0.0, %v3765_v6  ;;  %v3761_v15 = vmul.f32 %v5415_v51, %v3736_v55 }
 0xd9c   : > { %v3780_v45 = vsel %vm3770_vm0, %v3765_v6, %v3775_v4  ;;  %v3766_v47 = vsub.f32 1.0, %v3761_v15 }
 0xd9d   : > { %v3785_v31 = vadd.f32 1.0, %v3780_v45 }
 0xd9e   : > { %v3776_v34 = vsub.f32 0.0, %v3766_v47 }
 0xd9f   : > { %v3790_v0 = vmul.f32 %v3785_v31, %v3660_v26 }
 0xda0   : > { %v3781_v25 = vsel %vm3771_vm1, %v3766_v47, %v3776_v34 }
 0xda1   : > { %5006 = vmatmul.mubr.f32.vlgmr.msra.gmra.mrb[56].mxu0 %v3790_v0  ;;  %v3786_v40 = vadd.f32 1.0, %v3781_v25 }
 0xda2   : > { %v3646_v33 = vpop.f32.mrb[64].mxu1  ;;  %5008 = vmatprep.mubr.msk.f32.mxu0 %vm5498_vm6, %v5499_v39 }
 0xda3   : > { %v6749_v62 = vadd.f32 %v6742_v28, %v3646_v33  ;;  %v4966_v17 = vpop.f32.mrb[65].mxu1  ;;  %v3791_v13 = vmul.f32 %v3786_v40, %v3661_v50 }
 0xda5   : > { %v6752_v36 = vmul.f32 0.70710677, %v6749_v62  ;;  %5009 = vmatmul.mubr.f32.gmra.mrb[58].mxu0 %v3791_v13 }
 0xda6   : > { %v3651_v23 = vpop.f32.mrb[66].mxu1  ;;  %5011 = vmatprep.mubr.msk.f32.mxu0 %vm5498_vm6, %v5499_v39 }
 0xda7   : > { %v3672_v58 = vand.u32 2147483647, %v6752_v36  ;;  %v6758_v18 = vadd.f32 %v6742_v28, %v3651_v23  ;;  %v4969_v42 = vpop.f32.mrb[67].mxu1  ;;  %vm3772_vm2 = vcmp.ge.f32.partialorder %v6752_v36, 0.0 }
 0xda9   : > { %v3677_v7 = vmul.f32 0.3275911, %v3672_v58  ;;  %v6761_v19 = vmul.f32 0.70710677, %v6758_v18  ;;  %v3742_v9 = vsub.f32 0.0, %v3672_v58 }
 0xdab   : > { %v3682_v1 = vadd.f32 1.0, %v3677_v7  ;;  %v3673_v22 = vand.u32 2147483647, %v6761_v19  ;;  %v3656_v44 = vpop.f32.mrb[68].mxu1  ;;  %v3747_v8 = vmul.f32 %v3742_v9, %v3672_v58  ;;  %vm3773_vm3 = vcmp.ge.f32.partialorder %v6761_v19, 0.0 }
 0xdac   : > { %v6765_v12 = vadd.f32 %v6742_v28, %v3656_v44  ;;  %v4972_v60 = vpop.f32.mrb[69].mxu1 }
 0xdad   : > { %5416 = vrcp.f32 %v3682_v1  ;;  %v3678_v63 = vmul.f32 0.3275911, %v3673_v22  ;;  %v3743_v56 = vsub.f32 0.0, %v3673_v22  ;;  %v3754_v3 = vmul.f32 1.442695, %v3747_v8 }
 0xdae   : > { %v6768_v24 = vmul.f32 0.70710677, %v6765_v12  ;;  %v3664_v19 = vmul.f32 0.5, %v6765_v12 }
 0xdaf   : > { %v3683_v46 = vadd.f32 1.0, %v3678_v63  ;;  %v3748_v59 = vmul.f32 %v3743_v56, %v3673_v22 }
 0xdb0   : > { %v3674_v10 = vand.u32 2147483647, %v6768_v24  ;;  %vm3774_vm4 = vcmp.ge.f32.partialorder %v6768_v24, 0.0 }
 0xdb1   : > { %5418 = vrcp.f32 %v3683_v46  ;;  %v3756_v29 = vmul.f32 1.442695, %v3748_v59 }
 0xdb2   : > { %v3679_v5 = vmul.f32 0.3275911, %v3674_v10  ;;  %v3744_v30 = vsub.f32 0.0, %v3674_v10 }
 0xdb4   : > { %v3684_v27 = vadd.f32 1.0, %v3679_v5  ;;  %v3749_v2 = vmul.f32 %v3744_v30, %v3674_v10  ;;  %v3662_v10 = vmul.f32 0.5, %v6749_v62 }
 0xdb6   : > { %5420 = vrcp.f32 %v3684_v27  ;;  %v3758_v15 = vmul.f32 1.442695, %v3749_v2 }
 0xdb7   : > { %v5417_v48 = vpop.eup %5416  ;;  %5422 = vpow2.f32 %v3754_v3 }
 0xdb8   : > { %v3697_v57 = vmul.f32 1.0614054, %v5417_v48  ;;  %5424 = vpow2.f32 %v3756_v29 }
 0xdb9   : > { %5426 = vpow2.f32 %v3758_v15 }
 0xdba   : > { %v3702_v28 = vadd.f32 -1.4531521, %v3697_v57 }
 0xdbb   : > { %v5419_v37 = vpop.eup %5418 }
 0xdbc   : > { %v3707_v32 = vmul.f32 %v5417_v48, %v3702_v28  ;;  %v3698_v11 = vmul.f32 1.0614054, %v5419_v37  ;;  %v3663_v28 = vmul.f32 0.5, %v6758_v18  ;;  %v4449_v18 = vld [vmem:[%s6995_s0] ss:$0 sm:$0xff] }
 0xdbe   : > { %v3712_v43 = vadd.f32 1.4214138, %v3707_v32  ;;  %v3703_v41 = vadd.f32 -1.4531521, %v3698_v11 }
 0xdc0   : > { %v5421_v35 = vpop.eup %5420  ;;  %v3717_v20 = vmul.f32 %v5417_v48, %v3712_v43  ;;  %v3708_v38 = vmul.f32 %v5419_v37, %v3703_v41 }
 0xdc1   : > { %v3699_v6 = vmul.f32 1.0614054, %v5421_v35  ;;  %v5423_v40 = vpop.eup %5422 }
 0xdc2   : > { %v3722_v55 = vadd.f32 -0.28449672, %v3717_v20  ;;  %v3713_v51 = vadd.f32 1.4214138, %v3708_v38  ;;  %v5425_v7 = vpop.eup %5424 }
 0xdc3   : > { %v3704_v4 = vadd.f32 -1.4531521, %v3699_v6  ;;  %v5427_v27 = vpop.eup %5426 }
 0xdc4   : > { %v3727_v45 = vmul.f32 %v5417_v48, %v3722_v55  ;;  %v3718_v47 = vmul.f32 %v5419_v37, %v3713_v51 }
 0xdc5   : > { %v3709_v26 = vmul.f32 %v5421_v35, %v3704_v4 }
 0xdc6   : > { %v3732_v31 = vadd.f32 0.2548296, %v3727_v45  ;;  %v3723_v34 = vadd.f32 -0.28449672, %v3718_v47 }
 0xdc7   : > { %v3714_v0 = vadd.f32 1.4214138, %v3709_v26 }
 0xdc8   : > { %v3737_v25 = vmul.f32 %v5417_v48, %v3732_v31  ;;  %v3728_v50 = vmul.f32 %v5419_v37, %v3723_v34 }
 0xdc9   : > { %v3719_v33 = vmul.f32 %v5421_v35, %v3714_v0 }
 0xdca   : > { %v3762_v17 = vmul.f32 %v5423_v40, %v3737_v25  ;;  %v3733_v13 = vadd.f32 0.2548296, %v3728_v50 }
 0xdcb   : > { %v3724_v23 = vadd.f32 -0.28449672, %v3719_v33 }
 0xdcc   : > { %v3767_v58 = vsub.f32 1.0, %v3762_v17  ;;  %v3738_v42 = vmul.f32 %v5419_v37, %v3733_v13 }
 0xdcd   : > { %v3729_v1 = vmul.f32 %v5421_v35, %v3724_v23 }
 0xdce   : > { %v3777_v22 = vsub.f32 0.0, %v3767_v58  ;;  %v3763_v44 = vmul.f32 %v5425_v7, %v3738_v42 }
 0xdcf   : > { %v3734_v60 = vadd.f32 0.2548296, %v3729_v1 }
 0xdd0   : > { %v3782_v63 = vsel %vm3772_vm2, %v3767_v58, %v3777_v22  ;;  %v3768_v46 = vsub.f32 1.0, %v3763_v44 }
 0xdd1   : > { %v3787_v5 = vadd.f32 1.0, %v3782_v63  ;;  %v3739_v9 = vmul.f32 %v5421_v35, %v3734_v60 }
 0xdd2   : > { %v3778_v48 = vsub.f32 0.0, %v3768_v46 }
 0xdd3   : > { %v3792_v8 = vmul.f32 %v3787_v5, %v3662_v10  ;;  %v3764_v56 = vmul.f32 %v5427_v27, %v3739_v9 }
 0xdd4   : > { %v3783_v57 = vsel %vm3773_vm3, %v3768_v46, %v3778_v48 }
 0xdd5   : > { %5012 = vmatmul.mubr.f32.gmra.mrb[60].mxu0 %v3792_v8  ;;  %v3788_v37 = vadd.f32 1.0, %v3783_v57  ;;  %v3769_v36 = vsub.f32 1.0, %v3764_v56  ;;  %v4006_v57 = vld [vmem:[%s6997_s28] sm:$0xff] (!%p4450_p0) }
 0xdd6   : > { %5014 = vmatprep.mubr.msk.f32.mxu0 %vm5498_vm6, %v5499_v39 }
 0xdd7   : > { %v3793_v3 = vmul.f32 %v3788_v37, %v3663_v28  ;;  %v3779_v62 = vsub.f32 0.0, %v3769_v36  ;;  %v4007_v28 = vld [vmem:[%s6997_s28 + $0x8] sm:$0xff] (!%p4450_p0) }
 0xdd8   : > { %v5166_v37 = vpack.c.bf16 (!%p4450_p0), %v4007_v28, %v4006_v57 }
 0xdd9   : > { %5015 = vmatmul.mubr.f32.gmra.mrb[62].mxu0 %v3793_v3  ;;  %v3784_v59 = vsel %vm3774_vm4, %v3769_v36, %v3779_v62  ;;  %v4008_v36 = vld [vmem:[%s6997_s28 + $0x10] sm:$0xff] (!%p4450_p0)  ;;  %v4009_v3 = vld [vmem:[%s6997_s28 + $0x18] sm:$0xff] (!%p4450_p0)  ;;  %v5514_v62 = vmov (!%p4450_p0), 0.0|0.0  }
 0xdda   : > { %5017 = vmatprep.mubr.msk.f32.mxu0 %vm5498_vm6, %v5499_v39  ;;  %v3789_v30 = vadd.f32 1.0, %v3784_v59  ;;  %5165 = vmatprep.subr.bf16.mxu0 (!%p4450_p0), %v5514_v62  ;;  %v5169_v59 = vpack.c.bf16 (!%p4450_p0), %v4009_v3, %v4008_v36  ;;  %vm5515_vm6 = vmmov (!%p4450_p0), 0  }
 0xddb   : > { %5171 = vmatprep.subr.bf16.mxu1 (!%p4450_p0), %v5514_v62  ;;  %5167 = vmatpush3.bf16.msra.mxu0 (!%p4450_p0), %v5166_v37 }
 0xddc   : > { %v3794_v32 = vmul.f32 %v3789_v30, %v3664_v19  ;;  %5173 = vmatpush3.bf16.msra.mxu1 (!%p4450_p0), %v5166_v37  ;;  %5168 = vmatprep.subr.bf16.mxu0 (!%p4450_p0), %v5514_v62  ;;  %v5516_v19 = vmov (!%p4450_p0), 0.0  }
 0xddd   : > { %5172 = vmatprep.subr.bf16.mxu1 (!%p4450_p0), %v5514_v62  ;;  %5037 = vmatprep.mubr.msk.f32.mxu1 (!%p4450_p0), %vm5515_vm6, %v5516_v19 }
 0xdde   : > { %5018 = vmatmul.mubr.f32.gmra.mrb[64].mxu0 %v3794_v32 }
 0xddf   : > { %5028 = vmatprep.mubr.msk.f32.mxu0 (!%p4450_p0), %vm5515_vm6, %v5516_v19  ;;  %5170 = vmatpush3.bf16.msra.mxu0 (!%p4450_p0), %v5169_v59 }
 0xde0   : > { %5174 = vmatpush3.bf16.msra.mxu1 (!%p4450_p0), %v5169_v59 }
 0xe74   : > { %v3884_v11 = vpop.f32.mrb[56].mxu0 }
 0xe75   : > { %v3885_v43 = vadd.f32 %v4449_v18, %v3884_v11  ;;  %v5007_v41 = vpop.f32.mrb[57].mxu0 }
 0xe77   : > { %v3908_v24 = vadd.f32 %v3885_v43, %v6663_v14 }
 0xe78   : > { %v3889_v29 = vpop.f32.mrb[58].mxu0 }
 0xe79   : > { %3913 = vst.msk [vmem:[#allocation2] sm:$0xff] %vm1147_vm5, %v3908_v24  ;;  %v3890_v12 = vadd.f32 %v4449_v18, %v3889_v29  ;;  %v5010_v35 = vpop.f32.mrb[59].mxu0 }
 0xe7b   : > { %v3909_v39 = vadd.f32 %v3890_v12, %v6667_v21 }
 0xe7d   : > { %3914 = vst.msk [vmem:[#allocation2 + $0x8] sm:$0xff] %vm1147_vm5, %v3909_v39 }
 0xea8   : > { %v3894_v2 = vpop.f32.mrb[60].mxu0 }
 0xea9   : > { %v3895_v20 = vadd.f32 %v4449_v18, %v3894_v2  ;;  %v5013_v38 = vpop.f32.mrb[61].mxu0 }
 0xeab   : > { %v3910_v6 = vadd.f32 %v3895_v20, %v6671_v61  ;;  %v3923_v61 = vsel (!%p4450_p0), %vm1147_vm5, %v3908_v24, 0.0 }
 0xeac   : > { %v3899_v55 = vpop.f32.mrb[62].mxu0  ;;  %3924 = vadd.xlane.f32.xlu0 (!%p4450_p0), %v3923_v61 }
 0xead   : > { %3915 = vst.msk [vmem:[#allocation2 + $0x10] sm:$0xff] %vm1147_vm5, %v3910_v6  ;;  %v3900_v51 = vadd.f32 %v4449_v18, %v3899_v55  ;;  %v5016_v4 = vpop.f32.mrb[63].mxu0  ;;  %v3929_v31 = vsel (!%p4450_p0), %vm1147_vm5, %v3910_v6, 0.0  ;;  %v3922_v55 = vld [vmem:[%s6998_s7] sm:$0x3] (!%p4450_p0) }
 0xeaf   : > { %v3911_v14 = vadd.f32 %v3900_v51, %v6675_v16  ;;  %v3926_v16 = vsel (!%p4450_p0), %vm1147_vm5, %v3909_v39, 0.0  ;;  %v3991_v51 = vrot.slane (!%p4450_p0), %v3922_v55, %v1217_v52 }
 0xeb0   : > { %3921 = sbr.rel (%p4450_p0) target bundleno = 4296 (0x10c8), region = 96  ;;  %3927 = vadd.xlane.f32.xlu0 (!%p4450_p0), %v3926_v16 }
 0xeb1   : > { %3916 = vst.msk [vmem:[#allocation2 + $0x18] sm:$0xff] %vm1147_vm5, %v3911_v14  ;;  %v3904_v15 = vpop.f32.mrb[64].mxu0  ;;  %v3932_v26 = vsel (!%p4450_p0), %vm1147_vm5, %v3911_v14, 0.0 }
 0xeb2   : > { %v3905_v45 = vadd.f32 %v4449_v18, %v3904_v15  ;;  %v5019_v47 = vpop.f32.mrb[65].mxu0  ;;  %3933 = vadd.xlane.f32.xlu1 (!%p4450_p0), %v3932_v26  ;;  %v4000_v15 = vrot.slane (!%p4450_p0), %v3922_v55, %v1226_v54 }
 0xeb4   : > { %v3912_v21 = vadd.f32 %v3905_v45, %v6679_v53 }
 0xeb6   : > { %3917 = vst.msk [vmem:[#allocation2 + $0x20] sm:$0x3] %vm1160_vm7, %v3912_v21  ;;  %3930 = vadd.xlane.f32.xlu1 (!%p4450_p0), %v3929_v31  ;;  %v3935_v34 = vsel (!%p4450_p0), %vm1160_vm7, %v3912_v21, 0.0 }
 0xeb7   : > { %3936 = vadd.xlane.f32.xlu0 %v3935_v34 }
 0xf39   : > { %v3925_v53 = vpop.xlane.xlu0 %3924 }
 0xf3a   : > { %v3938_v25 = vmul.f32 0.03125, %v3925_v53 }
 0xf3c   : > { %v6802_v40 = vsub.f32 %v3908_v24, %v3938_v25 }
 0xf3d   : > { %v3928_v17 = vpop.xlane.xlu0 %3927 }
 0xf3e   : > { %v3939_v23 = vmul.f32 0.03125, %v3928_v17  ;;  %v3948_v42 = vmul.f32 %v6802_v40, %v6802_v40 }
 0xf3f   : > { %v3934_v0 = vpop.xlane.xlu1 %3933 }
 0xf40   : > { %v3941_v50 = vmul.f32 0.03125, %v3934_v0  ;;  %v6810_v1 = vsub.f32 %v3909_v39, %v3939_v23  ;;  %v3953_v44 = vsel %vm1147_vm5, %v3948_v42, 0.0 }
 0xf41   : > { %3954 = vadd.xlane.f32.xlu1 %v3953_v44 }
 0xf42   : > { %v6804_v33 = vsub.f32 %v3911_v14, %v3941_v50  ;;  %v3949_v10 = vmul.f32 %v6810_v1, %v6810_v1 }
 0xf43   : > { %v3931_v13 = vpop.xlane.xlu1 %3930 }
 0xf44   : > { %v3940_v58 = vmul.f32 0.03125, %v3931_v13  ;;  %v3951_v7 = vmul.f32 %v6804_v33, %v6804_v33  ;;  %v3937_v60 = vpop.xlane.xlu0 %3936  ;;  %v3956_v27 = vsel %vm1147_vm5, %v3949_v10, 0.0  ;;  %v4451_v13 = vld [vmem:[%s6999_s29] ss:$0 sm:$0xff] }
 0xf45   : > { %v3942_v63 = vmul.f32 0.03125, %v3937_v60  ;;  %3957 = vadd.xlane.f32.xlu0 %v3956_v27 }
 0xf46   : > { %v6812_v22 = vsub.f32 %v3910_v6, %v3940_v58  ;;  %v3962_v46 = vsel %vm1147_vm5, %v3951_v7, 0.0 }
 0xf47   : > { %v6820_v9 = vsub.f32 %v3912_v21, %v3942_v63  ;;  %3963 = vadd.xlane.f32.xlu1 %v3962_v46 }
 0xf48   : > { %v3950_v5 = vmul.f32 %v6812_v22, %v6812_v22 }
 0xf49   : > { %v3952_v8 = vmul.f32 %v6820_v9, %v6820_v9 }
 0xf4a   : > { %v3959_v48 = vsel %vm1147_vm5, %v3950_v5, 0.0 }
 0xf4b   : > { %v3965_v56 = vsel %vm1160_vm7, %v3952_v8, 0.0  ;;  %3960 = vadd.xlane.f32.xlu0 %v3959_v48  ;;  %vm4122_vm7 = vcmask 392193  }
 0xf4c   : > { %3966 = vadd.xlane.f32.xlu1 %v3965_v56 }
 0xfce   : > { %v3955_v30 = vpop.xlane.xlu1 %3954 }
 0xfcf   : > { %v3968_v32 = vmul.f32 0.03125, %v3955_v30 }
 0xfd1   : > { %v3973_v18 = vadd.f32 1e-06, %v3968_v32 }
 0xfd2   : > { %v3958_v43 = vpop.xlane.xlu0 %3957 }
 0xfd3   : > { %5434 = vrsqrt.f32 %v3973_v18  ;;  %v3969_v24 = vmul.f32 0.03125, %v3958_v43 }
 0xfd4   : > { %v3964_v11 = vpop.xlane.xlu1 %3963 }
 0xfd5   : > { %v3971_v41 = vmul.f32 0.03125, %v3964_v11  ;;  %v3974_v12 = vadd.f32 1e-06, %v3969_v24 }
 0xfd7   : > { %v3976_v29 = vadd.f32 1e-06, %v3971_v41 }
 0xfd8   : > { %v3961_v39 = vpop.xlane.xlu0 %3960 }
 0xfd9   : > { %v3967_v35 = vpop.xlane.xlu1 %3966  ;;  %5436 = vrsqrt.f32 %v3976_v29  ;;  %v3970_v20 = vmul.f32 0.03125, %v3961_v39 }
 0xfda   : > { %v3972_v2 = vmul.f32 0.03125, %v3967_v35  ;;  %5438 = vrsqrt.f32 %v3974_v12 }
 0xfdb   : > { %v3975_v6 = vadd.f32 1e-06, %v3970_v20 }
 0xfdc   : > { %v3977_v38 = vadd.f32 1e-06, %v3972_v2 }
 0xfdd   : > { %v5435_v4 = vpop.eup %5434 }
 0xfde   : > { %5440 = vrsqrt.f32 %v3977_v38  ;;  %v3983_v14 = vmul.f32 %v5435_v4, %v6802_v40 }
 0xfdf   : > { %5442 = vrsqrt.f32 %v3975_v6 }
 0xfe0   : > { %v3992_v45 = vmul.f32 %v3991_v51, %v3983_v14 }
 0xfe2   : > { %v4001_v61 = vadd.f32 %v4000_v15, %v3992_v45 }
 0xfe3   : > { %v5437_v47 = vpop.eup %5436 }
 0xfe4   : > { %v5439_v21 = vpop.eup %5438  ;;  %v3986_v26 = vmul.f32 %v5437_v47, %v6804_v33  ;;  %5029 = vmatmul.mubr.msk.f32.vlgmr.msra.gmra.mrb[0].mxu0 %vm1147_vm5, %v4001_v61 }
 0xfe5   : > { %v3984_v16 = vmul.f32 %v5439_v21, %v6810_v1  ;;  %5031 = vmatprep.mubr.msk.f32.mxu0 %vm5515_vm6, %v5516_v19 }
 0xfe6   : > { %v3995_v31 = vmul.f32 %v3991_v51, %v3986_v26 }
 0xfe7   : > { %v3993_v52 = vmul.f32 %v3991_v51, %v3984_v16 }
 0xfe8   : > { %v5441_v34 = vpop.eup %5440  ;;  %v4004_v0 = vadd.f32 %v4000_v15, %v3995_v31 }
 0xfe9   : > { %v5443_v53 = vpop.eup %5442  ;;  %v3987_v49 = vmul.f32 %v5441_v34, %v6820_v9  ;;  %v4002_v54 = vadd.f32 %v4000_v15, %v3993_v52 }
 0xfea   : > { %v3985_v25 = vmul.f32 %v5443_v53, %v6812_v22  ;;  %5038 = vmatmul.mubr.msk.f32.vlgmr.msra.gmra.mrb[0].mxu1 %vm1147_vm5, %v4004_v0 }
 0xfeb   : > { %v3996_v50 = vmul.f32 %v3991_v51, %v3987_v49  ;;  %5032 = vmatmul.mubr.msk.f32.gmra.mrb[2].mxu0 %vm1147_vm5, %v4002_v54  ;;  %5040 = vmatprep.mubr.msk.f32.mxu1 %vm5515_vm6, %v5516_v19 }
 0xfec   : > { %v3994_v40 = vmul.f32 %v3991_v51, %v3985_v25  ;;  %5034 = vmatprep.mubr.msk.f32.mxu0 %vm5515_vm6, %v5516_v19 }
 0xfed   : > { %v4005_v33 = vadd.f32 %v4000_v15, %v3996_v50 }
 0xfee   : > { %v4003_v17 = vadd.f32 %v4000_v15, %v3994_v40 }
 0xfef   : > { %5041 = vmatmul.mubr.msk.f32.gmra.mrb[2].mxu1 %vm1147_vm5, %v4005_v33 }
 0xff0   : > { %5035 = vmatmul.mubr.msk.f32.gmra.mrb[4].mxu0 %vm1147_vm5, %v4003_v17  ;;  %vm4132_vm5 = vcmask 386048  }
0x10b7   : > { %v4098_v23 = vpop.f32.mrb[0].mxu0 }
0x10b8   : > { %v4099_v58 = vadd.f32 %v4451_v13, %v4098_v23  ;;  %v5030_v42 = vpop.f32.mrb[1].mxu0 }
0x10ba   : > { %4123 = vst.msk [vmem:[#allocation6 - $0x1] sm:$0xfe] %vm4122_vm7, %v4099_v58 }
0x10bd   : > { %v4113_v7 = vpop.f32.mrb[0].mxu1 }
0x10be   : > { %v4103_v1 = vpop.f32.mrb[2].mxu0  ;;  %v4114_v22 = vadd.f32 %v4451_v13, %v4113_v7  ;;  %v5039_v44 = vpop.f32.mrb[1].mxu1 }
0x10bf   : > { %v4104_v60 = vadd.f32 %v4451_v13, %v4103_v1  ;;  %v5033_v63 = vpop.f32.mrb[3].mxu0 }
0x10c0   : > { %4131 = vst.msk [vmem:[#allocation6 + $0x16] sm:$0xff] %vm4124_vm8, %v4114_v22 }
0x10c1   : > { %4125 = vst.msk [vmem:[#allocation6 + $0x7] sm:$0xff] %vm4124_vm8, %v4104_v60 }
0x10c2   : > { %v4118_v46 = vpop.f32.mrb[2].mxu1 }
0x10c3   : > { %v4108_v10 = vpop.f32.mrb[4].mxu0  ;;  %v4119_v5 = vadd.f32 %v4451_v13, %v4118_v46  ;;  %v5042_v9 = vpop.f32.mrb[3].mxu1 }
0x10c4   : > { %v4109_v27 = vadd.f32 %v4451_v13, %v4108_v10  ;;  %v5036_v48 = vpop.f32.mrb[5].mxu0 }
0x10c5   : > { %4133 = vst.msk [vmem:[#allocation6 + $0x1e] sm:$0x3] %vm4132_vm5, %v4119_v5 }
0x10c6   : > { %4127 = vst.msk [vmem:[#allocation6 + $0xf] sm:$0x1] %vm4126_vm9, %v4109_v27 }
0x10c7   : > { %4130 = vst.msk [vmem:[#allocation6 + $0xe] sm:$0xfc] %vm4129_vm10, %v4109_v27 }
0x10c8 PF: > { %s7000_s27 = sld [smem:[#allocation11_spill]]  ;;  %s5517_s1 = smov [#allocation6]  }
0x10c9   : > { %s4140_s19 = sshll.u32 %s5517_s1, 4  ;;  %s4141_s19 = int_to_ptr.vmem [resolvable:$true] %s4140_s19 }
0x10ca   : > { %s5456_s8 = scalar_lea.vmem %s4141_s19, 512  ;;  %p5463_p5 = scmp.lt.s32.totalorder %s4141_s19, %s4141_s19 }
0x10cb   : > { %p5457_p2 = scmp.ne.s32.totalorder %s4141_s19, %s5456_s8  ;;  %p5464_p6 = scmp.lt.s32.totalorder %s5456_s8, %s5456_s8 }
0x10cd   : > { %p5465_p7 = por %p5464_p6, %p5463_p5 }
0x10ce   : > { %p5179_p1 = scmp.eq.s32.totalorder %s7000_s27, 1 }
0x10d0   : > { %p5458_p3 = pnand %p5457_p2, %p5179_p1 }
0x10d2   : > { %p5459_p4 = pneg %p5458_p3 }
0x10d4   : > { %p5466_p8 = pnand %p5465_p7, %p5459_p4 }
0x10d6   : > { %5469 = shalt.err (!%p5466_p8)
}
0x10d7   : > { %s7001_s17 = sld [smem:[#allocation42_spill]] }
0x10dd   : > { %s5470_s12 = scalar_lea.hbm %s7001_s17, 512 }
0x10de   : > { %p5471_p9 = scmp.ne.s32.totalorder %s7001_s17, %s5470_s12  ;;  %p5476_p12 = scmp.lt.u32.totalorder %s5470_s12, %s7001_s17 }
0x10e0   : > { %p5472_p10 = pnand %p5471_p9, %p5179_p1 }
0x10e2   : > { %p5473_p11 = pneg %p5472_p10 }
0x10e4   : > { %p5478_p13 = pnand %p5476_p12, %p5473_p11 }
0x10e6   : > { %5481 = shalt.err (!%p5478_p13)
}
0x10e7   : > { %s5518_s11 = smov 128  }
0x10e8   : > { %5176 = dma.vmem_to_hbm [thread:$0]  (%p5179_p1), %s4141_s19, 512, %s7001_s17, [#allocation7], %s5518_s11, %s5518_s11, %s5511_s26  }
0x10e9   : > { %5489 = dma.done.wait (%p5179_p1), [#allocation7], 512  }
0x10ea   : > { %5491 = vsyncadd (%p5179_p1), [#allocation7], 4294966784 }
0x10eb PF: > { %s7002_s13 = sld [smem:[#allocation10_spill]] }
0x10f1   : > { %s35_s19 = sadd.s32 1, %s7002_s13  }
0x10f2   : > { %p32_p0 = scmp.ge.s32.totalorder %s35_s19, 4  }
0x10f4   :  { %34 = sbr.rel (!%p32_p0) target bundleno = 25 (0x19), region = 181 }
0x10fb   :  { %4156 = vsyncpa [#allocation7], 1 }
0x10fc   :  { %4158 = vsyncpa [#allocation7 + $0x1], 1 }

</bundles_post_ra>
